<compile_context>
chip_gen: v6e
topology: v6e:2x2x1
jax: 0.10.0
libtpu: 0.0.40
codegen_flags: <defaults>
</compile_context>

<pallas_src>
import functools

import jax
import jax.numpy as jnp
from jax import lax
from jax.experimental import pallas as pl
from jax.experimental.pallas import tpu as pltpu

K = 4                      # all DCGAN_G layers use kernel_size=4
BN_EPS = 1e-5              # nn.BatchNorm2d default eps
COMPUTE_DTYPE = jnp.bfloat16          # MXU operand dtype
HIDDEN_DTYPE = jnp.bfloat16           # hidden-layer activation storage dtype
VMEM_LIMIT_BYTES = 32 * 1024 * 1024   # explicit scoped-VMEM cap (all gens safe)
VMEM_TILE_BUDGET = 20 * 1024 * 1024   # target double-buffered working set


def _round_up(x, m):
    return (x + m - 1) // m * m


def _pick_tile(dim, cap, quantum):
    """Largest t <= cap that divides dim with t % quantum == 0 (or t == dim)."""
    for t in range(min(cap, dim), 0, -1):
        if dim % t == 0 and (t % quantum == 0 or t == dim):
            return t
    return dim


def _tile_plan(m, kd, n, out_bytes):
    """Choose (tm, tn, tk) dividing (m, kd, n) exactly, within the VMEM budget."""
    tm = tn = tk = None
    for tm_cap, tn_cap, tk_cap in ((512, 1024, 2048), (256, 512, 1024), (128, 256, 512)):
        tm = _pick_tile(m, tm_cap, 8)
        tn = _pick_tile(n, tn_cap, 128)
        tk = _pick_tile(kd, tk_cap, 128)
        footprint = (2 * (tm * tk + tk * tn) * 2     # bf16 A / W tiles, double-buffered
                     + 2 * 2 * tn * 4                # scale + shift rows (f32)
                     + tm * tn * 4                   # f32 accumulator scratch
                     + 2 * tm * tn * out_bytes)      # output tile, double-buffered
        if footprint <= VMEM_TILE_BUDGET:
            break
    # v7x megacore: make sure at least one "parallel" grid axis has >= 2 blocks.
    if (m // tm) * (n // tn) < 2:
        if tn % 256 == 0:
            tn //= 2
        elif tm % 16 == 0:
            tm //= 2
    return tm, tn, tk


# ---------------------------------------------------------------------------
# Fused  act((A @ W) * scale + shift)  kernel
# ---------------------------------------------------------------------------
def _mm_bn_act_kernel(a_ref, w_ref, scale_ref, shift_ref, o_ref, acc_ref, *, act):
    k = pl.program_id(2)

    @pl.when(k == 0)
    def _():
        acc_ref[...] = jnp.zeros_like(acc_ref)

    acc_ref[...] += jnp.dot(a_ref[...], w_ref[...],
                            preferred_element_type=jnp.float32)

    @pl.when(k == pl.num_programs(2) - 1)
    def _():
        y = acc_ref[...] * scale_ref[...] + shift_ref[...]   # folded BatchNorm affine
        if act == "relu":
            y = jnp.maximum(y, 0.0)
        elif act == "tanh":
            y = jnp.tanh(y)
        o_ref[...] = y.astype(o_ref.dtype)


def fused_matmul_bn_act(a, w, scale, shift, *, act, out_dtype):
    """out = act((a @ w) * scale + shift); bf16 operands, f32 accumulation.

    `a`, `w` must already be bf16 and their dims divisible by the chosen tiles
    (the wrappers / pack_params guarantee this) so no runtime pad/cast passes
    are emitted here.
    """
    m, ka = a.shape
    kb, n = w.shape
    assert ka == kb and scale.shape == (1, n) and shift.shape == (1, n)
    tm, tn, tk = _tile_plan(m, ka, n, jnp.dtype(out_dtype).itemsize)

    return pl.pallas_call(
        functools.partial(_mm_bn_act_kernel, act=act),
        out_shape=jax.ShapeDtypeStruct((m, n), out_dtype),
        grid=(m // tm, n // tn, ka // tk),
        in_specs=[
            pl.BlockSpec((tm, tk), lambda i, j, k: (i, k)),
            pl.BlockSpec((tk, tn), lambda i, j, k: (k, j)),
            pl.BlockSpec((1, tn), lambda i, j, k: (0, j)),
            pl.BlockSpec((1, tn), lambda i, j, k: (0, j)),
        ],
        out_specs=pl.BlockSpec((tm, tn), lambda i, j, k: (i, j)),
        scratch_shapes=[pltpu.VMEM((tm, tn), jnp.float32)],
        compiler_params=pltpu.CompilerParams(
            dimension_semantics=("parallel", "parallel", "arbitrary"),
            vmem_limit_bytes=VMEM_LIMIT_BYTES),
    )(a, w, scale, shift)


# ---------------------------------------------------------------------------
# One-time weight repacking (runs eagerly at init, outside jit)
# ---------------------------------------------------------------------------
def _phase_weight(w):
    """(Cin, Cout, 4, 4) deconv weight -> (9*Cin, 4*Cout) combined-phase matrix.

    Row = window_pos(i*3+j)*Cin + cin over the 3x3 window of the 1-padded
    (un-dilated) input; col = phase(py*2+px)*Cout + cout.  Entry is the
    flipped sub-kernel tap when window position (i, j) belongs to that
    phase's 2x2 sub-kernel.
    # TODO(synk): 16/36 blocks are nonzero (2.25x structural-zero MXU work);
    # acceptable here since the network is HBM-bound, not MXU-bound.
    """
    cin, cout = w.shape[0], w.shape[1]
    rows = []
    for i in range(3):
        for j in range(3):
            cols = []
            for py in range(2):
                for px in range(2):
                    if (i - py) in (0, 1) and (j - px) in (0, 1):
                        a, b = 2 * i - py, 2 * j - px
                        cols.append(w[:, :, 3 - a, 3 - b])            # (Cin, Cout)
                    else:
                        cols.append(jnp.zeros((cin, cout), w.dtype))
            rows.append(jnp.concatenate(cols, axis=1))                # (Cin, 4*Cout)
    return jnp.concatenate(rows, axis=0)                              # (9*Cin, 4*Cout)


def _pack_layer(w, scale, shift, *, first):
    """Pre-pack one layer into a matmul-ready, (optionally) lane-padded bf16 form."""
    cin, cout = w.shape[0], w.shape[1]
    if first:                                   # 1x1 input, stride 1, pad 0
        w_mat = jnp.transpose(w, (0, 2, 3, 1)).reshape(cin, K * K * cout)
        s = jnp.tile(scale, K * K)
        b = jnp.tile(shift, K * K)
    else:                                       # stride-2 phase decomposition
        w_mat = _phase_weight(w)
        s = jnp.tile(scale, 4)
        b = jnp.tile(shift, 4)
    n = int(w_mat.shape[1])
    n_pad = _round_up(n, 128) if n >= 128 else n      # tiny-N layers stay unpadded
    w_mat = jnp.pad(w_mat, ((0, 0), (0, n_pad - n)))
    s = jnp.pad(s.astype(jnp.float32), (0, n_pad - n)).reshape(1, n_pad)
    b = jnp.pad(b.astype(jnp.float32), (0, n_pad - n)).reshape(1, n_pad)
    return {"w": w_mat.astype(COMPUTE_DTYPE), "scale": s, "shift": b}, (n, int(cout))


def pack_params(params):
    """Repack raw per-layer params once (outside jit). Returns (pytree, static meta)."""
    packed, meta = [], []
    for i, layer in enumerate(params):
        pk, mt = _pack_layer(layer["w"], layer["scale"], layer["shift"], first=(i == 0))
        packed.append(pk)
        meta.append(mt)
    return packed, tuple(meta)


# ---------------------------------------------------------------------------
# Forward pass
# ---------------------------------------------------------------------------
def _window3_im2col(h):
    """bf16 NHWC -> (B*H*W, 9*Cin) 3x3-window gather of the 1-padded input.
    # TODO(synk): fold this gather into the matmul kernel (row-slab + halo DMA
    # with memory_space=pl.ANY) to remove the remaining 9x HBM read
    # amplification of the materialized im2col buffer.
    """
    B, H, W, cin = h.shape
    hp = jnp.pad(h, ((0, 0), (1, 1), (1, 1), (0, 0)))
    cols = [hp[:, i:i + H, j:j + W, :] for i in range(3) for j in range(3)]
    return jnp.concatenate(cols, axis=-1).reshape(B * H * W, 9 * cin)


def dcgan_g_forward(x, packed, meta):
    """x: (B, noise_d) noise (PyTorch does x.view(-1, noise_d, 1, 1)). Returns NCHW f32."""
    B = x.shape[0]
    num_layers = len(packed)

    # Layer 1: ConvTranspose2d(nz, C, 4, stride=1, padding=0) on 1x1 == matmul.
    p, (n0, cout0) = packed[0], meta[0]
    y = fused_matmul_bn_act(x.astype(COMPUTE_DTYPE), p["w"], p["scale"], p["shift"],
                            act="relu", out_dtype=HIDDEN_DTYPE)
    if y.shape[1] != n0:
        y = y[:, :n0]
    h = y.reshape(B, K, K, cout0)

    # Layers 2..5: ConvTranspose2d(4, stride=2, pad=1) via phase decomposition.
    for idx in range(1, num_layers):
        p, (n, cout) = packed[idx], meta[idx]
        last = idx == num_layers - 1
        act = "tanh" if last else "relu"
        out_dtype = jnp.float32 if last else HIDDEN_DTYPE
        Bh, H, W, _ = h.shape
        y = fused_matmul_bn_act(_window3_im2col(h), p["w"], p["scale"], p["shift"],
                                act=act, out_dtype=out_dtype)
        if y.shape[1] != n:
            y = y[:, :n]
        # TODO(synk): this pixel-shuffle is still one HBM read+write of the
        # activation per layer; removing it needs a phase-packed layout chained
        # through the next layer's window gather.
        y = y.reshape(Bh, H, W, 2, 2, cout)
        h = jnp.transpose(y, (0, 1, 3, 2, 4, 5)).reshape(Bh, 2 * H, 2 * W, cout)

    return jnp.transpose(h, (0, 3, 1, 2)).astype(jnp.float32)   # NHWC -> NCHW


# ---------------------------------------------------------------------------
# Parameter init + pure-JAX reference
# ---------------------------------------------------------------------------
def init_params(key, noise_d, channels):
    # TODO(synk): BatchNorm2d is folded to eval-mode per-channel affine
    # (running stats); training-mode batch statistics are not computed in-kernel.
    params = []
    cin = noise_d
    for i, cout in enumerate(channels):
        key, kw, kg, kb, km, kv = jax.random.split(key, 6)
        w = 0.02 * jax.random.normal(kw, (cin, cout, K, K), jnp.float32)
        if i < len(channels) - 1:                            # last layer has no BN
            gamma = 1.0 + 0.1 * jax.random.normal(kg, (cout,), jnp.float32)
            beta = 0.1 * jax.random.normal(kb, (cout,), jnp.float32)
            mean = 0.05 * jax.random.normal(km, (cout,), jnp.float32)
            var = 1.0 + 0.1 * jax.random.uniform(kv, (cout,), jnp.float32)
            scale = gamma / jnp.sqrt(var + BN_EPS)
            shift = beta - mean * scale
        else:
            scale = jnp.ones((cout,), jnp.float32)
            shift = jnp.zeros((cout,), jnp.float32)
        params.append({"w": w, "scale": scale, "shift": shift})
        cin = cout
    return params


def _ref_forward(x, params, noise_d):
    """Pure-JAX reference (XLA transposed conv, same bf16 operand quantization)."""
    B = x.shape[0]
    cfg = [(1, 0, "relu"), (2, 1, "relu"), (2, 1, "relu"), (2, 1, "relu"), (2, 1, "tanh")]
    h = x.reshape(B, 1, 1, noise_d).astype(jnp.float32)
    for (stride, padding, act), layer in zip(cfg, params):
        w = layer["w"]
        rhs = jnp.transpose(w[:, :, ::-1, ::-1], (1, 0, 2, 3))   # OIHW, flipped
        pad = K - 1 - padding
        h = lax.conv_general_dilated(
            h.astype(COMPUTE_DTYPE), rhs.astype(COMPUTE_DTYPE),
            window_strides=(1, 1), padding=[(pad, pad), (pad, pad)],
            lhs_dilation=(stride, stride),
            dimension_numbers=("NHWC", "OIHW", "NHWC"),
            preferred_element_type=jnp.float32)
        h = h * layer["scale"] + layer["shift"]
        h = jnp.maximum(h, 0.0) if act == "relu" else jnp.tanh(h)
    return jnp.transpose(h, (0, 3, 1, 2))


if __name__ == "__main__":
    noise_d = 16
    batch = 2
    # Scaled-down channel widths for a small run (original module: 1024,512,256,128,1).
    channels = [64, 32, 16, 8, 1]

    key = jax.random.PRNGKey(0)
    kx, kp = jax.random.split(key)
    x = jax.random.normal(kx, (batch, noise_d), jnp.float32)
    params = init_params(kp, noise_d, channels)
    packed, meta = pack_params(params)          # one-time weight repacking (cached)

    fwd = jax.jit(dcgan_g_forward, static_argnums=2)
    out = jax.block_until_ready(fwd(x, packed, meta))
    assert out.shape == (batch, 1, 64, 64), out.shape
    assert out.dtype == jnp.float32

    ref = jax.block_until_ready(_ref_forward(x, params, noise_d))
    max_err = float(jnp.max(jnp.abs(out - ref)))
    assert jnp.allclose(out, ref, atol=2e-2, rtol=2e-2), max_err

    print("KERNEL_OK")
</pallas_src>

<mosaic_0001>
module attributes {stable_mosaic.version = 11 : i64} {
  func.func @_mm_bn_act_kernel(%arg0: i32, %arg1: i32, %arg2: i32, %arg3: memref<2x16xbf16, #tpu.memory_space<vmem>>, %arg4: memref<16x512xbf16, #tpu.memory_space<vmem>>, %arg5: memref<1x512xf32, #tpu.memory_space<vmem>>, %arg6: memref<1x512xf32, #tpu.memory_space<vmem>>, %arg7: memref<2x512xbf16, #tpu.memory_space<vmem>>, %arg8: memref<2x512xf32, #tpu.memory_space<vmem>>) attributes {dimension_semantics = [#tpu.dimension_semantics<parallel>, #tpu.dimension_semantics<parallel>, #tpu.dimension_semantics<arbitrary>], iteration_bounds = array<i64: 1, 2, 1>, scalar_prefetch = 0 : i64, scratch_operands = 1 : i64, tpu.core_type = #tpu.core_type<tc>, window_params = [{transform_indices = @transform_0, window_bounds = array<i64: 2, 16>}, {transform_indices = @transform_1, window_bounds = array<i64: 16, 512>}, {transform_indices = @transform_2, window_bounds = array<i64: 1, 512>}, {transform_indices = @transform_3, window_bounds = array<i64: 1, 512>}, {transform_indices = @transform_4, window_bounds = array<i64: 2, 512>}]} {
    %c0_i32 = arith.constant 0 : i32
    %0 = arith.cmpi eq, %arg2, %c0_i32 : i32
    %1 = arith.extui %0 : i1 to i32
    %c0_i32_0 = arith.constant 0 : i32
    %2 = arith.cmpi ne, %1, %c0_i32_0 : i32
    scf.if %2 {
      %cst_10 = arith.constant 0.000000e+00 : f32
      %12 = vector.broadcast %cst_10 : f32 to vector<2x512xf32>
      %c0_11 = arith.constant 0 : index
      %c0_12 = arith.constant 0 : index
      %13 = vector.load %arg8[%c0_11, %c0_12] : memref<2x512xf32, #tpu.memory_space<vmem>>, vector<2x512xf32>
      tpu.vector_store %arg8[%c0_11, %c0_12], %12 {strides = array<i32>} : memref<2x512xf32, #tpu.memory_space<vmem>>, vector<2x512xf32>,
    } else {
    }
    %c0 = arith.constant 0 : index
    %c0_1 = arith.constant 0 : index
    %3 = vector.load %arg8[%c0, %c0_1] : memref<2x512xf32, #tpu.memory_space<vmem>>, vector<2x512xf32>
    %c0_2 = arith.constant 0 : index
    %c0_3 = arith.constant 0 : index
    %4 = vector.load %arg3[%c0_2, %c0_3] : memref<2x16xbf16, #tpu.memory_space<vmem>>, vector<2x16xbf16>
    %c0_4 = arith.constant 0 : index
    %c0_5 = arith.constant 0 : index
    %5 = vector.load %arg4[%c0_4, %c0_5] : memref<16x512xbf16, #tpu.memory_space<vmem>>, vector<16x512xbf16>
    %cst = arith.constant dense<0.000000e+00> : vector<2x512xf32>
    %6 = tpu.matmul %4, %5, %cst {dimension_numbers = #tpu.dot_dimension_numbers<[1], [0], [0], [1], [0, 0, 1, 1], [], []>} : vector<2x16xbf16>, vector<16x512xbf16>, vector<2x512xf32> -> vector<2x512xf32>
    %7 = arith.addf %3, %6 : vector<2x512xf32>
    %c0_6 = arith.constant 0 : index
    %c0_7 = arith.constant 0 : index
    %8 = vector.load %arg8[%c0_6, %c0_7] : memref<2x512xf32, #tpu.memory_space<vmem>>, vector<2x512xf32>
    tpu.vector_store %arg8[%c0_6, %c0_7], %7 {strides = array<i32>} : memref<2x512xf32, #tpu.memory_space<vmem>>, vector<2x512xf32>,
    %c0_i32_8 = arith.constant 0 : i32
    %9 = arith.cmpi eq, %arg2, %c0_i32_8 : i32
    %10 = arith.extui %9 : i1 to i32
    %c0_i32_9 = arith.constant 0 : i32
    %11 = arith.cmpi ne, %10, %c0_i32_9 : i32
    scf.if %11 {
      %c0_10 = arith.constant 0 : index
      %c0_11 = arith.constant 0 : index
      %12 = vector.load %arg8[%c0_10, %c0_11] : memref<2x512xf32, #tpu.memory_space<vmem>>, vector<2x512xf32>
      %c0_12 = arith.constant 0 : index
      %c0_13 = arith.constant 0 : index
      %13 = vector.load %arg5[%c0_12, %c0_13] : memref<1x512xf32, #tpu.memory_space<vmem>>, vector<1x512xf32>
      %14 = vector.broadcast %13 : vector<1x512xf32> to vector<2x512xf32>
      %15 = arith.mulf %12, %14 : vector<2x512xf32>
      %c0_14 = arith.constant 0 : index
      %c0_15 = arith.constant 0 : index
      %16 = vector.load %arg6[%c0_14, %c0_15] : memref<1x512xf32, #tpu.memory_space<vmem>>, vector<1x512xf32>
      %17 = vector.broadcast %16 : vector<1x512xf32> to vector<2x512xf32>
      %18 = arith.addf %15, %17 : vector<2x512xf32>
      %cst_16 = arith.constant 0.000000e+00 : f32
      %19 = vector.broadcast %cst_16 : f32 to vector<2x512xf32>
      %20 = arith.maximumf %18, %19 : vector<2x512xf32>
      %21 = arith.truncf %20 : vector<2x512xf32> to vector<2x512xbf16>
      %c0_17 = arith.constant 0 : index
      %c0_18 = arith.constant 0 : index
      %22 = vector.load %arg7[%c0_17, %c0_18] : memref<2x512xbf16, #tpu.memory_space<vmem>>, vector<2x512xbf16>
      tpu.vector_store %arg7[%c0_17, %c0_18], %21 {strides = array<i32>} : memref<2x512xbf16, #tpu.memory_space<vmem>>, vector<2x512xbf16>,
    } else {
    }
    return
  }
  func.func @transform_0(%arg0: i32, %arg1: i32, %arg2: i32) -> (i32, i32) {
    %c0_i32 = arith.constant 0 : i32
    return %arg0, %arg2 : i32, i32
  }
  func.func @transform_1(%arg0: i32, %arg1: i32, %arg2: i32) -> (i32, i32) {
    %c0_i32 = arith.constant 0 : i32
    return %arg2, %arg1 : i32, i32
  }
  func.func @transform_2(%arg0: i32, %arg1: i32, %arg2: i32) -> (i32, i32) {
    %c0_i32 = arith.constant 0 : i32
    %c0_i32_0 = arith.constant 0 : i32
    return %c0_i32, %arg1 : i32, i32
  }
  func.func @transform_3(%arg0: i32, %arg1: i32, %arg2: i32) -> (i32, i32) {
    %c0_i32 = arith.constant 0 : i32
    %c0_i32_0 = arith.constant 0 : i32
    return %c0_i32, %arg1 : i32, i32
  }
  func.func @transform_4(%arg0: i32, %arg1: i32, %arg2: i32) -> (i32, i32) {
    %c0_i32 = arith.constant 0 : i32
    return %arg0, %arg1 : i32, i32
  }
}

module attributes {stable_mosaic.version = 11 : i64} {
  func.func @_mm_bn_act_kernel(%arg0: i32, %arg1: i32, %arg2: i32, %arg3: memref<16x576xbf16, #tpu.memory_space<vmem>>, %arg4: memref<576x128xbf16, #tpu.memory_space<vmem>>, %arg5: memref<1x128xf32, #tpu.memory_space<vmem>>, %arg6: memref<1x128xf32, #tpu.memory_space<vmem>>, %arg7: memref<16x128xbf16, #tpu.memory_space<vmem>>, %arg8: memref<16x128xf32, #tpu.memory_space<vmem>>) attributes {dimension_semantics = [#tpu.dimension_semantics<parallel>, #tpu.dimension_semantics<parallel>, #tpu.dimension_semantics<arbitrary>], iteration_bounds = array<i64: 2, 1, 1>, scalar_prefetch = 0 : i64, scratch_operands = 1 : i64, tpu.core_type = #tpu.core_type<tc>, window_params = [{transform_indices = @transform_0, window_bounds = array<i64: 16, 576>}, {transform_indices = @transform_1, window_bounds = array<i64: 576, 128>}, {transform_indices = @transform_2, window_bounds = array<i64: 1, 128>}, {transform_indices = @transform_3, window_bounds = array<i64: 1, 128>}, {transform_indices = @transform_4, window_bounds = array<i64: 16, 128>}]} {
    %c0_i32 = arith.constant 0 : i32
    %0 = arith.cmpi eq, %arg2, %c0_i32 : i32
    %1 = arith.extui %0 : i1 to i32
    %c0_i32_0 = arith.constant 0 : i32
    %2 = arith.cmpi ne, %1, %c0_i32_0 : i32
    scf.if %2 {
      %cst_10 = arith.constant 0.000000e+00 : f32
      %12 = vector.broadcast %cst_10 : f32 to vector<16x128xf32>
      %c0_11 = arith.constant 0 : index
      %c0_12 = arith.constant 0 : index
      %13 = vector.load %arg8[%c0_11, %c0_12] : memref<16x128xf32, #tpu.memory_space<vmem>>, vector<16x128xf32>
      tpu.vector_store %arg8[%c0_11, %c0_12], %12 {strides = array<i32>} : memref<16x128xf32, #tpu.memory_space<vmem>>, vector<16x128xf32>,
    } else {
    }
    %c0 = arith.constant 0 : index
    %c0_1 = arith.constant 0 : index
    %3 = vector.load %arg8[%c0, %c0_1] : memref<16x128xf32, #tpu.memory_space<vmem>>, vector<16x128xf32>
    %c0_2 = arith.constant 0 : index
    %c0_3 = arith.constant 0 : index
    %4 = vector.load %arg3[%c0_2, %c0_3] : memref<16x576xbf16, #tpu.memory_space<vmem>>, vector<16x576xbf16>
    %c0_4 = arith.constant 0 : index
    %c0_5 = arith.constant 0 : index
    %5 = vector.load %arg4[%c0_4, %c0_5] : memref<576x128xbf16, #tpu.memory_space<vmem>>, vector<576x128xbf16>
    %cst = arith.constant dense<0.000000e+00> : vector<16x128xf32>
    %6 = tpu.matmul %4, %5, %cst {dimension_numbers = #tpu.dot_dimension_numbers<[1], [0], [0], [1], [0, 0, 1, 1], [], []>} : vector<16x576xbf16>, vector<576x128xbf16>, vector<16x128xf32> -> vector<16x128xf32>
    %7 = arith.addf %3, %6 : vector<16x128xf32>
    %c0_6 = arith.constant 0 : index
    %c0_7 = arith.constant 0 : index
    %8 = vector.load %arg8[%c0_6, %c0_7] : memref<16x128xf32, #tpu.memory_space<vmem>>, vector<16x128xf32>
    tpu.vector_store %arg8[%c0_6, %c0_7], %7 {strides = array<i32>} : memref<16x128xf32, #tpu.memory_space<vmem>>, vector<16x128xf32>,
    %c0_i32_8 = arith.constant 0 : i32
    %9 = arith.cmpi eq, %arg2, %c0_i32_8 : i32
    %10 = arith.extui %9 : i1 to i32
    %c0_i32_9 = arith.constant 0 : i32
    %11 = arith.cmpi ne, %10, %c0_i32_9 : i32
    scf.if %11 {
      %c0_10 = arith.constant 0 : index
      %c0_11 = arith.constant 0 : index
      %12 = vector.load %arg8[%c0_10, %c0_11] : memref<16x128xf32, #tpu.memory_space<vmem>>, vector<16x128xf32>
      %c0_12 = arith.constant 0 : index
      %c0_13 = arith.constant 0 : index
      %13 = vector.load %arg5[%c0_12, %c0_13] : memref<1x128xf32, #tpu.memory_space<vmem>>, vector<1x128xf32>
      %14 = vector.broadcast %13 : vector<1x128xf32> to vector<16x128xf32>
      %15 = arith.mulf %12, %14 : vector<16x128xf32>
      %c0_14 = arith.constant 0 : index
      %c0_15 = arith.constant 0 : index
      %16 = vector.load %arg6[%c0_14, %c0_15] : memref<1x128xf32, #tpu.memory_space<vmem>>, vector<1x128xf32>
      %17 = vector.broadcast %16 : vector<1x128xf32> to vector<16x128xf32>
      %18 = arith.addf %15, %17 : vector<16x128xf32>
      %cst_16 = arith.constant 0.000000e+00 : f32
      %19 = vector.broadcast %cst_16 : f32 to vector<16x128xf32>
      %20 = arith.maximumf %18, %19 : vector<16x128xf32>
      %21 = arith.truncf %20 : vector<16x128xf32> to vector<16x128xbf16>
      %c0_17 = arith.constant 0 : index
      %c0_18 = arith.constant 0 : index
      %22 = vector.load %arg7[%c0_17, %c0_18] : memref<16x128xbf16, #tpu.memory_space<vmem>>, vector<16x128xbf16>
      tpu.vector_store %arg7[%c0_17, %c0_18], %21 {strides = array<i32>} : memref<16x128xbf16, #tpu.memory_space<vmem>>, vector<16x128xbf16>,
    } else {
    }
    return
  }
  func.func @transform_0(%arg0: i32, %arg1: i32, %arg2: i32) -> (i32, i32) {
    %c0_i32 = arith.constant 0 : i32
    return %arg0, %arg2 : i32, i32
  }
  func.func @transform_1(%arg0: i32, %arg1: i32, %arg2: i32) -> (i32, i32) {
    %c0_i32 = arith.constant 0 : i32
    return %arg2, %arg1 : i32, i32
  }
  func.func @transform_2(%arg0: i32, %arg1: i32, %arg2: i32) -> (i32, i32) {
    %c0_i32 = arith.constant 0 : i32
    %c0_i32_0 = arith.constant 0 : i32
    return %c0_i32, %arg1 : i32, i32
  }
  func.func @transform_3(%arg0: i32, %arg1: i32, %arg2: i32) -> (i32, i32) {
    %c0_i32 = arith.constant 0 : i32
    %c0_i32_0 = arith.constant 0 : i32
    return %c0_i32, %arg1 : i32, i32
  }
  func.func @transform_4(%arg0: i32, %arg1: i32, %arg2: i32) -> (i32, i32) {
    %c0_i32 = arith.constant 0 : i32
    return %arg0, %arg1 : i32, i32
  }
}

module attributes {stable_mosaic.version = 11 : i64} {
  func.func @_mm_bn_act_kernel(%arg0: i32, %arg1: i32, %arg2: i32, %arg3: memref<64x288xbf16, #tpu.memory_space<vmem>>, %arg4: memref<288x64xbf16, #tpu.memory_space<vmem>>, %arg5: memref<1x64xf32, #tpu.memory_space<vmem>>, %arg6: memref<1x64xf32, #tpu.memory_space<vmem>>, %arg7: memref<64x64xbf16, #tpu.memory_space<vmem>>, %arg8: memref<64x64xf32, #tpu.memory_space<vmem>>) attributes {dimension_semantics = [#tpu.dimension_semantics<parallel>, #tpu.dimension_semantics<parallel>, #tpu.dimension_semantics<arbitrary>], iteration_bounds = array<i64: 2, 1, 1>, scalar_prefetch = 0 : i64, scratch_operands = 1 : i64, tpu.core_type = #tpu.core_type<tc>, window_params = [{transform_indices = @transform_0, window_bounds = array<i64: 64, 288>}, {transform_indices = @transform_1, window_bounds = array<i64: 288, 64>}, {transform_indices = @transform_2, window_bounds = array<i64: 1, 64>}, {transform_indices = @transform_3, window_bounds = array<i64: 1, 64>}, {transform_indices = @transform_4, window_bounds = array<i64: 64, 64>}]} {
    %c0_i32 = arith.constant 0 : i32
    %0 = arith.cmpi eq, %arg2, %c0_i32 : i32
    %1 = arith.extui %0 : i1 to i32
    %c0_i32_0 = arith.constant 0 : i32
    %2 = arith.cmpi ne, %1, %c0_i32_0 : i32
    scf.if %2 {
      %cst_10 = arith.constant 0.000000e+00 : f32
      %12 = vector.broadcast %cst_10 : f32 to vector<64x64xf32>
      %c0_11 = arith.constant 0 : index
      %c0_12 = arith.constant 0 : index
      %13 = vector.load %arg8[%c0_11, %c0_12] : memref<64x64xf32, #tpu.memory_space<vmem>>, vector<64x64xf32>
      tpu.vector_store %arg8[%c0_11, %c0_12], %12 {strides = array<i32>} : memref<64x64xf32, #tpu.memory_space<vmem>>, vector<64x64xf32>,
    } else {
    }
    %c0 = arith.constant 0 : index
    %c0_1 = arith.constant 0 : index
    %3 = vector.load %arg8[%c0, %c0_1] : memref<64x64xf32, #tpu.memory_space<vmem>>, vector<64x64xf32>
    %c0_2 = arith.constant 0 : index
    %c0_3 = arith.constant 0 : index
    %4 = vector.load %arg3[%c0_2, %c0_3] : memref<64x288xbf16, #tpu.memory_space<vmem>>, vector<64x288xbf16>
    %c0_4 = arith.constant 0 : index
    %c0_5 = arith.constant 0 : index
    %5 = vector.load %arg4[%c0_4, %c0_5] : memref<288x64xbf16, #tpu.memory_space<vmem>>, vector<288x64xbf16>
    %cst = arith.constant dense<0.000000e+00> : vector<64x64xf32>
    %6 = tpu.matmul %4, %5, %cst {dimension_numbers = #tpu.dot_dimension_numbers<[1], [0], [0], [1], [0, 0, 1, 1], [], []>} : vector<64x288xbf16>, vector<288x64xbf16>, vector<64x64xf32> -> vector<64x64xf32>
    %7 = arith.addf %3, %6 : vector<64x64xf32>
    %c0_6 = arith.constant 0 : index
    %c0_7 = arith.constant 0 : index
    %8 = vector.load %arg8[%c0_6, %c0_7] : memref<64x64xf32, #tpu.memory_space<vmem>>, vector<64x64xf32>
    tpu.vector_store %arg8[%c0_6, %c0_7], %7 {strides = array<i32>} : memref<64x64xf32, #tpu.memory_space<vmem>>, vector<64x64xf32>,
    %c0_i32_8 = arith.constant 0 : i32
    %9 = arith.cmpi eq, %arg2, %c0_i32_8 : i32
    %10 = arith.extui %9 : i1 to i32
    %c0_i32_9 = arith.constant 0 : i32
    %11 = arith.cmpi ne, %10, %c0_i32_9 : i32
    scf.if %11 {
      %c0_10 = arith.constant 0 : index
      %c0_11 = arith.constant 0 : index
      %12 = vector.load %arg8[%c0_10, %c0_11] : memref<64x64xf32, #tpu.memory_space<vmem>>, vector<64x64xf32>
      %c0_12 = arith.constant 0 : index
      %c0_13 = arith.constant 0 : index
      %13 = vector.load %arg5[%c0_12, %c0_13] : memref<1x64xf32, #tpu.memory_space<vmem>>, vector<1x64xf32>
      %14 = vector.broadcast %13 : vector<1x64xf32> to vector<64x64xf32>
      %15 = arith.mulf %12, %14 : vector<64x64xf32>
      %c0_14 = arith.constant 0 : index
      %c0_15 = arith.constant 0 : index
      %16 = vector.load %arg6[%c0_14, %c0_15] : memref<1x64xf32, #tpu.memory_space<vmem>>, vector<1x64xf32>
      %17 = vector.broadcast %16 : vector<1x64xf32> to vector<64x64xf32>
      %18 = arith.addf %15, %17 : vector<64x64xf32>
      %cst_16 = arith.constant 0.000000e+00 : f32
      %19 = vector.broadcast %cst_16 : f32 to vector<64x64xf32>
      %20 = arith.maximumf %18, %19 : vector<64x64xf32>
      %21 = arith.truncf %20 : vector<64x64xf32> to vector<64x64xbf16>
      %c0_17 = arith.constant 0 : index
      %c0_18 = arith.constant 0 : index
      %22 = vector.load %arg7[%c0_17, %c0_18] : memref<64x64xbf16, #tpu.memory_space<vmem>>, vector<64x64xbf16>
      tpu.vector_store %arg7[%c0_17, %c0_18], %21 {strides = array<i32>} : memref<64x64xbf16, #tpu.memory_space<vmem>>, vector<64x64xbf16>,
    } else {
    }
    return
  }
  func.func @transform_0(%arg0: i32, %arg1: i32, %arg2: i32) -> (i32, i32) {
    %c0_i32 = arith.constant 0 : i32
    return %arg0, %arg2 : i32, i32
  }
  func.func @transform_1(%arg0: i32, %arg1: i32, %arg2: i32) -> (i32, i32) {
    %c0_i32 = arith.constant 0 : i32
    return %arg2, %arg1 : i32, i32
  }
  func.func @transform_2(%arg0: i32, %arg1: i32, %arg2: i32) -> (i32, i32) {
    %c0_i32 = arith.constant 0 : i32
    %c0_i32_0 = arith.constant 0 : i32
    return %c0_i32, %arg1 : i32, i32
  }
  func.func @transform_3(%arg0: i32, %arg1: i32, %arg2: i32) -> (i32, i32) {
    %c0_i32 = arith.constant 0 : i32
    %c0_i32_0 = arith.constant 0 : i32
    return %c0_i32, %arg1 : i32, i32
  }
  func.func @transform_4(%arg0: i32, %arg1: i32, %arg2: i32) -> (i32, i32) {
    %c0_i32 = arith.constant 0 : i32
    return %arg0, %arg1 : i32, i32
  }
}

module attributes {stable_mosaic.version = 11 : i64} {
  func.func @_mm_bn_act_kernel(%arg0: i32, %arg1: i32, %arg2: i32, %arg3: memref<256x144xbf16, #tpu.memory_space<vmem>>, %arg4: memref<144x32xbf16, #tpu.memory_space<vmem>>, %arg5: memref<1x32xf32, #tpu.memory_space<vmem>>, %arg6: memref<1x32xf32, #tpu.memory_space<vmem>>, %arg7: memref<256x32xbf16, #tpu.memory_space<vmem>>, %arg8: memref<256x32xf32, #tpu.memory_space<vmem>>) attributes {dimension_semantics = [#tpu.dimension_semantics<parallel>, #tpu.dimension_semantics<parallel>, #tpu.dimension_semantics<arbitrary>], iteration_bounds = array<i64: 2, 1, 1>, scalar_prefetch = 0 : i64, scratch_operands = 1 : i64, tpu.core_type = #tpu.core_type<tc>, window_params = [{transform_indices = @transform_0, window_bounds = array<i64: 256, 144>}, {transform_indices = @transform_1, window_bounds = array<i64: 144, 32>}, {transform_indices = @transform_2, window_bounds = array<i64: 1, 32>}, {transform_indices = @transform_3, window_bounds = array<i64: 1, 32>}, {transform_indices = @transform_4, window_bounds = array<i64: 256, 32>}]} {
    %c0_i32 = arith.constant 0 : i32
    %0 = arith.cmpi eq, %arg2, %c0_i32 : i32
    %1 = arith.extui %0 : i1 to i32
    %c0_i32_0 = arith.constant 0 : i32
    %2 = arith.cmpi ne, %1, %c0_i32_0 : i32
    scf.if %2 {
      %cst_10 = arith.constant 0.000000e+00 : f32
      %12 = vector.broadcast %cst_10 : f32 to vector<256x32xf32>
      %c0_11 = arith.constant 0 : index
      %c0_12 = arith.constant 0 : index
      %13 = vector.load %arg8[%c0_11, %c0_12] : memref<256x32xf32, #tpu.memory_space<vmem>>, vector<256x32xf32>
      tpu.vector_store %arg8[%c0_11, %c0_12], %12 {strides = array<i32>} : memref<256x32xf32, #tpu.memory_space<vmem>>, vector<256x32xf32>,
    } else {
    }
    %c0 = arith.constant 0 : index
    %c0_1 = arith.constant 0 : index
    %3 = vector.load %arg8[%c0, %c0_1] : memref<256x32xf32, #tpu.memory_space<vmem>>, vector<256x32xf32>
    %c0_2 = arith.constant 0 : index
    %c0_3 = arith.constant 0 : index
    %4 = vector.load %arg3[%c0_2, %c0_3] : memref<256x144xbf16, #tpu.memory_space<vmem>>, vector<256x144xbf16>
    %c0_4 = arith.constant 0 : index
    %c0_5 = arith.constant 0 : index
    %5 = vector.load %arg4[%c0_4, %c0_5] : memref<144x32xbf16, #tpu.memory_space<vmem>>, vector<144x32xbf16>
    %cst = arith.constant dense<0.000000e+00> : vector<256x32xf32>
    %6 = tpu.matmul %4, %5, %cst {dimension_numbers = #tpu.dot_dimension_numbers<[1], [0], [0], [1], [0, 0, 1, 1], [], []>} : vector<256x144xbf16>, vector<144x32xbf16>, vector<256x32xf32> -> vector<256x32xf32>
    %7 = arith.addf %3, %6 : vector<256x32xf32>
    %c0_6 = arith.constant 0 : index
    %c0_7 = arith.constant 0 : index
    %8 = vector.load %arg8[%c0_6, %c0_7] : memref<256x32xf32, #tpu.memory_space<vmem>>, vector<256x32xf32>
    tpu.vector_store %arg8[%c0_6, %c0_7], %7 {strides = array<i32>} : memref<256x32xf32, #tpu.memory_space<vmem>>, vector<256x32xf32>,
    %c0_i32_8 = arith.constant 0 : i32
    %9 = arith.cmpi eq, %arg2, %c0_i32_8 : i32
    %10 = arith.extui %9 : i1 to i32
    %c0_i32_9 = arith.constant 0 : i32
    %11 = arith.cmpi ne, %10, %c0_i32_9 : i32
    scf.if %11 {
      %c0_10 = arith.constant 0 : index
      %c0_11 = arith.constant 0 : index
      %12 = vector.load %arg8[%c0_10, %c0_11] : memref<256x32xf32, #tpu.memory_space<vmem>>, vector<256x32xf32>
      %c0_12 = arith.constant 0 : index
      %c0_13 = arith.constant 0 : index
      %13 = vector.load %arg5[%c0_12, %c0_13] : memref<1x32xf32, #tpu.memory_space<vmem>>, vector<1x32xf32>
      %14 = vector.broadcast %13 : vector<1x32xf32> to vector<256x32xf32>
      %15 = arith.mulf %12, %14 : vector<256x32xf32>
      %c0_14 = arith.constant 0 : index
      %c0_15 = arith.constant 0 : index
      %16 = vector.load %arg6[%c0_14, %c0_15] : memref<1x32xf32, #tpu.memory_space<vmem>>, vector<1x32xf32>
      %17 = vector.broadcast %16 : vector<1x32xf32> to vector<256x32xf32>
      %18 = arith.addf %15, %17 : vector<256x32xf32>
      %cst_16 = arith.constant 0.000000e+00 : f32
      %19 = vector.broadcast %cst_16 : f32 to vector<256x32xf32>
      %20 = arith.maximumf %18, %19 : vector<256x32xf32>
      %21 = arith.truncf %20 : vector<256x32xf32> to vector<256x32xbf16>
      %c0_17 = arith.constant 0 : index
      %c0_18 = arith.constant 0 : index
      %22 = vector.load %arg7[%c0_17, %c0_18] : memref<256x32xbf16, #tpu.memory_space<vmem>>, vector<256x32xbf16>
      tpu.vector_store %arg7[%c0_17, %c0_18], %21 {strides = array<i32>} : memref<256x32xbf16, #tpu.memory_space<vmem>>, vector<256x32xbf16>,
    } else {
    }
    return
  }
  func.func @transform_0(%arg0: i32, %arg1: i32, %arg2: i32) -> (i32, i32) {
    %c0_i32 = arith.constant 0 : i32
    return %arg0, %arg2 : i32, i32
  }
  func.func @transform_1(%arg0: i32, %arg1: i32, %arg2: i32) -> (i32, i32) {
    %c0_i32 = arith.constant 0 : i32
    return %arg2, %arg1 : i32, i32
  }
  func.func @transform_2(%arg0: i32, %arg1: i32, %arg2: i32) -> (i32, i32) {
    %c0_i32 = arith.constant 0 : i32
    %c0_i32_0 = arith.constant 0 : i32
    return %c0_i32, %arg1 : i32, i32
  }
  func.func @transform_3(%arg0: i32, %arg1: i32, %arg2: i32) -> (i32, i32) {
    %c0_i32 = arith.constant 0 : i32
    %c0_i32_0 = arith.constant 0 : i32
    return %c0_i32, %arg1 : i32, i32
  }
  func.func @transform_4(%arg0: i32, %arg1: i32, %arg2: i32) -> (i32, i32) {
    %c0_i32 = arith.constant 0 : i32
    return %arg0, %arg1 : i32, i32
  }
}

module attributes {stable_mosaic.version = 11 : i64} {
  func.func @_mm_bn_act_kernel(%arg0: i32, %arg1: i32, %arg2: i32, %arg3: memref<512x72xbf16, #tpu.memory_space<vmem>>, %arg4: memref<72x4xbf16, #tpu.memory_space<vmem>>, %arg5: memref<1x4xf32, #tpu.memory_space<vmem>>, %arg6: memref<1x4xf32, #tpu.memory_space<vmem>>, %arg7: memref<512x4xf32, #tpu.memory_space<vmem>>, %arg8: memref<512x4xf32, #tpu.memory_space<vmem>>) attributes {dimension_semantics = [#tpu.dimension_semantics<parallel>, #tpu.dimension_semantics<parallel>, #tpu.dimension_semantics<arbitrary>], iteration_bounds = array<i64: 4, 1, 1>, scalar_prefetch = 0 : i64, scratch_operands = 1 : i64, tpu.core_type = #tpu.core_type<tc>, window_params = [{transform_indices = @transform_0, window_bounds = array<i64: 512, 72>}, {transform_indices = @transform_1, window_bounds = array<i64: 72, 4>}, {transform_indices = @transform_2, window_bounds = array<i64: 1, 4>}, {transform_indices = @transform_3, window_bounds = array<i64: 1, 4>}, {transform_indices = @transform_4, window_bounds = array<i64: 512, 4>}]} {
    %c0_i32 = arith.constant 0 : i32
    %0 = arith.cmpi eq, %arg2, %c0_i32 : i32
    %1 = arith.extui %0 : i1 to i32
    %c0_i32_0 = arith.constant 0 : i32
    %2 = arith.cmpi ne, %1, %c0_i32_0 : i32
    scf.if %2 {
      %cst_10 = arith.constant 0.000000e+00 : f32
      %12 = vector.broadcast %cst_10 : f32 to vector<512x4xf32>
      %c0_11 = arith.constant 0 : index
      %c0_12 = arith.constant 0 : index
      %13 = vector.load %arg8[%c0_11, %c0_12] : memref<512x4xf32, #tpu.memory_space<vmem>>, vector<512x4xf32>
      tpu.vector_store %arg8[%c0_11, %c0_12], %12 {strides = array<i32>} : memref<512x4xf32, #tpu.memory_space<vmem>>, vector<512x4xf32>,
    } else {
    }
    %c0 = arith.constant 0 : index
    %c0_1 = arith.constant 0 : index
    %3 = vector.load %arg8[%c0, %c0_1] : memref<512x4xf32, #tpu.memory_space<vmem>>, vector<512x4xf32>
    %c0_2 = arith.constant 0 : index
    %c0_3 = arith.constant 0 : index
    %4 = vector.load %arg3[%c0_2, %c0_3] : memref<512x72xbf16, #tpu.memory_space<vmem>>, vector<512x72xbf16>
    %c0_4 = arith.constant 0 : index
    %c0_5 = arith.constant 0 : index
    %5 = vector.load %arg4[%c0_4, %c0_5] : memref<72x4xbf16, #tpu.memory_space<vmem>>, vector<72x4xbf16>
    %cst = arith.constant dense<0.000000e+00> : vector<512x4xf32>
    %6 = tpu.matmul %4, %5, %cst {dimension_numbers = #tpu.dot_dimension_numbers<[1], [0], [0], [1], [0, 0, 1, 1], [], []>} : vector<512x72xbf16>, vector<72x4xbf16>, vector<512x4xf32> -> vector<512x4xf32>
    %7 = arith.addf %3, %6 : vector<512x4xf32>
    %c0_6 = arith.constant 0 : index
    %c0_7 = arith.constant 0 : index
    %8 = vector.load %arg8[%c0_6, %c0_7] : memref<512x4xf32, #tpu.memory_space<vmem>>, vector<512x4xf32>
    tpu.vector_store %arg8[%c0_6, %c0_7], %7 {strides = array<i32>} : memref<512x4xf32, #tpu.memory_space<vmem>>, vector<512x4xf32>,
    %c0_i32_8 = arith.constant 0 : i32
    %9 = arith.cmpi eq, %arg2, %c0_i32_8 : i32
    %10 = arith.extui %9 : i1 to i32
    %c0_i32_9 = arith.constant 0 : i32
    %11 = arith.cmpi ne, %10, %c0_i32_9 : i32
    scf.if %11 {
      %c0_10 = arith.constant 0 : index
      %c0_11 = arith.constant 0 : index
      %12 = vector.load %arg8[%c0_10, %c0_11] : memref<512x4xf32, #tpu.memory_space<vmem>>, vector<512x4xf32>
      %c0_12 = arith.constant 0 : index
      %c0_13 = arith.constant 0 : index
      %13 = vector.load %arg5[%c0_12, %c0_13] : memref<1x4xf32, #tpu.memory_space<vmem>>, vector<1x4xf32>
      %14 = vector.broadcast %13 : vector<1x4xf32> to vector<512x4xf32>
      %15 = arith.mulf %12, %14 : vector<512x4xf32>
      %c0_14 = arith.constant 0 : index
      %c0_15 = arith.constant 0 : index
      %16 = vector.load %arg6[%c0_14, %c0_15] : memref<1x4xf32, #tpu.memory_space<vmem>>, vector<1x4xf32>
      %17 = vector.broadcast %16 : vector<1x4xf32> to vector<512x4xf32>
      %18 = arith.addf %15, %17 : vector<512x4xf32>
      %19 = math.tanh %18 : vector<512x4xf32>
      %c0_16 = arith.constant 0 : index
      %c0_17 = arith.constant 0 : index
      %20 = vector.load %arg7[%c0_16, %c0_17] : memref<512x4xf32, #tpu.memory_space<vmem>>, vector<512x4xf32>
      tpu.vector_store %arg7[%c0_16, %c0_17], %19 {strides = array<i32>} : memref<512x4xf32, #tpu.memory_space<vmem>>, vector<512x4xf32>,
    } else {
    }
    return
  }
  func.func @transform_0(%arg0: i32, %arg1: i32, %arg2: i32) -> (i32, i32) {
    %c0_i32 = arith.constant 0 : i32
    return %arg0, %arg2 : i32, i32
  }
  func.func @transform_1(%arg0: i32, %arg1: i32, %arg2: i32) -> (i32, i32) {
    %c0_i32 = arith.constant 0 : i32
    return %arg2, %arg1 : i32, i32
  }
  func.func @transform_2(%arg0: i32, %arg1: i32, %arg2: i32) -> (i32, i32) {
    %c0_i32 = arith.constant 0 : i32
    %c0_i32_0 = arith.constant 0 : i32
    return %c0_i32, %arg1 : i32, i32
  }
  func.func @transform_3(%arg0: i32, %arg1: i32, %arg2: i32) -> (i32, i32) {
    %c0_i32 = arith.constant 0 : i32
    %c0_i32_0 = arith.constant 0 : i32
    return %c0_i32, %arg1 : i32, i32
  }
  func.func @transform_4(%arg0: i32, %arg1: i32, %arg2: i32) -> (i32, i32) {
    %c0_i32 = arith.constant 0 : i32
    return %arg0, %arg1 : i32, i32
  }
}

</mosaic_0001>

<bundles_post_ra>
// kernel: dcgan_g_forward.5
= control target key start
LH: loop header
LB: loop body
LE: loop exit
PB: predicated region body
PF: predicated region fallthrough
CT: control target
= control target key end

     0   :  { %9 = vsyncpa [#allocation4], 0  ;;  %s1218_s0 = inlined_call_operand.vmem [shape: bf16[2,16], index: 0, kind: input, shape index: {}]   ;;  %s1219_s1 = inlined_call_operand.hbm [shape: bf16[16,1024], index: 1, kind: input, shape index: {}]   ;;  %s1220_s2 = inlined_call_operand.hbm [shape: f32[1,1024], index: 2, kind: input, shape index: {}]   ;;  %s1221_s3 = inlined_call_operand.hbm [shape: f32[1,1024], index: 3, kind: input, shape index: {}]   ;;  %s1222_s4 = inlined_call_operand.vmem [shape: bf16[2,1024], index: 4, kind: output, shape index: {}]  }
   0x1   :  { %11 = vsyncpa [#allocation4 + $0x1], 0 }
   0x2   :  { %12 = vsyncpa [#allocation6], 0 }
   0x3   :  { %14 = vsyncpa [#allocation6 + $0x1], 0  ;;  %s1064_s15 = smov 0   ;;  %s1066_s16 = smov 0  }
   0x4   :  { %s1068_s17 = smov 0   ;;  %s1070_s18 = smov 0  }
   0x5   :  { %s1072_s19 = smov 0   ;;  %s1074_s20 = smov 0  }
   0x6 LB: > { %s1223_s21 = sadd.s32 4294967295, %s1028_s20   ;;  %s35_s22 = sadd.s32 1, %s1024_s19  ;;  %s1028_s20 = sphi %s1074_s20, %s20_s20   ;;  %s1024_s19 = sphi %s1072_s19, %s1232_s19   ;;  %s1020_s18 = sphi %s1070_s18, %s1231_s18   ;;  %s1016_s17 = sphi %s1068_s17, %s1230_s17   ;;  %s1012_s16 = sphi %s1066_s16, %s1229_s16   ;;  %s1008_s15 = sphi %s1064_s15, %s1228_s15  }
   0x7   : > { %p37_p0 = scmp.ge.s32.totalorder %s35_s22, 2  ;;  %s76_s23 = sadd.s32 1, %s1016_s17 }
   0x8   : > { %p83_p1 = scmp.ne.s32.totalorder %s1016_s17, %s1012_s16  ;;  %p84_p2 = scmp.eq.s32.totalorder %s1028_s20, 0 }
   0x9   : > { %s1234_s22 = smov (%p37_p0, %s35_s22), 0  ;;  %p89_p4 = scmp.ne.s32.totalorder %s1012_s16, %s1008_s15 }
   0xa   : > { %p85_p3 = por %p84_p2, %p83_p1  ;;  %s72_s24 = ssub.s32 %s1024_s19, %s1234_s22 }
   0xb   : > { %p90_p5 = scmp.eq.s32.totalorder %s1223_s21, 0  ;;  %p74_p6 = scmp.eq.s32.totalorder %s72_s24, 0 }
   0xc   : > { %p829_p8 = scmp.lt.s32.totalorder %s1028_s20, 2  ;;  %s1114_s27 = sand.u32 1, %s1016_s17  }
   0xd   : > { %p1105_p7 = por %p90_p5, %p89_p4  ;;  %s785_s29 = sshll.u32 %s1114_s27, 5 }
   0xe   : > { %s1111_s26 = scalar_select %p74_p6, %s1016_s17, %s76_s23  }
   0xf   : > { %p1116_p9 = pnand %p829_p8, %p85_p3  ;;  %s206_s30 = scalar_lea.vmem [#allocation3], %s785_s29 }
  0x10   : > { %s216_s5 = sshll.u32 %s206_s30, 4  ;;  %s226_s6 = sand.u32 1, %s1028_s20   ;;  %s1122_s5 = int_to_ptr.vmem [resolvable:$true] %s216_s5 }
  0x11   : > { %s788_s7 = sshll.u32 %s1114_s27, 2  ;;  %s811_s8 = sshll.u32 %s1024_s19, 6 }
  0x12   : > { %s236_s11 = scalar_lea.hbm %s1220_s2, %s811_s8  ;;  %s230_s12 = scalar_lea.vmem [#allocation5], %s788_s7 }
  0x13   : > { %s238_s13 = sshll.u32 %s230_s12, 4  ;;  %s1134_s23 = scalar_lea.hbm %s1221_s3, %s811_s8  ;;  %s239_s13 = int_to_ptr.vmem [resolvable:$true] %s238_s13 }
  0x14   : > { %s1136_s24 = scalar_lea.sflag [#allocation6], %s226_s6  ;;  %p892_p10 = pneg %p1116_p9 }
  0x15   : > { %s903_s29 = scalar_lea.vmem %s239_s13, 64  ;;  %s1030_s30 = smov [#allocation5]  }
  0x16   : > { %p904_p11 = scmp.ne.s32.totalorder %s239_s13, %s903_s29  ;;  %s908_s9 = sshll.u32 %s1030_s30, 4  ;;  %s909_s9 = int_to_ptr.vmem [resolvable:$false] %s908_s9 }
  0x17   : > { %s910_s10 = scalar_lea.vmem %s909_s9, 128  ;;  %p911_p0 = scmp.lt.s32.totalorder %s239_s13, %s909_s9 }
  0x18   : > { %p906_p12 = pnand %p904_p11, %p892_p10  ;;  %p912_p1 = scmp.lt.s32.totalorder %s910_s10, %s903_s29 }
  0x1a   : > { %p907_p13 = pneg %p906_p12  ;;  %p913_p2 = por %p912_p1, %p911_p0 }
  0x1c   : > { %p914_p3 = pnand %p913_p2, %p907_p13 }
  0x1e   : > { %917 = shalt.err (!%p914_p3)
}
  0x1f   : > { %825 = dma.hbm_to_vmem [thread:$0]  (!%p1116_p9), %s236_s11, 64, %s239_s13, %s1136_s24  }
  0x20   : > { %p794_p4 = scmp.ge.s32.totalorder %s1028_s20, 1  ;;  %p262_p5 = scmp.lt.s32.totalorder %s1028_s20, 3 }
  0x21   : > { %s810_s6 = sshll.u32 %s1024_s19, 8  ;;  %s203_s29 = scalar_lea.sflag [#allocation4], %s1114_s27 }
  0x22   : > { %p1149_p6 = pnand %p794_p4, %p262_p5  ;;  %s215_s15 = scalar_lea.hbm %s1219_s1, %s810_s6 }
  0x23   : > { %s931_s30 = scalar_lea.vmem %s1122_s5, 512  ;;  %s1031_s9 = smov [#allocation3]  }
  0x24   : > { %p932_p8 = scmp.ne.s32.totalorder %s1122_s5, %s931_s30  ;;  %s936_s11 = sshll.u32 %s1031_s9, 4  ;;  %s937_s11 = int_to_ptr.vmem [resolvable:$false] %s936_s11 }
  0x25   : > { %s938_s13 = scalar_lea.vmem %s937_s11, 1024  ;;  %p939_p13 = scmp.lt.s32.totalorder %s1122_s5, %s937_s11 }
  0x26   : > { %p934_p11 = pnand %p932_p8, %p892_p10  ;;  %p940_p0 = scmp.lt.s32.totalorder %s938_s13, %s931_s30 }
  0x28   : > { %p935_p12 = pneg %p934_p11  ;;  %p941_p1 = por %p940_p0, %p939_p13 }
  0x2a   : > { %p942_p2 = pnand %p941_p1, %p935_p12 }
  0x2c   : > { %945 = shalt.err (!%p942_p2)
}
  0x2d   : > { %s1032_s10 = smov 512   ;;  %s1033_s6 = smov 256  }
  0x2e   : > { %s1034_s12 = smov 16   ;;  %s249_s14 = scalar_lea.vmem [#allocation7], %s788_s7 }
  0x2f   : > { %822 = dma.hbm_to_vmem [thread:$0]  (!%p1116_p9), %s215_s15, 512, %s1122_s5, %s203_s29, %s1032_s10, %s1033_s6, %s1034_s12  }
  0x30   : > { %s257_s21 = sshll.u32 %s249_s14, 4  ;;  %s1035_s30 = smov [#allocation7]   ;;  %s258_s21 = int_to_ptr.vmem [resolvable:$true] %s257_s21 }
  0x31   : > { %s959_s9 = scalar_lea.vmem %s258_s21, 64  ;;  %s964_s11 = sshll.u32 %s1035_s30, 4  ;;  %s965_s11 = int_to_ptr.vmem [resolvable:$false] %s964_s11 }
  0x32   : > { %p960_p3 = scmp.ne.s32.totalorder %s258_s21, %s959_s9  ;;  %s966_s13 = scalar_lea.vmem %s965_s11, 128 }
  0x33   : > { %p967_p8 = scmp.lt.s32.totalorder %s258_s21, %s965_s11  ;;  %p968_p11 = scmp.lt.s32.totalorder %s966_s13, %s959_s9 }
  0x34   : > { %p962_p4 = pnand %p960_p3, %p892_p10 }
  0x35   : > { %p969_p12 = por %p968_p11, %p967_p8 }
  0x36   : > { %p963_p5 = pneg %p962_p4 }
  0x38   : > { %p970_p13 = pnand %p969_p12, %p963_p5 }
  0x3a   : > { %973 = shalt.err (!%p970_p13)
}
  0x3b   : > { %828 = dma.hbm_to_vmem [thread:$0]  (!%p1116_p9), %s1134_s23, 64, %s258_s21, %s1136_s24  }
  0x3c   : > { %266 = sbr.rel (%p1149_p6) target bundleno = 296 (0x128), region = 36  ;;  %s1178_s27 = sand.u32 (!%p1149_p6), 1, %s1012_s16  }
  0x3d   : > { %s795_s5 = sshll.u32 (!%p1149_p6), %s1178_s27, 5  ;;  %s269_s7 = scalar_lea.sflag (!%p1149_p6), [#allocation4], %s1178_s27 }
  0x3e   : > { %s272_s15 = scalar_lea.vmem (!%p1149_p6), [#allocation3], %s795_s5 }
  0x41   : > { %999 = dma.done.wait (%p1105_p7), %s269_s7, 512  }
  0x42   : > { %1001 = vsyncadd (%p1105_p7), %s269_s7, 4294966784  ;;  %s1227_s28 = sadd.s32 4294967295, %s1028_s20   ;;  %s796_s23 = sshll.u32 %s1178_s27, 2 }
  0x43   : > { %s277_s21 = sand.u32 1, %s1227_s28   ;;  %s281_s8 = scalar_lea.vmem [#allocation5], %s796_s23 }
  0x44   : > { %s278_s24 = scalar_lea.sflag [#allocation6], %s277_s21 }
  0x45   : > { %1003 = dma.done.wait (%p1105_p7), %s278_s24, 128  }
  0x46   : > { %1005 = vsyncadd (%p1105_p7), %s278_s24, 4294967168  ;;  %v1036_v0 = vmov 0   ;;  %v884_v1 = vld [vmem:[%s272_s15 + $0x4] ss:$16 sps:$4 sm:$0xff]   ;;  %v886_v2 = vld [vmem:[%s272_s15 + $0xc] ss:$16 sps:$4 sm:$0xff]   ;;  %v480_v6 = vlaneseq }
  0x47   : > { %421 = vmatprep.mubr.bf16.mxu0 %v1036_v0  ;;  %462 = vmatprep.mubr.bf16.mxu1 %v1036_v0  ;;  %v888_v3 = vld [vmem:[%s272_s15] ss:$16 sps:$4 sm:$0xff]   ;;  %v889_v4 = vld [vmem:[%s272_s15 + $0x8] ss:$16 sps:$4 sm:$0xff]   ;;  %vm385_vm0 = vcmask 130048   ;;  %s290_s25 = scalar_lea.vmem [#allocation7], %s796_s23 }
  0x48   : > { %403 = vmatprep.subr.bf16.mxu0 %v884_v1  ;;  %444 = vmatprep.subr.bf16.mxu1 %v886_v2  ;;  %v360_v5 = vld [vmem:[%s1218_s0] sm:$0x1]  ;;  %v481_v7 = vshrl.u32 %v480_v6, 7  ;;  %v1037_v8 = vmov 1983009808   ;;  %s798_s6 = sshll.u32 %s1020_s18, 2 }
  0x49   : > { %404 = vmatpush1.bf16.msra.mxu0 %v888_v3  ;;  %445 = vmatpush1.bf16.msra.mxu1 %v889_v4  ;;  %v478_v9 = vunpack.c.l.s4 %v1037_v8  ;;  %v499_v14 = vld [vmem:[%s281_s8] sm:$0xf]  ;;  %v536_v16 = vld [vmem:[%s290_s25] sm:$0xf]  ;;  %v1038_v51 = vmov 1966171168  }
  0x4a   : > { %v503_v10 = vsub.s32 0, %v481_v7  ;;  %v507_v11 = vsub.s32 1, %v481_v7  ;;  %v511_v12 = vsub.s32 2, %v481_v7  ;;  %v515_v13 = vsub.s32 3, %v481_v7  ;;  %p347_p7 = scmp.lt.s32.totalorder %s798_s6, 7 }
  0x4b   : > { %v479_v15 = vunpack.c.0.s8 %v478_v9  ;;  %v607_v52 = vunpack.c.l.s4 %v1038_v51 }
  0x4c   : > { %803 = vmatmul.mubr.msk.bf16.vlgmr.msra.gmra.mxu0 %vm385_vm0, %v360_v5  ;;  %804 = vmatmul.mubr.msk.bf16.vlgmr.msra.gmra.mxu1 %vm385_vm0, %v360_v5  ;;  %v504_v17 = vrot.slane %v499_v14, %v503_v10  ;;  %v508_v18 = vrot.slane %v499_v14, %v507_v11  ;;  %v512_v19 = vrot.slane %v499_v14, %v511_v12  ;;  %s1236_s6 = smov (!%p347_p7, %s798_s6), 7 }
  0x4d   : > { %v516_v20 = vrot.slane %v499_v14, %v515_v13  ;;  %v541_v21 = vrot.slane %v536_v16, %v503_v10  ;;  %v545_v22 = vrot.slane %v536_v16, %v507_v11  ;;  %v549_v23 = vrot.slane %v536_v16, %v511_v12  ;;  %s351_s9 = scalar_lea.vmem %s1222_s4, %s1236_s6 }
  0x4e   : > { %v553_v24 = vrot.slane %v536_v16, %v515_v13  ;;  %v482_v25 = vsub.s32 %v479_v15, %v481_v7  ;;  %v517_v26 = vcombine.low %v504_v17, %v508_v18  ;;  %v608_v56 = vunpack.c.0.s8 %v607_v52 }
  0x4f   : > { %v518_v27 = vcombine.low %v512_v19, %v516_v20  ;;  %v554_v28 = vcombine.low %v541_v21, %v545_v22 }
  0x50   : > { %v555_v29 = vcombine.low %v549_v23, %v553_v24  ;;  %v525_v32 = vrot.slane %v517_v26, %v482_v25  ;;  %v611_v61 = vsub.s32 %v608_v56, %v481_v7 }
  0x51   : > { %v532_v33 = vrot.slane %v518_v27, %v482_v25  ;;  %v562_v38 = vrot.slane %v554_v28, %v482_v25 }
  0x52   : > { %v569_v39 = vrot.slane %v555_v29, %v482_v25 }
  0x53   : > { %v533_v44 = vcombine.low %v525_v32, %v532_v33 }
  0x54   : > { %v570_v48 = vcombine.low %v562_v38, %v569_v39 }
 0x10c   : > { %v423_v30 = vpop.f32.mrf.mxu0  ;;  %v464_v31 = vpop.f32.mrf.mxu1 }
 0x10e   : > { %v425_v34 = vpop.f32.mrf.mxu0  ;;  %v466_v35 = vpop.f32.mrf.mxu1 }
 0x10f   : > { %v475_v36 = vcombine.low %v423_v30, %v425_v34  ;;  %v476_v37 = vcombine.low %v464_v31, %v466_v35 }
 0x110   : > { %v427_v40 = vpop.f32.mrf.mxu0  ;;  %v468_v41 = vpop.f32.mrf.mxu1 }
 0x111   : > { %v483_v42 = vrot.slane %v475_v36, %v482_v25  ;;  %v490_v43 = vrot.slane %v476_v37, %v482_v25 }
 0x112   : > { %v428_v45 = vpop.f32.mrf.mxu0  ;;  %v469_v46 = vpop.f32.mrf.mxu1 }
 0x113   : > { %v491_v47 = vcombine.low %v483_v42, %v490_v43 }
 0x115   : > { %v535_v49 = vmul.f32 %v533_v44, %v491_v47 }
 0x117   : > { %v572_v50 = vadd.f32 %v570_v48, %v535_v49 }
 0x119   : > { %v573_v53 = vmax.f32 %v572_v50, 0.0 }
 0x11b   : > { %v575_v54 = vcombine.high %v573_v53, %v573_v53  ;;  %v582_v55 = vrot.slane %v573_v53, %v482_v25 }
 0x11d   : > { %v589_v57 = vrot.slane %v575_v54, %v482_v25  ;;  %v590_v58 = vcombine.high %v582_v55, %v582_v55 }
 0x11f   : > { %v591_v59 = vcombine.high %v589_v57, %v589_v57  ;;  %v805_v60 = vpack.c.bf16 %v590_v58, %v582_v55 }
 0x121   : > { %v806_v62 = vpack.c.bf16 %v591_v59, %v589_v57  ;;  %v612_v63 = vrot.slane %v805_v60, %v611_v61 }
 0x123   : > { %v619_v0 = vrot.slane %v806_v62, %v611_v61 }
 0x125   : > { %v620_v1 = vcombine.low %v612_v63, %v619_v0 }
 0x127   : > { %807 = vst.sshfl [vmem:[%s351_s9] sm:$0x55 pattern:$0x73625140] %v620_v1 }
 0x128 PF: > { %s20_s20 = sadd.s32 1, %s1028_s20   ;;  %s1228_s15 = smov %s1012_s16 }
 0x129   : > { %p17_p9 = scmp.ge.s32.totalorder %s20_s20, 4   ;;  %s1229_s16 = smov %s1016_s17 }
 0x12a   : > { %s1230_s17 = smov %s1111_s26  ;;  %s1231_s18 = smov %s1024_s19 }
 0x12b   : > { %s1232_s19 = smov %s1234_s22  ;;  %19 = sbr.rel (!%p17_p9) target bundleno = 6 (0x6), region = 111 }
 0x130   :  { %658 = vsyncpa [#allocation4], 1 }
 0x131   :  { %660 = vsyncpa [#allocation4 + $0x1], 1 }
 0x132   :  { %661 = vsyncpa [#allocation6], 1 }
 0x133   :  { %663 = vsyncpa [#allocation6 + $0x1], 1 }

// kernel: dcgan_g_forward.6
= control target key start
LH: loop header
LB: loop body
LE: loop exit
PB: predicated region body
PF: predicated region fallthrough
CT: control target
= control target key end

     0   :  { %9 = vsyncpa [#allocation4], 0  ;;  %s1405_s0 = inlined_call_operand.vmem [shape: bf16[32,576], index: 0, kind: input, shape index: {}]   ;;  %s1406_s1 = inlined_call_operand.hbm [shape: bf16[576,128], index: 1, kind: input, shape index: {}]   ;;  %s1407_s2 = inlined_call_operand.hbm [shape: f32[1,128], index: 2, kind: input, shape index: {}]   ;;  %s1408_s3 = inlined_call_operand.hbm [shape: f32[1,128], index: 3, kind: input, shape index: {}]   ;;  %s1409_s4 = inlined_call_operand.vmem [shape: bf16[32,128], index: 4, kind: output, shape index: {}]  }
   0x1   :  { %10 = vsyncpa [#allocation6], 0  ;;  %s1306_s15 = smov 0   ;;  %s1308_s16 = smov 0  }
   0x2   :  { %s1310_s17 = smov 0  }
   0x3 LB: > { %s1274_s18 = smov [#allocation5]   ;;  %s930_s20 = sadd.s32 4294967295, %s1272_s17   ;;  %s1272_s17 = sphi %s1310_s17, %s16_s17   ;;  %s1268_s16 = sphi %s1308_s16, %s1415_s16   ;;  %s1264_s15 = sphi %s1306_s15, %s1414_s15  }
   0x4   : > { %s208_s19 = sshll.u32 %s1274_s18, 4  ;;  %p932_p0 = scmp.ge.s32.totalorder %s1272_s17, 1  ;;  %s209_s19 = int_to_ptr.vmem [resolvable:$true] %s208_s19 }
   0x5   : > { %p176_p1 = scmp.lt.s32.totalorder %s1272_s17, 3  ;;  %p1324_p2 = scmp.eq.s32.totalorder %s930_s20, 0 }
   0x6   : > { %s35_s23 = sadd.s32 1, %s1268_s16  ;;  %s1275_s26 = smov [#allocation3]  }
   0x7   : > { %p1328_p3 = pnand %p932_p0, %p176_p1  ;;  %p1341_p6 = scmp.ge.s32.totalorder %s35_s23, 2 }
   0x8   : > { %s192_s27 = sshll.u32 %s1275_s26, 4  ;;  %s1175_s28 = scalar_lea.vmem %s209_s19, 16  ;;  %s193_s27 = int_to_ptr.vmem [resolvable:$true] %s192_s27 }
   0x9   : > { %p1074_p4 = pneg %p1328_p3  ;;  %p1176_p8 = scmp.ne.s32.totalorder %s209_s19, %s1175_s28 }
   0xa   : > { %s1182_s29 = scalar_lea.vmem %s209_s19, 32  ;;  %p1183_p11 = scmp.lt.s32.totalorder %s209_s19, %s209_s19 }
   0xb   : > { %p1337_p5 = pnand %p1324_p2, %p1074_p4  ;;  %p1184_p12 = scmp.lt.s32.totalorder %s1182_s29, %s1175_s28 }
   0xd   : > { %p1166_p7 = pneg %p1337_p5  ;;  %p1185_p13 = por %p1184_p12, %p1183_p11 }
   0xf   : > { %p1178_p9 = pnand %p1176_p8, %p1166_p7 }
  0x11   : > { %p1179_p10 = pneg %p1178_p9 }
  0x13   : > { %p1186_p0 = pnand %p1185_p13, %p1179_p10 }
  0x15   : > { %1189 = shalt.err (!%p1186_p0)
}
  0x16   : > { %1080 = dma.hbm_to_vmem [thread:$0]  (!%p1337_p5), %s1407_s2, 16, %s209_s19, [#allocation6]  }
  0x17   : > { %s1417_s23 = smov (%p1341_p6, %s35_s23), 0  ;;  %s1201_s6 = scalar_lea.vmem %s193_s27, 4608 }
  0x18   : > { %p1202_p1 = scmp.ne.s32.totalorder %s193_s27, %s1201_s6  ;;  %p1209_p9 = scmp.lt.s32.totalorder %s193_s27, %s193_s27 }
  0x19   : > { %p1210_p10 = scmp.lt.s32.totalorder %s1201_s6, %s1201_s6 }
  0x1a   : > { %p1204_p4 = pnand %p1202_p1, %p1166_p7 }
  0x1b   : > { %p1211_p11 = por %p1210_p10, %p1209_p9 }
  0x1c   : > { %p1205_p8 = pneg %p1204_p4 }
  0x1e   : > { %p1212_p12 = pnand %p1211_p11, %p1205_p8 }
  0x20   : > { %1215 = shalt.err (!%p1212_p12)
}
  0x21   : > { %s1276_s7 = smov 64   ;;  %s1277_s8 = smov 4  }
  0x22   : > { %1077 = dma.hbm_to_vmem [thread:$0]  (!%p1337_p5), %s1406_s1, 4608, %s193_s27, [#allocation4], %s1276_s7, %s1276_s7, %s1277_s8  }
  0x23   : > { %s1278_s11 = smov [#allocation7]  }
  0x24   : > { %s221_s12 = sshll.u32 %s1278_s11, 4  ;;  %s222_s12 = int_to_ptr.vmem [resolvable:$true] %s221_s12 }
  0x25   : > { %s1227_s13 = scalar_lea.vmem %s222_s12, 16  ;;  %s1234_s14 = scalar_lea.vmem %s222_s12, 32 }
  0x26   : > { %p1228_p6 = scmp.ne.s32.totalorder %s222_s12, %s1227_s13  ;;  %p1235_p1 = scmp.lt.s32.totalorder %s222_s12, %s222_s12 }
  0x27   : > { %p1236_p4 = scmp.lt.s32.totalorder %s1234_s14, %s1227_s13 }
  0x28   : > { %p1230_p13 = pnand %p1228_p6, %p1166_p7 }
  0x29   : > { %p1237_p8 = por %p1236_p4, %p1235_p1 }
  0x2a   : > { %p1231_p0 = pneg %p1230_p13 }
  0x2c   : > { %p1238_p9 = pnand %p1237_p8, %p1231_p0 }
  0x2e   : > { %1241 = shalt.err (!%p1238_p9)
}
  0x2f   : > { %1083 = dma.hbm_to_vmem [thread:$0]  (!%p1337_p5), %s1408_s3, 16, %s222_s12, [#allocation6]  }
  0x30   : > { %249 = sbr.rel (%p1328_p3) target bundleno = 314 (0x13a), region = 36 }
  0x35   : > { %1255 = dma.done.wait (%p1324_p2), [#allocation4], 4608  }
  0x36   : > { %1257 = vsyncadd (%p1324_p2), [#allocation4], 4294962688 }
  0x37   : > { %1259 = dma.done.wait (%p1324_p2), [#allocation6], 32  }
  0x38   : > { %1261 = vsyncadd (%p1324_p2), [#allocation6], 4294967264  ;;  %v1121_v0 = vld [vmem:[#allocation3 + $0x78] sm:$0xff]   ;;  %v1125_v4 = vld [vmem:[#allocation3 + $0x70] sm:$0xff]   ;;  %s941_s20 = sshll.u32 %s1264_s15, 1  ;;  %v1279_v34 = vmov 0.0  }
  0x39   : > { %v1122_v1 = vld [vmem:[#allocation3 + $0xf8] sm:$0xff]   ;;  %1000 = vmatprep.subr.bf16.mxu0 %v1121_v0  ;;  %v1126_v5 = vld [vmem:[#allocation3 + $0xf0] sm:$0xff]   ;;  %v1129_v8 = vld [vmem:[#allocation3 + $0x68] sm:$0xff]   ;;  %p293_p2 = scmp.lt.s32.totalorder %s941_s20, 3  ;;  %vm1280_vm0 = vmmov 0   ;;  %vm641_vm1 = vcmask 523264  }
  0x3a   : > { %v1123_v2 = vld [vmem:[#allocation3 + $0x38] sm:$0xff]   ;;  %1022 = vmatprep.subr.bf16.mxu1 %v1122_v1  ;;  %v1127_v6 = vld [vmem:[#allocation3 + $0x30] sm:$0xff]   ;;  %v1130_v9 = vld [vmem:[#allocation3 + $0xe8] sm:$0xff]  }
  0x3b   : > { %v1124_v3 = vld [vmem:[#allocation3 + $0xb8] sm:$0xff]   ;;  %1001 = vmatpush3.bf16.msra.mxu0 %v1123_v2  ;;  %v1128_v7 = vld [vmem:[#allocation3 + $0xb0] sm:$0xff]   ;;  %v1131_v10 = vld [vmem:[#allocation3 + $0x28] sm:$0xff]   ;;  %s1419_s20 = smov (!%p293_p2, %s941_s20), 3 }
  0x3c   : > { %1023 = vmatpush3.bf16.msra.mxu1 %v1124_v3  ;;  %1002 = vmatprep.subr.bf16.mxu0 %v1125_v4  ;;  %v1132_v11 = vld [vmem:[#allocation3 + $0xa8] sm:$0xff]   ;;  %v1133_v12 = vld [vmem:[#allocation3 + $0x60] sm:$0xff]   ;;  %v1137_v16 = vld [vmem:[#allocation3 + $0x58] sm:$0xff]   ;;  %s1061_s15 = smul.u32 20, %s1419_s20  ;;  %s944_s25 = sshll.u32 %s1419_s20, 2 }
  0x3d   : > { %1024 = vmatprep.subr.bf16.mxu1 %v1126_v5  ;;  %v1134_v13 = vld [vmem:[#allocation3 + $0xe0] sm:$0xff]   ;;  %v1138_v17 = vld [vmem:[#allocation3 + $0xd8] sm:$0xff]   ;;  %v1141_v20 = vld [vmem:[#allocation3 + $0x50] sm:$0xff]   ;;  %s311_s28 = scalar_lea.vmem %s1409_s4, %s944_s25 }
  0x3e   : > { %v1135_v14 = vld [vmem:[#allocation3 + $0x20] sm:$0xff]   ;;  %v1139_v18 = vld [vmem:[#allocation3 + $0x18] sm:$0xff]   ;;  %v1142_v21 = vld [vmem:[#allocation3 + $0xd0] sm:$0xff]   ;;  %s300_s24 = scalar_lea.vmem %s1405_s0, %s1061_s15 }
  0x3f   : > { %1003 = vmatpush3.bf16.msra.mxu0 %v1127_v6  ;;  %v1136_v15 = vld [vmem:[#allocation3 + $0xa0] sm:$0xff]   ;;  %v1140_v19 = vld [vmem:[#allocation3 + $0x98] sm:$0xff]   ;;  %v1143_v22 = vld [vmem:[#allocation3 + $0x10] sm:$0xff]  }
  0x40   : > { %1025 = vmatpush3.bf16.msra.mxu1 %v1128_v7  ;;  %1004 = vmatprep.subr.bf16.mxu0 %v1129_v8  ;;  %v1144_v23 = vld [vmem:[#allocation3 + $0x90] sm:$0xff]   ;;  %v1145_v24 = vld [vmem:[#allocation3 + $0x48] sm:$0xff]   ;;  %v1149_v28 = vld [vmem:[#allocation3 + $0x40] sm:$0xff]  }
  0x41   : > { %1026 = vmatprep.subr.bf16.mxu1 %v1130_v9  ;;  %v1146_v25 = vld [vmem:[#allocation3 + $0xc8] sm:$0xff]   ;;  %v1150_v29 = vld [vmem:[#allocation3 + $0xc0] sm:$0xff]   ;;  %v1159_v37 = vld [vmem:[#allocation3 + $0x118] sm:$0xff]  }
  0x42   : > { %v1147_v26 = vld [vmem:[#allocation3 + $0x8] sm:$0xff]   ;;  %v1151_v30 = vld [vmem:[#allocation3] sm:$0xff]   ;;  %v1160_v38 = vld [vmem:[#allocation3 + $0x110] sm:$0xff]  }
  0x43   : > { %1005 = vmatpush3.bf16.msra.mxu0 %v1131_v10  ;;  %v1148_v27 = vld [vmem:[#allocation3 + $0x88] sm:$0xff]   ;;  %v1152_v31 = vld [vmem:[#allocation3 + $0x80] sm:$0xff]  }
  0x44   : > { %1027 = vmatpush3.bf16.msra.mxu1 %v1132_v11  ;;  %1006 = vmatprep.subr.bf16.mxu0 %v1133_v12  ;;  %v1153_v32 = vld [vmem:[%s300_s24] ss:$20 sps:$4 sm:$0xff]   ;;  %v1155_v33 = vld [vmem:[%s300_s24 + $0x4] ss:$20 sps:$4 sm:$0xff]   ;;  %v1156_v35 = vld [vmem:[%s300_s24 + $0x8] ss:$20 sps:$4 sm:$0xff]  }
  0x45   : > { %1028 = vmatprep.subr.bf16.mxu1 %v1134_v13  ;;  %v1158_v36 = vld [vmem:[%s300_s24 + $0xc] ss:$20 sps:$4 sm:$0xff]   ;;  %677 = vmatprep.mubr.bf16.mxu0 %v1155_v33  ;;  %v1163_v41 = vld [vmem:[%s300_s24 + $0x10] ss:$20 sps:$4 sm:$0xff]  }
  0x46   : > { %718 = vmatprep.mubr.bf16.mxu1 %v1158_v36  ;;  %v1161_v39 = vld [vmem:[#allocation3 + $0x108] sm:$0xff]   ;;  %v1162_v40 = vld [vmem:[#allocation3 + $0x100] sm:$0xff]  }
  0x47   : > { %1007 = vmatpush3.bf16.msra.mxu0 %v1135_v14  ;;  %v987_v56 = vld [vmem:[#allocation5] ss:$0 sm:$0xff]  ;;  %v988_v61 = vld [vmem:[#allocation7] ss:$0 sm:$0xff] }
  0x48   : > { %1029 = vmatpush3.bf16.msra.mxu1 %v1136_v15  ;;  %1008 = vmatprep.subr.bf16.mxu0 %v1137_v16 }
  0x49   : > { %1030 = vmatprep.subr.bf16.mxu1 %v1138_v17 }
  0x4b   : > { %1009 = vmatpush3.bf16.msra.mxu0 %v1139_v18 }
  0x4c   : > { %1031 = vmatpush3.bf16.msra.mxu1 %v1140_v19  ;;  %1010 = vmatprep.subr.bf16.mxu0 %v1141_v20 }
  0x4d   : > { %1032 = vmatprep.subr.bf16.mxu1 %v1142_v21 }
  0x4f   : > { %1011 = vmatpush3.bf16.msra.mxu0 %v1143_v22 }
  0x50   : > { %1033 = vmatpush3.bf16.msra.mxu1 %v1144_v23  ;;  %1012 = vmatprep.subr.bf16.mxu0 %v1145_v24 }
  0x51   : > { %1034 = vmatprep.subr.bf16.mxu1 %v1146_v25 }
  0x53   : > { %1013 = vmatpush3.bf16.msra.mxu0 %v1147_v26 }
  0x54   : > { %1035 = vmatpush3.bf16.msra.mxu1 %v1148_v27  ;;  %1014 = vmatprep.subr.bf16.mxu0 %v1149_v28 }
  0x55   : > { %1036 = vmatprep.subr.bf16.mxu1 %v1150_v29 }
  0x57   : > { %1015 = vmatpush3.bf16.msra.mxu0 %v1151_v30 }
  0x58   : > { %1037 = vmatpush3.bf16.msra.mxu1 %v1152_v31  ;;  %1049 = vmatprep.subr.bf16.mxu0 %v1279_v34 }
  0x5a   : > { %678 = vmatmul.mubr.bf16.vlgmr.msra.gmra.mxu0 %v1153_v32 }
  0x5b   : > { %719 = vmatmul.mubr.bf16.vlgmr.msra.gmra.mxu1 %v1156_v35  ;;  %1050 = vmatpush3.bf16.msra.mxu0 %v1159_v37 }
  0x5c   : > { %1051 = vmatprep.subr.bf16.mxu0 %v1279_v34  ;;  %1057 = vmatprep.mubr.msk.bf16.mxu0 %vm1280_vm0, %v1279_v34 }
  0x5f   : > { %1052 = vmatpush3.bf16.msra.mxu0 %v1160_v38 }
  0x60   : > { %1053 = vmatprep.subr.bf16.mxu0 %v1279_v34 }
  0x63   : > { %1054 = vmatpush3.bf16.msra.mxu0 %v1161_v39 }
  0x64   : > { %1055 = vmatprep.subr.bf16.mxu0 %v1279_v34 }
  0x67   : > { %1056 = vmatpush3.bf16.msra.mxu0 %v1162_v40 }
  0x6a   : > { %1058 = vmatmul.mubr.msk.bf16.vlgmr.msra.gmra.mxu0 %vm641_vm1, %v1163_v41 }
 0x11a   : > { %v1016_v42 = vpop.f32.mrf.mxu0 }
 0x11b   : > { %v1038_v43 = vpop.f32.mrf.mxu1 }
 0x11c   : > { %v1017_v44 = vpop.f32.mrf.mxu0 }
 0x11d   : > { %v1039_v45 = vpop.f32.mrf.mxu1  ;;  %v1018_v48 = vadd.f32 %v1017_v44, %v1016_v42 }
 0x11e   : > { %v1019_v46 = vpop.f32.mrf.mxu0  ;;  %v1040_v49 = vadd.f32 %v1039_v45, %v1038_v43 }
 0x11f   : > { %v1041_v47 = vpop.f32.mrf.mxu1 }
 0x120   : > { %v1020_v50 = vpop.f32.mrf.mxu0  ;;  %v721_v54 = vadd.f32 %v1040_v49, %v1018_v48 }
 0x121   : > { %v1042_v51 = vpop.f32.mrf.mxu1  ;;  %v1021_v52 = vadd.f32 %v1020_v50, %v1019_v46 }
 0x122   : > { %v1043_v53 = vadd.f32 %v1042_v51, %v1041_v47 }
 0x124   : > { %v724_v60 = vadd.f32 %v1043_v53, %v1021_v52 }
 0x12a   : > { %v761_v55 = vpop.f32.mrf.mxu0 }
 0x12b   : > { %v762_v57 = vadd.f32 %v761_v55, %v721_v54 }
 0x12c   : > { %v1059_v58 = vpop.f32.mrf.mxu0 }
 0x12d   : > { %v784_v59 = vmul.f32 %v987_v56, %v762_v57 }
 0x12e   : > { %v764_v62 = vpop.f32.mrf.mxu0 }
 0x12f   : > { %v765_v63 = vadd.f32 %v764_v62, %v724_v60  ;;  %v793_v1 = vadd.f32 %v988_v61, %v784_v59 }
 0x130   : > { %v1060_v0 = vpop.f32.mrf.mxu0 }
 0x131   : > { %v785_v2 = vmul.f32 %v987_v56, %v765_v63  ;;  %v795_v4 = vmax.f32 %v793_v1, 0.0 }
 0x133   : > { %v794_v3 = vadd.f32 %v988_v61, %v785_v2 }
 0x135   : > { %v796_v5 = vmax.f32 %v794_v3, 0.0 }
 0x137   : > { %v998_v6 = vpack.c.bf16 %v796_v5, %v795_v4 }
 0x139   : > { %999 = vst [vmem:[%s311_s28] sm:$0xff] %v998_v6  }
 0x13a PF: > { %s16_s17 = sadd.s32 1, %s1272_s17   ;;  %s1414_s15 = smov %s1268_s16 }
 0x13b   : > { %p13_p3 = scmp.ge.s32.totalorder %s16_s17, 4   ;;  %s1415_s16 = smov %s1417_s23 }
 0x13d   :  { %15 = sbr.rel (!%p13_p3) target bundleno = 3 (0x3), region = 90 }
 0x142   :  { %835 = vsyncpa [#allocation4], 1 }
 0x143   :  { %837 = vsyncpa [#allocation4 + $0x1], 1 }
 0x144   :  { %838 = vsyncpa [#allocation6], 1 }

// kernel: dcgan_g_forward.7
= control target key start
LH: loop header
LB: loop body
LE: loop exit
PB: predicated region body
PF: predicated region fallthrough
CT: control target
= control target key end

     0   :  { %9 = vsyncpa [#allocation4], 0  ;;  %s1466_s0 = inlined_call_operand.vmem [shape: bf16[128,288], index: 0, kind: input, shape index: {}]   ;;  %s1467_s1 = inlined_call_operand.vmem [shape: bf16[288,64], index: 1, kind: input, shape index: {}]   ;;  %s1468_s2 = inlined_call_operand.hbm [shape: f32[1,64], index: 2, kind: input, shape index: {}]   ;;  %s1469_s3 = inlined_call_operand.hbm [shape: f32[1,64], index: 3, kind: input, shape index: {}]   ;;  %s1470_s4 = inlined_call_operand.vmem [shape: bf16[128,64], index: 4, kind: output, shape index: {}]  }
   0x1   :  { %10 = vsyncpa [#allocation6], 0  ;;  %s1275_s15 = smov 0   ;;  %s1277_s16 = smov 0  }
   0x2   :  { %s1279_s17 = smov 0  }
   0x3 LB: > { %s940_s18 = sadd.s32 4294967295, %s1245_s17   ;;  %s35_s19 = sadd.s32 1, %s1241_s16  ;;  %s1245_s17 = sphi %s1279_s17, %s16_s17   ;;  %s1241_s16 = sphi %s1277_s16, %s1478_s16   ;;  %s1237_s15 = sphi %s1275_s15, %s1477_s15  }
   0x4   : > { %p37_p0 = scmp.ge.s32.totalorder %s35_s19, 2  ;;  %p942_p1 = scmp.ge.s32.totalorder %s1245_s17, 1 }
   0x5   : > { %p176_p2 = scmp.lt.s32.totalorder %s1245_s17, 3  ;;  %p1300_p4 = scmp.eq.s32.totalorder %s940_s18, 0 }
   0x6   : > { %s1480_s19 = smov (%p37_p0, %s35_s19), 0  ;;  %s1247_s22 = smov [#allocation3]  }
   0x7   : > { %p1296_p3 = pnand %p942_p1, %p176_p2  ;;  %s203_s23 = sshll.u32 %s1247_s22, 4  ;;  %s204_s23 = int_to_ptr.vmem [resolvable:$true] %s203_s23 }
   0x8   : > { %s1474_s21 = scalar_select %p1300_p4, 1, 0 }
   0x9   : > { %p1091_p5 = pneg %p1296_p3  ;;  %s1248_s24 = smov [#allocation5]  }
   0xa   : > { %s216_s25 = sshll.u32 %s1248_s24, 4  ;;  %s1174_s27 = scalar_lea.vmem %s204_s23, 16  ;;  %s217_s25 = int_to_ptr.vmem [resolvable:$true] %s216_s25 }
   0xb   : > { %p1308_p6 = pnand %p1300_p4, %p1091_p5  ;;  %p1175_p8 = scmp.ne.s32.totalorder %s204_s23, %s1174_s27 }
   0xc   : > { %s1181_s28 = scalar_lea.vmem %s204_s23, 32  ;;  %p1182_p11 = scmp.lt.s32.totalorder %s204_s23, %s204_s23 }
   0xd   : > { %p1165_p7 = pneg %p1308_p6  ;;  %p1183_p12 = scmp.lt.s32.totalorder %s1181_s28, %s1174_s27 }
   0xf   : > { %p1177_p9 = pnand %p1175_p8, %p1165_p7  ;;  %p1184_p13 = por %p1183_p12, %p1182_p11 }
  0x11   : > { %p1178_p10 = pneg %p1177_p9 }
  0x13   : > { %p1185_p0 = pnand %p1184_p13, %p1178_p10 }
  0x15   : > { %1188 = shalt.err (!%p1185_p0)
}
  0x16   : > { %1094 = dma.hbm_to_vmem [thread:$0]  (!%p1308_p6), %s1468_s2, 16, %s204_s23, [#allocation4]  }
  0x17   : > { %s1200_s5 = scalar_lea.vmem %s217_s25, 16  ;;  %s1207_s6 = scalar_lea.vmem %s217_s25, 32 }
  0x18   : > { %p1201_p1 = scmp.ne.s32.totalorder %s217_s25, %s1200_s5  ;;  %p1208_p8 = scmp.lt.s32.totalorder %s217_s25, %s217_s25 }
  0x19   : > { %p1209_p9 = scmp.lt.s32.totalorder %s1207_s6, %s1200_s5 }
  0x1a   : > { %p1203_p2 = pnand %p1201_p1, %p1165_p7 }
  0x1b   : > { %p1210_p4 = por %p1209_p9, %p1208_p8 }
  0x1c   : > { %p1204_p5 = pneg %p1203_p2 }
  0x1e   : > { %p1211_p11 = pnand %p1210_p4, %p1204_p5 }
  0x20   : > { %1214 = shalt.err (!%p1211_p11)
}
  0x21   : > { %1097 = dma.hbm_to_vmem [thread:$0]  (!%p1308_p6), %s1469_s3, 16, %s217_s25, [#allocation6]  }
  0x22   : > { %244 = sbr.rel (%p1296_p3) target bundleno = 313 (0x139), region = 36  ;;  %p1476_p10 = scmp.ne.s32.totalorder (!%p1296_p3), %s1474_s21, 0 }
  0x27   : > { %1228 = dma.done.wait (%p1476_p10), [#allocation4], 16  }
  0x28   : > { %1230 = vsyncadd (%p1476_p10), [#allocation4], 4294967280 }
  0x29   : > { %1232 = dma.done.wait (%p1476_p10), [#allocation6], 16  }
  0x2a   : > { %1234 = vsyncadd (%p1476_p10), [#allocation6], 4294967280  ;;  %s950_s9 = sshll.u32 %s1237_s15, 3  ;;  %v1129_v0 = vld [vmem:[%s1467_s1 + $0x78] sm:$0xff]   ;;  %v1131_v2 = vld [vmem:[%s1467_s1 + $0x70] sm:$0xff]   ;;  %vm562_vm0 = vcmask 261120  }
  0x2b   : > { %v1130_v1 = vld [vmem:[%s1467_s1 + $0x38] sm:$0xff]   ;;  %1008 = vmatprep.subr.bf16.mxu0 %v1129_v0  ;;  %1066 = vmatprep.subr.bf16.mxu1 %v1129_v0  ;;  %p292_p3 = scmp.lt.s32.totalorder %s950_s9, 15  ;;  %v1132_v3 = vld [vmem:[%s1467_s1 + $0x30] sm:$0xff]   ;;  %v1133_v4 = vld [vmem:[%s1467_s1 + $0x68] sm:$0xff]   ;;  %vm325_vm1 = vcmask 523264   ;;  %v1249_v30 = vmov 0.0  }
  0x2c   : > { %1009 = vmatpush3.bf16.msra.mxu0 %v1130_v1  ;;  %1074 = vmatpush3.bf16.msra.mxu1 %v1130_v1  ;;  %v1134_v5 = vld [vmem:[%s1467_s1 + $0x28] sm:$0xff]   ;;  %v1135_v6 = vld [vmem:[%s1467_s1 + $0x60] sm:$0xff]   ;;  %v1137_v8 = vld [vmem:[%s1467_s1 + $0x58] sm:$0xff]   ;;  %328 = vst.msk [vmem:[#allocation2 + $0x10] sm:$0xff] %vm325_vm1, %v1249_v30  ;;  %vm803_vm2 = vcmask 519168  }
  0x2d   : > { %1010 = vmatprep.subr.bf16.mxu0 %v1131_v2  ;;  %1067 = vmatprep.subr.bf16.mxu1 %v1131_v2  ;;  %s1482_s9 = smov (!%p292_p3, %s950_s9), 15  ;;  %v1136_v7 = vld [vmem:[%s1467_s1 + $0x20] sm:$0xff]   ;;  %v1138_v9 = vld [vmem:[%s1467_s1 + $0x18] sm:$0xff]   ;;  %v1139_v10 = vld [vmem:[%s1467_s1 + $0x50] sm:$0xff]   ;;  %326 = vst.msk [vmem:[#allocation2] sm:$0xff] %vm325_vm1, %v1249_v30 }
  0x2e   : > { %s1082_s27 = smul.u32 12, %s1482_s9  ;;  %v1140_v13 = vld [vmem:[%s1467_s1 + $0x10] sm:$0xff]   ;;  %v1141_v14 = vld [vmem:[%s1467_s1 + $0x48] sm:$0xff]   ;;  %v1143_v16 = vld [vmem:[%s1467_s1 + $0x40] sm:$0xff]   ;;  %327 = vst.msk [vmem:[#allocation2 + $0x8] sm:$0xff] %vm325_vm1, %v1249_v30  ;;  %s953_s5 = sshll.u32 %s1482_s9, 2 }
  0x2f   : > { %v1142_v15 = vld [vmem:[%s1467_s1 + $0x8] sm:$0xff]   ;;  %v1144_v17 = vld [vmem:[%s1467_s1] sm:$0xff]   ;;  %329 = vst.msk [vmem:[#allocation2 + $0x18] sm:$0xff] %vm325_vm1, %v1249_v30  ;;  %330 = vst.msk [vmem:[#allocation2 + $0x20] sm:$0xff] %vm325_vm1, %v1249_v30 }
  0x30   : > { %1011 = vmatpush3.bf16.msra.mxu0 %v1132_v3  ;;  %1075 = vmatpush3.bf16.msra.mxu1 %v1132_v3  ;;  %s1374_s8 = scalar_lea.vmem %s1466_s0, %s1082_s27  ;;  %v1151_v18 = vld [vmem:[%s1467_s1 + $0x88] sm:$0xff]   ;;  %v1152_v22 = vld [vmem:[%s1467_s1 + $0x80] sm:$0xff]   ;;  %331 = vst.msk [vmem:[#allocation2 + $0x28] sm:$0xff] %vm325_vm1, %v1249_v30  ;;  %332 = vst.msk [vmem:[#allocation2 + $0x30] sm:$0xff] %vm325_vm1, %v1249_v30 }
  0x31   : > { %1012 = vmatprep.subr.bf16.mxu0 %v1133_v4  ;;  %1068 = vmatprep.subr.bf16.mxu1 %v1133_v4  ;;  %v1147_v11 = vld [vmem:[%s1374_s8 + $0x4] ss:$12 sps:$4 sm:$0xff]   ;;  %v1150_v12 = vld [vmem:[%s1374_s8 + $0x4c] ss:$12 sps:$4 sm:$0xff]   ;;  %v1148_v20 = vld [vmem:[%s1374_s8 + $0x48] ss:$12 sps:$4 sm:$0xff]  }
  0x32   : > { %607 = vmatprep.mubr.bf16.mxu0 %v1147_v11  ;;  %631 = vmatprep.mubr.bf16.mxu1 %v1150_v12  ;;  %v1145_v19 = vld [vmem:[%s1374_s8] ss:$12 sps:$4 sm:$0xff]   ;;  %v1153_v21 = vld [vmem:[%s1374_s8 + $0x1c] ss:$12 sps:$4 sm:$0xff]   ;;  %v1156_v24 = vld [vmem:[%s1374_s8 + $0x18] ss:$12 sps:$4 sm:$0xff]  }
  0x33   : > { %v1155_v23 = vld [vmem:[%s1374_s8 + $0x8] ss:$12 sps:$4 sm:$0xff]   ;;  %v1157_v25 = vld [vmem:[%s1374_s8 + $0x20] ss:$12 sps:$4 sm:$0xff]   ;;  %v1160_v27 = vld [vmem:[%s1374_s8 + $0x38] ss:$12 sps:$4 sm:$0xff]  }
  0x34   : > { %1013 = vmatpush3.bf16.msra.mxu0 %v1134_v5  ;;  %1076 = vmatpush3.bf16.msra.mxu1 %v1134_v5  ;;  %v1158_v26 = vld [vmem:[%s1374_s8 + $0x34] ss:$12 sps:$4 sm:$0xff]   ;;  %v1161_v28 = vld [vmem:[%s1374_s8 + $0x30] ss:$12 sps:$4 sm:$0xff]   ;;  %333 = vst.msk [vmem:[#allocation2 + $0x38] sm:$0xff] %vm325_vm1, %v1249_v30 }
  0x35   : > { %1014 = vmatprep.subr.bf16.mxu0 %v1135_v6  ;;  %1069 = vmatprep.subr.bf16.mxu1 %v1135_v6  ;;  %v1162_v29 = vld [vmem:[%s1374_s8 + $0x50] ss:$12 sps:$4 sm:$0xff]   ;;  %v334_v43 = vld [vmem:[#allocation2] sm:$0xff]  ;;  %v335_v54 = vld [vmem:[#allocation2 + $0x8] sm:$0xff]  ;;  %s1438_s8 = scalar_lea.vmem %s1470_s4, %s953_s5 }
  0x36   : > { %v336_v47 = vld [vmem:[#allocation2 + $0x10] sm:$0xff]  ;;  %v337_v60 = vld [vmem:[#allocation2 + $0x18] sm:$0xff] }
  0x37   : > { %v340_v62 = vld [vmem:[#allocation2 + $0x30] sm:$0xff] }
  0x38   : > { %1015 = vmatpush3.bf16.msra.mxu0 %v1136_v7  ;;  %1077 = vmatpush3.bf16.msra.mxu1 %v1136_v7 }
  0x39   : > { %1016 = vmatprep.subr.bf16.mxu0 %v1137_v8  ;;  %1070 = vmatprep.subr.bf16.mxu1 %v1137_v8 }
  0x3b   : > { %v341_v12 = vld [vmem:[#allocation2 + $0x38] sm:$0xff] }
  0x3c   : > { %1017 = vmatpush3.bf16.msra.mxu0 %v1138_v9  ;;  %1078 = vmatpush3.bf16.msra.mxu1 %v1138_v9  ;;  %v988_v9 = vld [vmem:[#allocation3] ss:$0 sm:$0xff] }
  0x3d   : > { %1018 = vmatprep.subr.bf16.mxu0 %v1139_v10  ;;  %1071 = vmatprep.subr.bf16.mxu1 %v1139_v10  ;;  %v338_v10 = vld [vmem:[#allocation2 + $0x20] sm:$0xff] }
  0x40   : > { %1019 = vmatpush3.bf16.msra.mxu0 %v1140_v13  ;;  %1079 = vmatpush3.bf16.msra.mxu1 %v1140_v13 }
  0x41   : > { %1020 = vmatprep.subr.bf16.mxu0 %v1141_v14  ;;  %1072 = vmatprep.subr.bf16.mxu1 %v1141_v14 }
  0x44   : > { %1021 = vmatpush3.bf16.msra.mxu0 %v1142_v15  ;;  %1080 = vmatpush3.bf16.msra.mxu1 %v1142_v15 }
  0x45   : > { %1022 = vmatprep.subr.bf16.mxu0 %v1143_v16  ;;  %1073 = vmatprep.subr.bf16.mxu1 %v1143_v16  ;;  %v989_v16 = vld [vmem:[#allocation5] ss:$0 sm:$0xff] }
  0x48   : > { %1023 = vmatpush3.bf16.msra.mxu0 %v1144_v17  ;;  %1081 = vmatpush3.bf16.msra.mxu1 %v1144_v17 }
  0x49   : > { %1054 = vmatprep.subr.bf16.mxu1 %v1151_v18 }
  0x4b   : > { %608 = vmatmul.mubr.bf16.vlgmr.msra.gmra.mxu0 %v1145_v19  ;;  %632 = vmatmul.mubr.bf16.vlgmr.msra.gmra.mxu1 %v1148_v20 }
  0x4c   : > { %1055 = vmatpush3.bf16.msra.mxu1 %v1151_v18  ;;  %615 = vmatprep.mubr.bf16.mxu0 %v1153_v21 }
  0x4d   : > { %1056 = vmatprep.subr.bf16.mxu1 %v1152_v22  ;;  %1058 = vmatprep.mubr.msk.bf16.mxu1 %vm562_vm0, %v1155_v23 }
  0x50   : > { %1057 = vmatpush3.bf16.msra.mxu1 %v1152_v22 }
  0x53   : > { %616 = vmatmul.mubr.bf16.gmra.mxu0 %v1156_v24  ;;  %1059 = vmatmul.mubr.msk.bf16.vlgmr.msra.gmra.mxu1 %vm562_vm0, %v1157_v25  ;;  %v339_v24 = vld [vmem:[#allocation2 + $0x28] sm:$0xff] }
  0x54   : > { %623 = vmatprep.mubr.bf16.mxu0 %v1158_v26  ;;  %1062 = vmatprep.mubr.msk.bf16.mxu1 %vm562_vm0, %v1160_v27 }
  0x5b   : > { %624 = vmatmul.mubr.bf16.gmra.mxu0 %v1161_v28  ;;  %1063 = vmatmul.mubr.msk.bf16.gmra.mxu1 %vm562_vm0, %v1162_v29 }
 0x10b   : > { %v1024_v31 = vpop.f32.mrf.mxu0  ;;  %v1042_v32 = vpop.f32.mrf.mxu1 }
 0x10d   : > { %v1025_v33 = vpop.f32.mrf.mxu0  ;;  %v1043_v34 = vpop.f32.mrf.mxu1 }
 0x10e   : > { %v1026_v41 = vadd.f32 %v1025_v33, %v1024_v31  ;;  %v1044_v56 = vadd.f32 %v1043_v34, %v1042_v32 }
 0x10f   : > { %v1027_v35 = vpop.f32.mrf.mxu0  ;;  %v1045_v36 = vpop.f32.mrf.mxu1 }
 0x111   : > { %v1028_v37 = vpop.f32.mrf.mxu0  ;;  %v1046_v38 = vpop.f32.mrf.mxu1 }
 0x112   : > { %v1029_v50 = vadd.f32 %v1028_v37, %v1027_v35  ;;  %v1047_v5 = vadd.f32 %v1046_v38, %v1045_v36 }
 0x113   : > { %v1030_v39 = vpop.f32.mrf.mxu0  ;;  %v1060_v40 = vpop.f32.mrf.mxu1 }
 0x115   : > { %v1031_v42 = vpop.f32.mrf.mxu0  ;;  %v674_v44 = vpop.f32.mrf.mxu1 }
 0x116   : > { %v1032_v45 = vadd.f32 %v1031_v42, %v1030_v39  ;;  %v675_v46 = vadd.f32 %v1026_v41, %v674_v44 }
 0x117   : > { %v1033_v48 = vpop.f32.mrf.mxu0  ;;  %v1061_v49 = vpop.f32.mrf.mxu1 }
 0x118   : > { %v683_v51 = vadd.f32 %v1060_v40, %v1032_v45  ;;  %v705_v52 = vadd.f32 %v675_v46, %v334_v43 }
 0x119   : > { %v1034_v53 = vpop.f32.mrf.mxu0  ;;  %v677_v55 = vpop.f32.mrf.mxu1 }
 0x11a   : > { %v707_v57 = vadd.f32 %v683_v51, %v336_v47  ;;  %714 = vst.msk [vmem:[#allocation2] sm:$0xff] %vm325_vm1, %v705_v52  ;;  %v1035_v58 = vadd.f32 %v1034_v53, %v1033_v48  ;;  %v678_v59 = vadd.f32 %v1029_v50, %v677_v55 }
 0x11b   : > { %v1036_v61 = vpop.f32.mrf.mxu0  ;;  %v1064_v63 = vpop.f32.mrf.mxu1 }
 0x11c   : > { %716 = vst.msk [vmem:[#allocation2 + $0x10] sm:$0xff] %vm325_vm1, %v707_v57  ;;  %v686_v0 = vadd.f32 %v1061_v49, %v1035_v58  ;;  %v706_v1 = vadd.f32 %v678_v59, %v335_v54  ;;  %v699_v2 = vadd.f32 %v1064_v63, %v1044_v56 }
 0x11d   : > { %v1037_v3 = vpop.f32.mrf.mxu0  ;;  %v690_v4 = vpop.f32.mrf.mxu1 }
 0x11e   : > { %v708_v6 = vadd.f32 %v686_v0, %v337_v60  ;;  %715 = vst.msk [vmem:[#allocation2 + $0x8] sm:$0xff] %vm325_vm1, %v706_v1  ;;  %v711_v7 = vadd.f32 %v699_v2, %v340_v62  ;;  %v1038_v8 = vadd.f32 %v1037_v3, %v1036_v61 }
 0x11f   : > { %v1039_v11 = vpop.f32.mrf.mxu0  ;;  %v1065_v13 = vpop.f32.mrf.mxu1 }
 0x120   : > { %717 = vst.msk [vmem:[#allocation2 + $0x18] sm:$0xff] %vm325_vm1, %v708_v6  ;;  %720 = vst.msk [vmem:[#allocation2 + $0x30] sm:$0xff] %vm325_vm1, %v711_v7  ;;  %v691_v14 = vadd.f32 %v1038_v8, %v690_v4  ;;  %v702_v15 = vadd.f32 %v1065_v13, %v1047_v5 }
 0x121   : > { %v725_v17 = vld [vmem:[#allocation2] sm:$0xff]  ;;  %v1040_v18 = vpop.f32.mrf.mxu0  ;;  %v693_v25 = vpop.f32.mrf.mxu1 }
 0x122   : > { %v740_v19 = vmul.f32 %v988_v9, %v725_v17  ;;  %v709_v20 = vadd.f32 %v691_v14, %v338_v10  ;;  %v712_v21 = vadd.f32 %v702_v15, %v341_v12  ;;  %v1041_v22 = vadd.f32 %v1040_v18, %v1039_v11 }
 0x123   : > { %v727_v23 = vld [vmem:[#allocation2 + $0x10] sm:$0xff] }
 0x124   : > { %v742_v26 = vmul.f32 %v988_v9, %v727_v23  ;;  %v755_v27 = vadd.f32 %v989_v16, %v740_v19  ;;  %718 = vst.msk [vmem:[#allocation2 + $0x20] sm:$0xff] %vm325_vm1, %v709_v20  ;;  %721 = vst.msk [vmem:[#allocation2 + $0x38] sm:$0xff] %vm325_vm1, %v712_v21  ;;  %v694_v28 = vadd.f32 %v1041_v22, %v693_v25 }
 0x125   : > { %v726_v29 = vld [vmem:[#allocation2 + $0x8] sm:$0xff] }
 0x126   : > { %v757_v30 = vadd.f32 %v989_v16, %v742_v26  ;;  %v763_v31 = vmax.f32 %v755_v27, 0.0  ;;  %v741_v32 = vmul.f32 %v988_v9, %v726_v29  ;;  %v710_v33 = vadd.f32 %v694_v28, %v339_v24 }
 0x127   : > { %v728_v34 = vld [vmem:[#allocation2 + $0x18] sm:$0xff]  ;;  %v731_v35 = vld [vmem:[#allocation2 + $0x30] sm:$0xff] }
 0x128   : > { %v765_v36 = vmax.f32 %v757_v30, 0.0  ;;  %v1000_v37 = vpack.c.bf16 %v763_v31, %v763_v31  ;;  %v743_v38 = vmul.f32 %v988_v9, %v728_v34  ;;  %v756_v39 = vadd.f32 %v989_v16, %v741_v32  ;;  %719 = vst.msk [vmem:[#allocation2 + $0x28] sm:$0xff] %vm325_vm1, %v710_v33 }
 0x129   : > { %v746_v40 = vmul.f32 %v988_v9, %v731_v35 }
 0x12a   : > { %v1002_v41 = vpack.c.bf16 %v765_v36, %v765_v36  ;;  %804 = vst.msk [vmem:[%s1438_s8] sm:$0xf] %vm803_vm2, %v1000_v37  ;;  %v758_v42 = vadd.f32 %v989_v16, %v743_v38  ;;  %v764_v43 = vmax.f32 %v756_v39, 0.0 }
 0x12b   : > { %v761_v44 = vadd.f32 %v989_v16, %v746_v40  ;;  %v729_v45 = vld [vmem:[#allocation2 + $0x20] sm:$0xff]  ;;  %v732_v46 = vld [vmem:[#allocation2 + $0x38] sm:$0xff] }
 0x12c   : > { %806 = vst.msk [vmem:[%s1438_s8 + $0x8] sm:$0xf] %vm803_vm2, %v1002_v41  ;;  %v766_v47 = vmax.f32 %v758_v42, 0.0  ;;  %v1001_v48 = vpack.c.bf16 %v764_v43, %v764_v43  ;;  %v744_v49 = vmul.f32 %v988_v9, %v729_v45  ;;  %v747_v50 = vmul.f32 %v988_v9, %v732_v46 }
 0x12d   : > { %v769_v51 = vmax.f32 %v761_v44, 0.0 }
 0x12e   : > { %v1003_v52 = vpack.c.bf16 %v766_v47, %v766_v47  ;;  %805 = vst.msk [vmem:[%s1438_s8 + $0x4] sm:$0xf] %vm803_vm2, %v1001_v48  ;;  %v759_v53 = vadd.f32 %v989_v16, %v744_v49  ;;  %v762_v54 = vadd.f32 %v989_v16, %v747_v50 }
 0x12f   : > { %v1006_v55 = vpack.c.bf16 %v769_v51, %v769_v51  ;;  %v730_v56 = vld [vmem:[#allocation2 + $0x28] sm:$0xff] }
 0x130   : > { %807 = vst.msk [vmem:[%s1438_s8 + $0xc] sm:$0xf] %vm803_vm2, %v1003_v52  ;;  %v767_v57 = vmax.f32 %v759_v53, 0.0  ;;  %v770_v58 = vmax.f32 %v762_v54, 0.0  ;;  %v745_v59 = vmul.f32 %v988_v9, %v730_v56 }
 0x131   : > { %810 = vst.msk [vmem:[%s1438_s8 + $0x18] sm:$0xf] %vm803_vm2, %v1006_v55 }
 0x132   : > { %v1004_v60 = vpack.c.bf16 %v767_v57, %v767_v57  ;;  %v1007_v61 = vpack.c.bf16 %v770_v58, %v770_v58  ;;  %v760_v62 = vadd.f32 %v989_v16, %v745_v59 }
 0x134   : > { %808 = vst.msk [vmem:[%s1438_s8 + $0x10] sm:$0xf] %vm803_vm2, %v1004_v60  ;;  %811 = vst.msk [vmem:[%s1438_s8 + $0x1c] sm:$0xf] %vm803_vm2, %v1007_v61  ;;  %v768_v63 = vmax.f32 %v760_v62, 0.0 }
 0x136   : > { %v1005_v0 = vpack.c.bf16 %v768_v63, %v768_v63 }
 0x138   : > { %809 = vst.msk [vmem:[%s1438_s8 + $0x14] sm:$0xf] %vm803_vm2, %v1005_v0 }
 0x139 PF: > { %s16_s17 = sadd.s32 1, %s1245_s17   ;;  %s1477_s15 = smov %s1241_s16 }
 0x13a   : > { %p13_p4 = scmp.ge.s32.totalorder %s16_s17, 4   ;;  %s1478_s16 = smov %s1480_s19 }
 0x13c   :  { %15 = sbr.rel (!%p13_p4) target bundleno = 3 (0x3), region = 88 }
 0x141   :  { %840 = vsyncpa [#allocation4], 1 }
 0x142   :  { %842 = vsyncpa [#allocation4 + $0x1], 1 }
 0x143   :  { %843 = vsyncpa [#allocation6], 1 }

// kernel: dcgan_g_forward.8
= control target key start
LH: loop header
LB: loop body
LE: loop exit
PB: predicated region body
PF: predicated region fallthrough
CT: control target
= control target key end

     0   :  { %s1624_s15 = smov 0   ;;  %s1626_s16 = smov 0   ;;  %s1960_s0 = inlined_call_operand.vmem [shape: bf16[512,144], index: 0, kind: input, shape index: {}]   ;;  %s1961_s1 = inlined_call_operand.vmem [shape: bf16[144,32], index: 1, kind: input, shape index: {}]   ;;  %s1962_s2 = inlined_call_operand.vmem [shape: f32[1,32], index: 2, kind: input, shape index: {}]   ;;  %s1963_s3 = inlined_call_operand.vmem [shape: f32[1,32], index: 3, kind: input, shape index: {}]   ;;  %s1964_s4 = inlined_call_operand.vmem [shape: bf16[512,32], index: 4, kind: output, shape index: {}]  }
   0x1   :  { %s1628_s17 = smov 0  }
   0x2 LB: > { %s33_s18 = sadd.s32 1, %s1591_s16  ;;  %p1340_p0 = scmp.ge.s32.totalorder %s1595_s17, 1  ;;  %s1595_s17 = sphi %s1628_s17, %s14_s17   ;;  %s1591_s16 = sphi %s1626_s16, %s1966_s16   ;;  %s1587_s15 = sphi %s1624_s15, %s1965_s15  }
   0x3   : > { %p35_p1 = scmp.ge.s32.totalorder %s33_s18, 2  ;;  %p224_p2 = scmp.lt.s32.totalorder %s1595_s17, 3 }
   0x5   : > { %s1968_s18 = smov (%p35_p1, %s33_s18), 0  ;;  %p225_p3 = pnand %p1340_p0, %p224_p2 }
   0x6   : > { %s1341_s21 = sshll.u32 (!%p225_p3), %s1587_s15, 5 }
   0x7   : > { %228 = sbr.rel (%p225_p3) target bundleno = 322 (0x142), region = 36  ;;  %p274_p4 = scmp.lt.s32.totalorder (!%p225_p3), %s1341_s21, 63 }
   0xc   : > { %v1516_v0 = vld [vmem:[%s1961_s1 + $0x38] sm:$0xff]   ;;  %v1597_v1 = vmov 0   ;;  %v1517_v2 = vld [vmem:[%s1961_s1 + $0x30] sm:$0xff]   ;;  %s1970_s21 = smov (!%p274_p4, %s1341_s21), 63  ;;  %v1518_v3 = vld [vmem:[%s1961_s1 + $0x28] sm:$0xff]   ;;  %vm313_vm0 = vcmask 261120  }
   0xd   : > { %675 = vmatprep.subr.bf16.mxu0 %v1597_v1  ;;  %1472 = vmatprep.subr.bf16.mxu1 %v1597_v1  ;;  %s1439_s26 = sshll.u32 %s1970_s21, 3  ;;  %v1519_v4 = vld [vmem:[%s1961_s1 + $0x20] sm:$0xff]   ;;  %vm626_vm1 = vcmask 130048   ;;  %v1598_v5 = vmov 0.0   ;;  %v1520_v8 = vld [vmem:[%s1961_s1 + $0x18] sm:$0xff]   ;;  %v1521_v9 = vld [vmem:[%s1961_s1 + $0x10] sm:$0xff]  }
   0xe   : > { %676 = vmatpush1.bf16.msra.mxu0 %v1516_v0  ;;  %1481 = vmatpush1.bf16.msra.mxu1 %v1516_v0  ;;  %s1663_s29 = scalar_lea.vmem %s1960_s0, %s1439_s26  ;;  %314 = vst.msk [vmem:[#allocation2] sm:$0xff] %vm313_vm0, %v1598_v5  ;;  %315 = vst.msk [vmem:[#allocation2 + $0x8] sm:$0xff] %vm313_vm0, %v1598_v5  ;;  %v1522_v10 = vld [vmem:[%s1961_s1 + $0x8] sm:$0xff]   ;;  %v1523_v11 = vld [vmem:[%s1961_s1] sm:$0xff]   ;;  %s1345_s24 = sshll.u32 %s1970_s21, 2  ;;  %vm1174_vm2 = vcmask 257024  }
   0xf   : > { %677 = vmatprep.subr.bf16.mxu0 %v1597_v1  ;;  %1473 = vmatprep.subr.bf16.mxu1 %v1597_v1  ;;  %316 = vst.msk [vmem:[#allocation2 + $0x10] sm:$0xff] %vm313_vm0, %v1598_v5  ;;  %317 = vst.msk [vmem:[#allocation2 + $0x18] sm:$0xff] %vm313_vm0, %v1598_v5  ;;  %v1527_v6 = vld [vmem:[%s1663_s29 + $0x4] ss:$8 sps:$4 sm:$0xff]   ;;  %v1525_v13 = vld [vmem:[%s1663_s29] ss:$8 sps:$4 sm:$0xff]   ;;  %s1803_s26 = scalar_lea.vmem %s1964_s4, %s1345_s24 }
  0x10   : > { %318 = vst.msk [vmem:[#allocation2 + $0x20] sm:$0xff] %vm313_vm0, %v1598_v5  ;;  %319 = vst.msk [vmem:[#allocation2 + $0x28] sm:$0xff] %vm313_vm0, %v1598_v5  ;;  %v1530_v7 = vld [vmem:[%s1663_s29 + $0x84] ss:$8 sps:$4 sm:$0xff]   ;;  %1387 = vmatprep.mubr.msk.bf16.mxu0 %vm626_vm1, %v1527_v6  ;;  %v1528_v14 = vld [vmem:[%s1663_s29 + $0x80] ss:$8 sps:$4 sm:$0xff]  }
  0x11   : > { %320 = vst.msk [vmem:[#allocation2 + $0x30] sm:$0xff] %vm313_vm0, %v1598_v5  ;;  %321 = vst.msk [vmem:[#allocation2 + $0x38] sm:$0xff] %vm313_vm0, %v1598_v5  ;;  %1395 = vmatprep.mubr.msk.bf16.mxu1 %vm626_vm1, %v1530_v7  ;;  %v1524_v12 = vld [vmem:[%s1961_s1 + $0x40] sm:$0xff]   ;;  %v1531_v15 = vld [vmem:[%s1663_s29 + $0x14] ss:$8 sps:$4 sm:$0xff]  }
  0x12   : > { %678 = vmatpush1.bf16.msra.mxu0 %v1517_v2  ;;  %1482 = vmatpush1.bf16.msra.mxu1 %v1517_v2  ;;  %322 = vst.msk [vmem:[#allocation2 + $0x40] sm:$0xff] %vm313_vm0, %v1598_v5  ;;  %323 = vst.msk [vmem:[#allocation2 + $0x48] sm:$0xff] %vm313_vm0, %v1598_v5  ;;  %v1533_v16 = vld [vmem:[%s1663_s29 + $0x94] ss:$8 sps:$4 sm:$0xff]   ;;  %v1535_v17 = vld [vmem:[%s1663_s29 + $0x10] ss:$8 sps:$4 sm:$0xff]  }
  0x13   : > { %679 = vmatprep.subr.bf16.mxu0 %v1597_v1  ;;  %1474 = vmatprep.subr.bf16.mxu1 %v1597_v1  ;;  %324 = vst.msk [vmem:[#allocation2 + $0x50] sm:$0xff] %vm313_vm0, %v1598_v5  ;;  %325 = vst.msk [vmem:[#allocation2 + $0x58] sm:$0xff] %vm313_vm0, %v1598_v5  ;;  %v1536_v18 = vld [vmem:[%s1663_s29 + $0x90] ss:$8 sps:$4 sm:$0xff]   ;;  %v1537_v19 = vld [vmem:[%s1663_s29 + $0x24] ss:$8 sps:$4 sm:$0xff]  }
  0x14   : > { %326 = vst.msk [vmem:[#allocation2 + $0x60] sm:$0xff] %vm313_vm0, %v1598_v5  ;;  %327 = vst.msk [vmem:[#allocation2 + $0x68] sm:$0xff] %vm313_vm0, %v1598_v5  ;;  %v1539_v20 = vld [vmem:[%s1663_s29 + $0xa4] ss:$8 sps:$4 sm:$0xff]   ;;  %v1541_v21 = vld [vmem:[%s1663_s29 + $0x20] ss:$8 sps:$4 sm:$0xff]  }
  0x15   : > { %328 = vst.msk [vmem:[#allocation2 + $0x70] sm:$0xff] %vm313_vm0, %v1598_v5  ;;  %329 = vst.msk [vmem:[#allocation2 + $0x78] sm:$0xff] %vm313_vm0, %v1598_v5  ;;  %v1542_v22 = vld [vmem:[%s1663_s29 + $0xa0] ss:$8 sps:$4 sm:$0xff]   ;;  %v1543_v23 = vld [vmem:[%s1663_s29 + $0x34] ss:$8 sps:$4 sm:$0xff]  }
  0x16   : > { %330 = vst.msk [vmem:[#allocation2 + $0x80] sm:$0xff] %vm313_vm0, %v1598_v5  ;;  %331 = vst.msk [vmem:[#allocation2 + $0x88] sm:$0xff] %vm313_vm0, %v1598_v5  ;;  %680 = vmatpush1.bf16.msra.mxu0 %v1518_v3  ;;  %1483 = vmatpush1.bf16.msra.mxu1 %v1518_v3  ;;  %v1545_v24 = vld [vmem:[%s1663_s29 + $0xb4] ss:$8 sps:$4 sm:$0xff]   ;;  %v1547_v25 = vld [vmem:[%s1663_s29 + $0x30] ss:$8 sps:$4 sm:$0xff]  }
  0x17   : > { %332 = vst.msk [vmem:[#allocation2 + $0x90] sm:$0xff] %vm313_vm0, %v1598_v5  ;;  %333 = vst.msk [vmem:[#allocation2 + $0x98] sm:$0xff] %vm313_vm0, %v1598_v5  ;;  %681 = vmatprep.subr.bf16.mxu0 %v1597_v1  ;;  %1475 = vmatprep.subr.bf16.mxu1 %v1597_v1  ;;  %v1548_v26 = vld [vmem:[%s1663_s29 + $0xb0] ss:$8 sps:$4 sm:$0xff]   ;;  %v1549_v27 = vld [vmem:[%s1663_s29 + $0x44] ss:$8 sps:$4 sm:$0xff]  }
  0x18   : > { %334 = vst.msk [vmem:[#allocation2 + $0xa0] sm:$0xff] %vm313_vm0, %v1598_v5  ;;  %335 = vst.msk [vmem:[#allocation2 + $0xa8] sm:$0xff] %vm313_vm0, %v1598_v5  ;;  %v1551_v28 = vld [vmem:[%s1663_s29 + $0xc4] ss:$8 sps:$4 sm:$0xff]   ;;  %v1553_v29 = vld [vmem:[%s1663_s29 + $0x40] ss:$8 sps:$4 sm:$0xff]  }
  0x19   : > { %336 = vst.msk [vmem:[#allocation2 + $0xb0] sm:$0xff] %vm313_vm0, %v1598_v5  ;;  %337 = vst.msk [vmem:[#allocation2 + $0xb8] sm:$0xff] %vm313_vm0, %v1598_v5  ;;  %v1554_v30 = vld [vmem:[%s1663_s29 + $0xc0] ss:$8 sps:$4 sm:$0xff]   ;;  %v1555_v31 = vld [vmem:[%s1663_s29 + $0x54] ss:$8 sps:$4 sm:$0xff]  }
  0x1a   : > { %338 = vst.msk [vmem:[#allocation2 + $0xc0] sm:$0xff] %vm313_vm0, %v1598_v5  ;;  %339 = vst.msk [vmem:[#allocation2 + $0xc8] sm:$0xff] %vm313_vm0, %v1598_v5  ;;  %682 = vmatpush1.bf16.msra.mxu0 %v1519_v4  ;;  %1484 = vmatpush1.bf16.msra.mxu1 %v1519_v4  ;;  %v1557_v32 = vld [vmem:[%s1663_s29 + $0xd4] ss:$8 sps:$4 sm:$0xff]   ;;  %v1559_v33 = vld [vmem:[%s1663_s29 + $0x50] ss:$8 sps:$4 sm:$0xff]  }
  0x1b   : > { %340 = vst.msk [vmem:[#allocation2 + $0xd0] sm:$0xff] %vm313_vm0, %v1598_v5  ;;  %341 = vst.msk [vmem:[#allocation2 + $0xd8] sm:$0xff] %vm313_vm0, %v1598_v5  ;;  %683 = vmatprep.subr.bf16.mxu0 %v1597_v1  ;;  %1476 = vmatprep.subr.bf16.mxu1 %v1597_v1  ;;  %v1560_v34 = vld [vmem:[%s1663_s29 + $0xd0] ss:$8 sps:$4 sm:$0xff]   ;;  %v1561_v35 = vld [vmem:[%s1663_s29 + $0x64] ss:$8 sps:$4 sm:$0xff]  }
  0x1c   : > { %342 = vst.msk [vmem:[#allocation2 + $0xe0] sm:$0xff] %vm313_vm0, %v1598_v5  ;;  %343 = vst.msk [vmem:[#allocation2 + $0xe8] sm:$0xff] %vm313_vm0, %v1598_v5  ;;  %v1563_v36 = vld [vmem:[%s1663_s29 + $0xe4] ss:$8 sps:$4 sm:$0xff]   ;;  %v1565_v37 = vld [vmem:[%s1663_s29 + $0x60] ss:$8 sps:$4 sm:$0xff]  }
  0x1d   : > { %344 = vst.msk [vmem:[#allocation2 + $0xf0] sm:$0xff] %vm313_vm0, %v1598_v5  ;;  %345 = vst.msk [vmem:[#allocation2 + $0xf8] sm:$0xff] %vm313_vm0, %v1598_v5  ;;  %v1566_v38 = vld [vmem:[%s1663_s29 + $0xe0] ss:$8 sps:$4 sm:$0xff]   ;;  %v1567_v39 = vld [vmem:[%s1663_s29 + $0x74] ss:$8 sps:$4 sm:$0xff]  }
  0x1e   : > { %684 = vmatpush1.bf16.msra.mxu0 %v1520_v8  ;;  %1485 = vmatpush1.bf16.msra.mxu1 %v1520_v8  ;;  %v1569_v40 = vld [vmem:[%s1663_s29 + $0xf4] ss:$8 sps:$4 sm:$0xff]   ;;  %v1571_v41 = vld [vmem:[%s1663_s29 + $0x70] ss:$8 sps:$4 sm:$0xff]   ;;  %v346_v43 = vld [vmem:[#allocation2] sm:$0xff] }
  0x1f   : > { %685 = vmatprep.subr.bf16.mxu0 %v1597_v1  ;;  %1477 = vmatprep.subr.bf16.mxu1 %v1597_v1  ;;  %v1572_v42 = vld [vmem:[%s1663_s29 + $0xf0] ss:$8 sps:$4 sm:$0xff]   ;;  %v362_v44 = vld [vmem:[#allocation2 + $0x80] sm:$0xff]  ;;  %v347_v51 = vld [vmem:[#allocation2 + $0x8] sm:$0xff] }
  0x20   : > { %v363_v52 = vld [vmem:[#allocation2 + $0x88] sm:$0xff]  ;;  %v348_v59 = vld [vmem:[#allocation2 + $0x10] sm:$0xff]  ;;  %v1782_v61 = vld [vmem:[%s1962_s2] ss:$0 sm:$0xff] }
  0x21   : > { %v364_v60 = vld [vmem:[#allocation2 + $0x90] sm:$0xff]  ;;  %v1787_v0 = vld [vmem:[%s1963_s3] ss:$0 sm:$0xff]  ;;  %v349_v3 = vld [vmem:[#allocation2 + $0x18] sm:$0xff] }
  0x22   : > { %686 = vmatpush1.bf16.msra.mxu0 %v1521_v9  ;;  %1486 = vmatpush1.bf16.msra.mxu1 %v1521_v9  ;;  %v365_v8 = vld [vmem:[#allocation2 + $0x98] sm:$0xff] }
  0x23   : > { %687 = vmatprep.subr.bf16.mxu0 %v1597_v1  ;;  %1478 = vmatprep.subr.bf16.mxu1 %v1597_v1 }
  0x26   : > { %688 = vmatpush1.bf16.msra.mxu0 %v1522_v10  ;;  %1487 = vmatpush1.bf16.msra.mxu1 %v1522_v10 }
  0x27   : > { %689 = vmatprep.subr.bf16.mxu0 %v1597_v1  ;;  %1479 = vmatprep.subr.bf16.mxu1 %v1597_v1 }
  0x2a   : > { %690 = vmatpush1.bf16.msra.mxu0 %v1523_v11  ;;  %1488 = vmatpush1.bf16.msra.mxu1 %v1523_v11 }
  0x2b   : > { %705 = vmatprep.subr.bf16.mxu0 %v1597_v1  ;;  %1480 = vmatprep.subr.bf16.mxu1 %v1597_v1 }
  0x2e   : > { %706 = vmatpush2.bf16.msra.mxu0 %v1524_v12  ;;  %1489 = vmatpush2.bf16.msra.mxu1 %v1524_v12 }
  0x31   : > { %708 = vmatmul.mubr.bf16.vlgmr.msra.gmra.mxu0 %v1525_v13  ;;  %772 = vmatmul.mubr.bf16.vlgmr.msra.gmra.mxu1 %v1528_v14 }
  0x32   : > { %1388 = vmatprep.mubr.msk.bf16.mxu0 %vm626_vm1, %v1531_v15  ;;  %1396 = vmatprep.mubr.msk.bf16.mxu1 %vm626_vm1, %v1533_v16 }
  0x39   : > { %716 = vmatmul.mubr.bf16.gmra.mxu0 %v1535_v17  ;;  %780 = vmatmul.mubr.bf16.gmra.mxu1 %v1536_v18 }
  0x3a   : > { %1389 = vmatprep.mubr.msk.bf16.mxu0 %vm626_vm1, %v1537_v19  ;;  %1397 = vmatprep.mubr.msk.bf16.mxu1 %vm626_vm1, %v1539_v20 }
  0x41   : > { %724 = vmatmul.mubr.bf16.gmra.mxu0 %v1541_v21  ;;  %788 = vmatmul.mubr.bf16.gmra.mxu1 %v1542_v22 }
  0x42   : > { %1390 = vmatprep.mubr.msk.bf16.mxu0 %vm626_vm1, %v1543_v23  ;;  %1398 = vmatprep.mubr.msk.bf16.mxu1 %vm626_vm1, %v1545_v24 }
  0x49   : > { %732 = vmatmul.mubr.bf16.gmra.mxu0 %v1547_v25  ;;  %796 = vmatmul.mubr.bf16.gmra.mxu1 %v1548_v26  ;;  %v350_v25 = vld [vmem:[#allocation2 + $0x20] sm:$0xff] }
  0x4a   : > { %1391 = vmatprep.mubr.msk.bf16.mxu0 %vm626_vm1, %v1549_v27  ;;  %1399 = vmatprep.mubr.msk.bf16.mxu1 %vm626_vm1, %v1551_v28  ;;  %v366_v26 = vld [vmem:[#allocation2 + $0xa0] sm:$0xff] }
  0x51   : > { %740 = vmatmul.mubr.bf16.gmra.mxu0 %v1553_v29  ;;  %804 = vmatmul.mubr.bf16.gmra.mxu1 %v1554_v30 }
  0x52   : > { %1392 = vmatprep.mubr.msk.bf16.mxu0 %vm626_vm1, %v1555_v31  ;;  %1400 = vmatprep.mubr.msk.bf16.mxu1 %vm626_vm1, %v1557_v32 }
  0x59   : > { %748 = vmatmul.mubr.bf16.gmra.mxu0 %v1559_v33  ;;  %812 = vmatmul.mubr.bf16.gmra.mxu1 %v1560_v34 }
  0x5a   : > { %1393 = vmatprep.mubr.msk.bf16.mxu0 %vm626_vm1, %v1561_v35  ;;  %1401 = vmatprep.mubr.msk.bf16.mxu1 %vm626_vm1, %v1563_v36 }
  0x61   : > { %756 = vmatmul.mubr.bf16.gmra.mxu0 %v1565_v37  ;;  %820 = vmatmul.mubr.bf16.gmra.mxu1 %v1566_v38 }
  0x62   : > { %1394 = vmatprep.mubr.msk.bf16.mxu0 %vm626_vm1, %v1567_v39  ;;  %1402 = vmatprep.mubr.msk.bf16.mxu1 %vm626_vm1, %v1569_v40 }
  0x69   : > { %764 = vmatmul.mubr.bf16.gmra.mxu0 %v1571_v41  ;;  %828 = vmatmul.mubr.bf16.gmra.mxu1 %v1572_v42 }
  0xf1   : > { %v709_v45 = vpop.f32.mrf.mxu0  ;;  %v773_v46 = vpop.f32.mrf.mxu1 }
  0xf2   : > { %v836_v47 = vadd.f32 %v709_v45, %v346_v43  ;;  %v852_v48 = vadd.f32 %v773_v46, %v362_v44  ;;  %v351_v43 = vld [vmem:[#allocation2 + $0x28] sm:$0xff] }
  0xf3   : > { %v711_v49 = vpop.f32.mrf.mxu0  ;;  %v775_v50 = vpop.f32.mrf.mxu1  ;;  %v367_v44 = vld [vmem:[#allocation2 + $0xa8] sm:$0xff] }
  0xf4   : > { %869 = vst.msk [vmem:[#allocation2] sm:$0xff] %vm313_vm0, %v836_v47  ;;  %885 = vst.msk [vmem:[#allocation2 + $0x80] sm:$0xff] %vm313_vm0, %v852_v48 }
  0xf5   : > { %v712_v53 = vpop.f32.mrf.mxu0  ;;  %v776_v54 = vpop.f32.mrf.mxu1 }
  0xf6   : > { %v837_v55 = vadd.f32 %v712_v53, %v347_v51  ;;  %v853_v56 = vadd.f32 %v776_v54, %v363_v52 }
  0xf7   : > { %v714_v57 = vpop.f32.mrf.mxu0  ;;  %v778_v58 = vpop.f32.mrf.mxu1 }
  0xf8   : > { %870 = vst.msk [vmem:[#allocation2 + $0x8] sm:$0xff] %vm313_vm0, %v837_v55  ;;  %886 = vst.msk [vmem:[#allocation2 + $0x88] sm:$0xff] %vm313_vm0, %v853_v56 }
  0xf9   : > { %v717_v62 = vpop.f32.mrf.mxu0  ;;  %v781_v63 = vpop.f32.mrf.mxu1 }
  0xfa   : > { %v838_v1 = vadd.f32 %v717_v62, %v348_v59  ;;  %v854_v2 = vadd.f32 %v781_v63, %v364_v60  ;;  %v352_v62 = vld [vmem:[#allocation2 + $0x30] sm:$0xff] }
  0xfb   : > { %v904_v4 = vld [vmem:[#allocation2] sm:$0xff]  ;;  %v719_v6 = vpop.f32.mrf.mxu0  ;;  %v783_v7 = vpop.f32.mrf.mxu1  ;;  %v368_v63 = vld [vmem:[#allocation2 + $0xb0] sm:$0xff] }
  0xfc   : > { %v920_v5 = vld [vmem:[#allocation2 + $0x80] sm:$0xff]  ;;  %v943_v9 = vmul.f32 %v1782_v61, %v904_v4  ;;  %871 = vst.msk [vmem:[#allocation2 + $0x10] sm:$0xff] %vm313_vm0, %v838_v1  ;;  %887 = vst.msk [vmem:[#allocation2 + $0x90] sm:$0xff] %vm313_vm0, %v854_v2 }
  0xfd   : > { %v959_v10 = vmul.f32 %v1782_v61, %v920_v5  ;;  %v720_v11 = vpop.f32.mrf.mxu0  ;;  %v784_v12 = vpop.f32.mrf.mxu1 }
  0xfe   : > { %v982_v13 = vadd.f32 %v1787_v0, %v943_v9  ;;  %v839_v15 = vadd.f32 %v720_v11, %v349_v3  ;;  %v855_v16 = vadd.f32 %v784_v12, %v365_v8  ;;  %v353_v11 = vld [vmem:[#allocation2 + $0x38] sm:$0xff] }
  0xff   : > { %v998_v14 = vadd.f32 %v1787_v0, %v959_v10  ;;  %v905_v17 = vld [vmem:[#allocation2 + $0x8] sm:$0xff]  ;;  %v722_v19 = vpop.f32.mrf.mxu0  ;;  %v786_v20 = vpop.f32.mrf.mxu1  ;;  %v369_v12 = vld [vmem:[#allocation2 + $0xb8] sm:$0xff] }
 0x100   : > { %v921_v18 = vld [vmem:[#allocation2 + $0x88] sm:$0xff]  ;;  %v1014_v21 = vmax.f32 %v982_v13, 0.0  ;;  %v944_v23 = vmul.f32 %v1782_v61, %v905_v17  ;;  %872 = vst.msk [vmem:[#allocation2 + $0x18] sm:$0xff] %vm313_vm0, %v839_v15  ;;  %888 = vst.msk [vmem:[#allocation2 + $0x98] sm:$0xff] %vm313_vm0, %v855_v16 }
 0x101   : > { %v1030_v22 = vmax.f32 %v998_v14, 0.0  ;;  %v960_v24 = vmul.f32 %v1782_v61, %v921_v18  ;;  %v725_v27 = vpop.f32.mrf.mxu0  ;;  %v789_v28 = vpop.f32.mrf.mxu1 }
 0x102   : > { %v1440_v29 = vpack.c.bf16 %v1014_v21, %v1014_v21  ;;  %v983_v31 = vadd.f32 %v1787_v0, %v944_v23  ;;  %v840_v35 = vadd.f32 %v725_v27, %v350_v25  ;;  %v856_v36 = vadd.f32 %v789_v28, %v366_v26 }
 0x103   : > { %v1456_v30 = vpack.c.bf16 %v1030_v22, %v1030_v22  ;;  %v999_v32 = vadd.f32 %v1787_v0, %v960_v24  ;;  %v906_v33 = vld [vmem:[#allocation2 + $0x10] sm:$0xff]  ;;  %v727_v37 = vpop.f32.mrf.mxu0  ;;  %v791_v38 = vpop.f32.mrf.mxu1 }
 0x104   : > { %v922_v34 = vld [vmem:[#allocation2 + $0x90] sm:$0xff]  ;;  %1175 = vst.msk [vmem:[%s1803_s26] sm:$0xf] %vm1174_vm2, %v1440_v29  ;;  %v1015_v39 = vmax.f32 %v983_v31, 0.0  ;;  %v945_v41 = vmul.f32 %v1782_v61, %v906_v33  ;;  %v354_v29 = vld [vmem:[#allocation2 + $0x40] sm:$0xff] }
 0x105   : > { %1191 = vst.msk [vmem:[%s1803_s26 + $0x40] sm:$0xf] %vm1174_vm2, %v1456_v30  ;;  %v1031_v40 = vmax.f32 %v999_v32, 0.0  ;;  %v961_v42 = vmul.f32 %v1782_v61, %v922_v34  ;;  %v728_v45 = vpop.f32.mrf.mxu0  ;;  %v792_v46 = vpop.f32.mrf.mxu1  ;;  %v370_v30 = vld [vmem:[#allocation2 + $0xc0] sm:$0xff] }
 0x106   : > { %873 = vst.msk [vmem:[#allocation2 + $0x20] sm:$0xff] %vm313_vm0, %v840_v35  ;;  %889 = vst.msk [vmem:[#allocation2 + $0xa0] sm:$0xff] %vm313_vm0, %v856_v36  ;;  %v1441_v47 = vpack.c.bf16 %v1015_v39, %v1015_v39  ;;  %v984_v49 = vadd.f32 %v1787_v0, %v945_v41  ;;  %v841_v53 = vadd.f32 %v728_v45, %v351_v43 }
 0x107   : > { %v1457_v48 = vpack.c.bf16 %v1031_v40, %v1031_v40  ;;  %v1000_v50 = vadd.f32 %v1787_v0, %v961_v42  ;;  %v907_v51 = vld [vmem:[#allocation2 + $0x18] sm:$0xff]  ;;  %v857_v54 = vadd.f32 %v792_v46, %v367_v44  ;;  %v730_v55 = vpop.f32.mrf.mxu0  ;;  %v794_v56 = vpop.f32.mrf.mxu1 }
 0x108   : > { %v923_v52 = vld [vmem:[#allocation2 + $0x98] sm:$0xff]  ;;  %1176 = vst.msk [vmem:[%s1803_s26 + $0x4] sm:$0xf] %vm1174_vm2, %v1441_v47  ;;  %v1016_v57 = vmax.f32 %v984_v49, 0.0  ;;  %v946_v59 = vmul.f32 %v1782_v61, %v907_v51  ;;  %v355_v47 = vld [vmem:[#allocation2 + $0x48] sm:$0xff] }
 0x109   : > { %1192 = vst.msk [vmem:[%s1803_s26 + $0x44] sm:$0xf] %vm1174_vm2, %v1457_v48  ;;  %v1032_v58 = vmax.f32 %v1000_v50, 0.0  ;;  %v962_v60 = vmul.f32 %v1782_v61, %v923_v52  ;;  %v733_v1 = vpop.f32.mrf.mxu0  ;;  %v797_v2 = vpop.f32.mrf.mxu1  ;;  %v371_v48 = vld [vmem:[#allocation2 + $0xc8] sm:$0xff] }
 0x10a   : > { %874 = vst.msk [vmem:[#allocation2 + $0x28] sm:$0xff] %vm313_vm0, %v841_v53  ;;  %890 = vst.msk [vmem:[#allocation2 + $0xa8] sm:$0xff] %vm313_vm0, %v857_v54  ;;  %v1442_v3 = vpack.c.bf16 %v1016_v57, %v1016_v57  ;;  %v985_v5 = vadd.f32 %v1787_v0, %v946_v59  ;;  %v842_v7 = vadd.f32 %v733_v1, %v352_v62  ;;  %v356_v59 = vld [vmem:[#allocation2 + $0x50] sm:$0xff] }
 0x10b   : > { %v1458_v4 = vpack.c.bf16 %v1032_v58, %v1032_v58  ;;  %v1001_v6 = vadd.f32 %v1787_v0, %v962_v60  ;;  %v858_v8 = vadd.f32 %v797_v2, %v368_v63  ;;  %v735_v9 = vpop.f32.mrf.mxu0  ;;  %v799_v10 = vpop.f32.mrf.mxu1 }
 0x10c   : > { %1177 = vst.msk [vmem:[%s1803_s26 + $0x8] sm:$0xf] %vm1174_vm2, %v1442_v3  ;;  %v1017_v13 = vmax.f32 %v985_v5, 0.0 }
 0x10d   : > { %1193 = vst.msk [vmem:[%s1803_s26 + $0x48] sm:$0xf] %vm1174_vm2, %v1458_v4  ;;  %v1033_v14 = vmax.f32 %v1001_v6, 0.0  ;;  %v908_v15 = vld [vmem:[#allocation2 + $0x20] sm:$0xff]  ;;  %v736_v19 = vpop.f32.mrf.mxu0  ;;  %v800_v20 = vpop.f32.mrf.mxu1  ;;  %v372_v6 = vld [vmem:[#allocation2 + $0xd0] sm:$0xff] }
 0x10e   : > { %v924_v16 = vld [vmem:[#allocation2 + $0xa0] sm:$0xff]  ;;  %v947_v17 = vmul.f32 %v1782_v61, %v908_v15  ;;  %875 = vst.msk [vmem:[#allocation2 + $0x30] sm:$0xff] %vm313_vm0, %v842_v7  ;;  %891 = vst.msk [vmem:[#allocation2 + $0xb0] sm:$0xff] %vm313_vm0, %v858_v8  ;;  %v1443_v21 = vpack.c.bf16 %v1017_v13, %v1017_v13  ;;  %v843_v23 = vadd.f32 %v736_v19, %v353_v11 }
 0x10f   : > { %v963_v18 = vmul.f32 %v1782_v61, %v924_v16  ;;  %v1459_v22 = vpack.c.bf16 %v1033_v14, %v1033_v14  ;;  %v859_v24 = vadd.f32 %v800_v20, %v369_v12  ;;  %v738_v27 = vpop.f32.mrf.mxu0  ;;  %v802_v28 = vpop.f32.mrf.mxu1 }
 0x110   : > { %v986_v25 = vadd.f32 %v1787_v0, %v947_v17  ;;  %1178 = vst.msk [vmem:[%s1803_s26 + $0xc] sm:$0xf] %vm1174_vm2, %v1443_v21  ;;  %v357_v27 = vld [vmem:[#allocation2 + $0x58] sm:$0xff] }
 0x111   : > { %v1002_v26 = vadd.f32 %v1787_v0, %v963_v18  ;;  %1194 = vst.msk [vmem:[%s1803_s26 + $0x4c] sm:$0xf] %vm1174_vm2, %v1459_v22  ;;  %v909_v31 = vld [vmem:[#allocation2 + $0x28] sm:$0xff]  ;;  %v741_v37 = vpop.f32.mrf.mxu0  ;;  %v805_v38 = vpop.f32.mrf.mxu1  ;;  %v373_v28 = vld [vmem:[#allocation2 + $0xd8] sm:$0xff] }
 0x112   : > { %v925_v32 = vld [vmem:[#allocation2 + $0xa8] sm:$0xff]  ;;  %876 = vst.msk [vmem:[#allocation2 + $0x38] sm:$0xff] %vm313_vm0, %v843_v23  ;;  %892 = vst.msk [vmem:[#allocation2 + $0xb8] sm:$0xff] %vm313_vm0, %v859_v24  ;;  %v1018_v33 = vmax.f32 %v986_v25, 0.0  ;;  %v948_v35 = vmul.f32 %v1782_v61, %v909_v31  ;;  %v844_v39 = vadd.f32 %v741_v37, %v354_v29  ;;  %v860_v40 = vadd.f32 %v805_v38, %v370_v30 }
 0x113   : > { %v1034_v34 = vmax.f32 %v1002_v26, 0.0  ;;  %v964_v36 = vmul.f32 %v1782_v61, %v925_v32  ;;  %v743_v45 = vpop.f32.mrf.mxu0  ;;  %v807_v46 = vpop.f32.mrf.mxu1 }
 0x114   : > { %v1444_v41 = vpack.c.bf16 %v1018_v33, %v1018_v33  ;;  %v987_v43 = vadd.f32 %v1787_v0, %v948_v35  ;;  %877 = vst.msk [vmem:[#allocation2 + $0x40] sm:$0xff] %vm313_vm0, %v844_v39  ;;  %893 = vst.msk [vmem:[#allocation2 + $0xc0] sm:$0xff] %vm313_vm0, %v860_v40  ;;  %v358_v45 = vld [vmem:[#allocation2 + $0x60] sm:$0xff] }
 0x115   : > { %v1460_v42 = vpack.c.bf16 %v1034_v34, %v1034_v34  ;;  %v1003_v44 = vadd.f32 %v1787_v0, %v964_v36  ;;  %v910_v49 = vld [vmem:[#allocation2 + $0x30] sm:$0xff]  ;;  %v744_v55 = vpop.f32.mrf.mxu0  ;;  %v808_v56 = vpop.f32.mrf.mxu1  ;;  %v374_v46 = vld [vmem:[#allocation2 + $0xe0] sm:$0xff] }
 0x116   : > { %v926_v50 = vld [vmem:[#allocation2 + $0xb0] sm:$0xff]  ;;  %1179 = vst.msk [vmem:[%s1803_s26 + $0x10] sm:$0xf] %vm1174_vm2, %v1444_v41  ;;  %v1019_v51 = vmax.f32 %v987_v43, 0.0  ;;  %v949_v53 = vmul.f32 %v1782_v61, %v910_v49  ;;  %v845_v57 = vadd.f32 %v744_v55, %v355_v47  ;;  %v861_v58 = vadd.f32 %v808_v56, %v371_v48 }
 0x117   : > { %1195 = vst.msk [vmem:[%s1803_s26 + $0x50] sm:$0xf] %vm1174_vm2, %v1460_v42  ;;  %v1035_v52 = vmax.f32 %v1003_v44, 0.0  ;;  %v965_v54 = vmul.f32 %v1782_v61, %v926_v50  ;;  %v746_v4 = vpop.f32.mrf.mxu0  ;;  %v810_v5 = vpop.f32.mrf.mxu1 }
 0x118   : > { %v1445_v60 = vpack.c.bf16 %v1019_v51, %v1019_v51  ;;  %v988_v63 = vadd.f32 %v1787_v0, %v949_v53  ;;  %878 = vst.msk [vmem:[#allocation2 + $0x48] sm:$0xff] %vm313_vm0, %v845_v57  ;;  %894 = vst.msk [vmem:[#allocation2 + $0xc8] sm:$0xff] %vm313_vm0, %v861_v58 }
 0x119   : > { %v1461_v62 = vpack.c.bf16 %v1035_v52, %v1035_v52  ;;  %v1004_v1 = vadd.f32 %v1787_v0, %v965_v54  ;;  %v911_v2 = vld [vmem:[#allocation2 + $0x38] sm:$0xff]  ;;  %v749_v11 = vpop.f32.mrf.mxu0  ;;  %v813_v12 = vpop.f32.mrf.mxu1 }
 0x11a   : > { %v927_v3 = vld [vmem:[#allocation2 + $0xb8] sm:$0xff]  ;;  %v950_v7 = vmul.f32 %v1782_v61, %v911_v2  ;;  %1180 = vst.msk [vmem:[%s1803_s26 + $0x14] sm:$0xf] %vm1174_vm2, %v1445_v60  ;;  %v1020_v9 = vmax.f32 %v988_v63, 0.0  ;;  %v846_v15 = vadd.f32 %v749_v11, %v356_v59  ;;  %v862_v16 = vadd.f32 %v813_v12, %v372_v6  ;;  %v375_v2 = vld [vmem:[#allocation2 + $0xe8] sm:$0xff] }
 0x11b   : > { %v966_v8 = vmul.f32 %v1782_v61, %v927_v3  ;;  %1196 = vst.msk [vmem:[%s1803_s26 + $0x54] sm:$0xf] %vm1174_vm2, %v1461_v62  ;;  %v1036_v10 = vmax.f32 %v1004_v1, 0.0  ;;  %v912_v19 = vld [vmem:[#allocation2 + $0x40] sm:$0xff]  ;;  %v751_v21 = vpop.f32.mrf.mxu0  ;;  %v815_v22 = vpop.f32.mrf.mxu1  ;;  %v359_v1 = vld [vmem:[#allocation2 + $0x68] sm:$0xff] }
 0x11c   : > { %v989_v13 = vadd.f32 %v1787_v0, %v950_v7  ;;  %v1446_v17 = vpack.c.bf16 %v1020_v9, %v1020_v9  ;;  %v928_v20 = vld [vmem:[#allocation2 + $0xc0] sm:$0xff]  ;;  %v951_v25 = vmul.f32 %v1782_v61, %v912_v19  ;;  %879 = vst.msk [vmem:[#allocation2 + $0x50] sm:$0xff] %vm313_vm0, %v846_v15  ;;  %895 = vst.msk [vmem:[#allocation2 + $0xd0] sm:$0xff] %vm313_vm0, %v862_v16 }
 0x11d   : > { %v1005_v14 = vadd.f32 %v1787_v0, %v966_v8  ;;  %v1462_v18 = vpack.c.bf16 %v1036_v10, %v1036_v10  ;;  %v967_v26 = vmul.f32 %v1782_v61, %v928_v20  ;;  %v752_v29 = vpop.f32.mrf.mxu0  ;;  %v816_v30 = vpop.f32.mrf.mxu1 }
 0x11e   : > { %v1021_v23 = vmax.f32 %v989_v13, 0.0  ;;  %1181 = vst.msk [vmem:[%s1803_s26 + $0x18] sm:$0xf] %vm1174_vm2, %v1446_v17  ;;  %v990_v33 = vadd.f32 %v1787_v0, %v951_v25  ;;  %v847_v37 = vadd.f32 %v752_v29, %v357_v27  ;;  %v863_v38 = vadd.f32 %v816_v30, %v373_v28  ;;  %v360_v13 = vld [vmem:[#allocation2 + $0x70] sm:$0xff] }
 0x11f   : > { %v1037_v24 = vmax.f32 %v1005_v14, 0.0  ;;  %1197 = vst.msk [vmem:[%s1803_s26 + $0x58] sm:$0xf] %vm1174_vm2, %v1462_v18  ;;  %v1006_v34 = vadd.f32 %v1787_v0, %v967_v26  ;;  %v913_v35 = vld [vmem:[#allocation2 + $0x48] sm:$0xff]  ;;  %v754_v39 = vpop.f32.mrf.mxu0  ;;  %v818_v40 = vpop.f32.mrf.mxu1  ;;  %v376_v14 = vld [vmem:[#allocation2 + $0xf0] sm:$0xff] }
 0x120   : > { %v1447_v31 = vpack.c.bf16 %v1021_v23, %v1021_v23  ;;  %v929_v36 = vld [vmem:[#allocation2 + $0xc8] sm:$0xff]  ;;  %v1022_v41 = vmax.f32 %v990_v33, 0.0  ;;  %v952_v43 = vmul.f32 %v1782_v61, %v913_v35  ;;  %880 = vst.msk [vmem:[#allocation2 + $0x58] sm:$0xff] %vm313_vm0, %v847_v37  ;;  %896 = vst.msk [vmem:[#allocation2 + $0xd8] sm:$0xff] %vm313_vm0, %v863_v38 }
 0x121   : > { %v1463_v32 = vpack.c.bf16 %v1037_v24, %v1037_v24  ;;  %v1038_v42 = vmax.f32 %v1006_v34, 0.0  ;;  %v968_v44 = vmul.f32 %v1782_v61, %v929_v36  ;;  %v757_v47 = vpop.f32.mrf.mxu0  ;;  %v821_v48 = vpop.f32.mrf.mxu1 }
 0x122   : > { %1182 = vst.msk [vmem:[%s1803_s26 + $0x1c] sm:$0xf] %vm1174_vm2, %v1447_v31  ;;  %v1448_v49 = vpack.c.bf16 %v1022_v41, %v1022_v41  ;;  %v991_v51 = vadd.f32 %v1787_v0, %v952_v43  ;;  %v848_v55 = vadd.f32 %v757_v47, %v358_v45  ;;  %v864_v56 = vadd.f32 %v821_v48, %v374_v46  ;;  %v361_v31 = vld [vmem:[#allocation2 + $0x78] sm:$0xff] }
 0x123   : > { %1198 = vst.msk [vmem:[%s1803_s26 + $0x5c] sm:$0xf] %vm1174_vm2, %v1463_v32  ;;  %v1464_v50 = vpack.c.bf16 %v1038_v42, %v1038_v42  ;;  %v1007_v52 = vadd.f32 %v1787_v0, %v968_v44  ;;  %v914_v53 = vld [vmem:[#allocation2 + $0x50] sm:$0xff]  ;;  %v759_v57 = vpop.f32.mrf.mxu0  ;;  %v823_v58 = vpop.f32.mrf.mxu1  ;;  %v377_v32 = vld [vmem:[#allocation2 + $0xf8] sm:$0xff] }
 0x124   : > { %v930_v54 = vld [vmem:[#allocation2 + $0xd0] sm:$0xff]  ;;  %1183 = vst.msk [vmem:[%s1803_s26 + $0x20] sm:$0xf] %vm1174_vm2, %v1448_v49  ;;  %v1023_v59 = vmax.f32 %v991_v51, 0.0  ;;  %v953_v62 = vmul.f32 %v1782_v61, %v914_v53 }
 0x125   : > { %1199 = vst.msk [vmem:[%s1803_s26 + $0x60] sm:$0xf] %vm1174_vm2, %v1464_v50  ;;  %v1039_v60 = vmax.f32 %v1007_v52, 0.0  ;;  %v969_v63 = vmul.f32 %v1782_v61, %v930_v54  ;;  %v760_v3 = vpop.f32.mrf.mxu0  ;;  %v824_v4 = vpop.f32.mrf.mxu1 }
 0x126   : > { %881 = vst.msk [vmem:[#allocation2 + $0x60] sm:$0xff] %vm313_vm0, %v848_v55  ;;  %897 = vst.msk [vmem:[#allocation2 + $0xe0] sm:$0xff] %vm313_vm0, %v864_v56  ;;  %v1449_v5 = vpack.c.bf16 %v1023_v59, %v1023_v59  ;;  %v992_v7 = vadd.f32 %v1787_v0, %v953_v62  ;;  %v849_v9 = vadd.f32 %v760_v3, %v359_v1 }
 0x127   : > { %v1465_v6 = vpack.c.bf16 %v1039_v60, %v1039_v60  ;;  %v1008_v8 = vadd.f32 %v1787_v0, %v969_v63  ;;  %v865_v10 = vadd.f32 %v824_v4, %v375_v2  ;;  %v762_v11 = vpop.f32.mrf.mxu0  ;;  %v826_v12 = vpop.f32.mrf.mxu1  ;;  %v915_v17 = vld [vmem:[#allocation2 + $0x58] sm:$0xff] }
 0x128   : > { %1184 = vst.msk [vmem:[%s1803_s26 + $0x24] sm:$0xf] %vm1174_vm2, %v1449_v5  ;;  %v1024_v15 = vmax.f32 %v992_v7, 0.0  ;;  %v931_v18 = vld [vmem:[#allocation2 + $0xd8] sm:$0xff]  ;;  %v954_v19 = vmul.f32 %v1782_v61, %v915_v17 }
 0x129   : > { %1200 = vst.msk [vmem:[%s1803_s26 + $0x64] sm:$0xf] %vm1174_vm2, %v1465_v6  ;;  %v1040_v16 = vmax.f32 %v1008_v8, 0.0  ;;  %v970_v20 = vmul.f32 %v1782_v61, %v931_v18  ;;  %v765_v21 = vpop.f32.mrf.mxu0  ;;  %v829_v22 = vpop.f32.mrf.mxu1 }
 0x12a   : > { %882 = vst.msk [vmem:[#allocation2 + $0x68] sm:$0xff] %vm313_vm0, %v849_v9  ;;  %898 = vst.msk [vmem:[#allocation2 + $0xe8] sm:$0xff] %vm313_vm0, %v865_v10  ;;  %v1450_v23 = vpack.c.bf16 %v1024_v15, %v1024_v15  ;;  %v850_v25 = vadd.f32 %v765_v21, %v360_v13  ;;  %v866_v26 = vadd.f32 %v829_v22, %v376_v14 }
 0x12b   : > { %v1466_v24 = vpack.c.bf16 %v1040_v16, %v1040_v16  ;;  %v993_v27 = vadd.f32 %v1787_v0, %v954_v19  ;;  %v1009_v28 = vadd.f32 %v1787_v0, %v970_v20  ;;  %v767_v29 = vpop.f32.mrf.mxu0  ;;  %v831_v30 = vpop.f32.mrf.mxu1 }
 0x12c   : > { %1185 = vst.msk [vmem:[%s1803_s26 + $0x28] sm:$0xf] %vm1174_vm2, %v1450_v23 }
 0x12d   : > { %1201 = vst.msk [vmem:[%s1803_s26 + $0x68] sm:$0xf] %vm1174_vm2, %v1466_v24  ;;  %v916_v33 = vld [vmem:[#allocation2 + $0x60] sm:$0xff]  ;;  %v1025_v35 = vmax.f32 %v993_v27, 0.0  ;;  %v1041_v36 = vmax.f32 %v1009_v28, 0.0  ;;  %v768_v39 = vpop.f32.mrf.mxu0  ;;  %v832_v40 = vpop.f32.mrf.mxu1 }
 0x12e   : > { %v932_v34 = vld [vmem:[#allocation2 + $0xe0] sm:$0xff]  ;;  %883 = vst.msk [vmem:[#allocation2 + $0x70] sm:$0xff] %vm313_vm0, %v850_v25  ;;  %899 = vst.msk [vmem:[#allocation2 + $0xf0] sm:$0xff] %vm313_vm0, %v866_v26  ;;  %v955_v37 = vmul.f32 %v1782_v61, %v916_v33  ;;  %v851_v41 = vadd.f32 %v768_v39, %v361_v31  ;;  %v867_v42 = vadd.f32 %v832_v40, %v377_v32 }
 0x12f   : > { %v971_v38 = vmul.f32 %v1782_v61, %v932_v34  ;;  %v1451_v43 = vpack.c.bf16 %v1025_v35, %v1025_v35  ;;  %v1467_v44 = vpack.c.bf16 %v1041_v36, %v1041_v36  ;;  %v770_v47 = vpop.f32.mrf.mxu0  ;;  %v834_v48 = vpop.f32.mrf.mxu1 }
 0x130   : > { %v994_v45 = vadd.f32 %v1787_v0, %v955_v37  ;;  %884 = vst.msk [vmem:[#allocation2 + $0x78] sm:$0xff] %vm313_vm0, %v851_v41  ;;  %900 = vst.msk [vmem:[#allocation2 + $0xf8] sm:$0xff] %vm313_vm0, %v867_v42 }
 0x131   : > { %v1010_v46 = vadd.f32 %v1787_v0, %v971_v38  ;;  %v917_v49 = vld [vmem:[#allocation2 + $0x68] sm:$0xff]  ;;  %1186 = vst.msk [vmem:[%s1803_s26 + $0x2c] sm:$0xf] %vm1174_vm2, %v1451_v43  ;;  %1202 = vst.msk [vmem:[%s1803_s26 + $0x6c] sm:$0xf] %vm1174_vm2, %v1467_v44 }
 0x132   : > { %v933_v50 = vld [vmem:[#allocation2 + $0xe8] sm:$0xff]  ;;  %v1026_v51 = vmax.f32 %v994_v45, 0.0  ;;  %v956_v53 = vmul.f32 %v1782_v61, %v917_v49 }
 0x133   : > { %v1042_v52 = vmax.f32 %v1010_v46, 0.0  ;;  %v972_v54 = vmul.f32 %v1782_v61, %v933_v50 }
 0x134   : > { %v1452_v55 = vpack.c.bf16 %v1026_v51, %v1026_v51  ;;  %v995_v57 = vadd.f32 %v1787_v0, %v956_v53 }
 0x135   : > { %v1468_v56 = vpack.c.bf16 %v1042_v52, %v1042_v52  ;;  %v1011_v58 = vadd.f32 %v1787_v0, %v972_v54  ;;  %v918_v59 = vld [vmem:[#allocation2 + $0x70] sm:$0xff] }
 0x136   : > { %v934_v60 = vld [vmem:[#allocation2 + $0xf0] sm:$0xff]  ;;  %v957_v62 = vmul.f32 %v1782_v61, %v918_v59  ;;  %1187 = vst.msk [vmem:[%s1803_s26 + $0x30] sm:$0xf] %vm1174_vm2, %v1452_v55  ;;  %v1027_v1 = vmax.f32 %v995_v57, 0.0 }
 0x137   : > { %v973_v63 = vmul.f32 %v1782_v61, %v934_v60  ;;  %1203 = vst.msk [vmem:[%s1803_s26 + $0x70] sm:$0xf] %vm1174_vm2, %v1468_v56  ;;  %v1043_v2 = vmax.f32 %v1011_v58, 0.0  ;;  %v919_v7 = vld [vmem:[#allocation2 + $0x78] sm:$0xff] }
 0x138   : > { %v996_v3 = vadd.f32 %v1787_v0, %v957_v62  ;;  %v1453_v5 = vpack.c.bf16 %v1027_v1, %v1027_v1  ;;  %v935_v8 = vld [vmem:[#allocation2 + $0xf8] sm:$0xff]  ;;  %v958_v11 = vmul.f32 %v1782_v61, %v919_v7 }
 0x139   : > { %v1012_v4 = vadd.f32 %v1787_v0, %v973_v63  ;;  %v1469_v6 = vpack.c.bf16 %v1043_v2, %v1043_v2  ;;  %v974_v12 = vmul.f32 %v1782_v61, %v935_v8 }
 0x13a   : > { %v1028_v9 = vmax.f32 %v996_v3, 0.0  ;;  %1188 = vst.msk [vmem:[%s1803_s26 + $0x34] sm:$0xf] %vm1174_vm2, %v1453_v5  ;;  %v997_v15 = vadd.f32 %v1787_v0, %v958_v11 }
 0x13b   : > { %v1044_v10 = vmax.f32 %v1012_v4, 0.0  ;;  %1204 = vst.msk [vmem:[%s1803_s26 + $0x74] sm:$0xf] %vm1174_vm2, %v1469_v6  ;;  %v1013_v16 = vadd.f32 %v1787_v0, %v974_v12 }
 0x13c   : > { %v1454_v13 = vpack.c.bf16 %v1028_v9, %v1028_v9  ;;  %v1029_v17 = vmax.f32 %v997_v15, 0.0 }
 0x13d   : > { %v1470_v14 = vpack.c.bf16 %v1044_v10, %v1044_v10  ;;  %v1045_v18 = vmax.f32 %v1013_v16, 0.0 }
 0x13e   : > { %1189 = vst.msk [vmem:[%s1803_s26 + $0x38] sm:$0xf] %vm1174_vm2, %v1454_v13  ;;  %v1455_v19 = vpack.c.bf16 %v1029_v17, %v1029_v17 }
 0x13f   : > { %1205 = vst.msk [vmem:[%s1803_s26 + $0x78] sm:$0xf] %vm1174_vm2, %v1470_v14  ;;  %v1471_v20 = vpack.c.bf16 %v1045_v18, %v1045_v18 }
 0x140   : > { %1190 = vst.msk [vmem:[%s1803_s26 + $0x3c] sm:$0xf] %vm1174_vm2, %v1455_v19 }
 0x141   : > { %1206 = vst.msk [vmem:[%s1803_s26 + $0x7c] sm:$0xf] %vm1174_vm2, %v1471_v20 }
 0x142 PF: > { %s14_s17 = sadd.s32 1, %s1595_s17   ;;  %s1965_s15 = smov %s1591_s16 }
 0x143   : > { %p11_p5 = scmp.ge.s32.totalorder %s14_s17, 4   ;;  %s1966_s16 = smov %s1968_s18 }
 0x145   :  { %13 = sbr.rel (!%p11_p5) target bundleno = 2 (0x2), region = 83 }

// kernel: dcgan_g_forward.9
= control target key start
LH: loop header
LB: loop body
LE: loop exit
PB: predicated region body
PF: predicated region fallthrough
CT: control target
= control target key end

     0   :  { %s2123_s15 = smov 0   ;;  %s2125_s16 = smov 0   ;;  %s2697_s0 = inlined_call_operand.vmem [shape: bf16[2048,72], index: 0, kind: input, shape index: {}]   ;;  %s2698_s1 = inlined_call_operand.vmem [shape: bf16[72,4], index: 1, kind: input, shape index: {}]   ;;  %s2699_s2 = inlined_call_operand.vmem [shape: f32[1,4], index: 2, kind: input, shape index: {}]   ;;  %s2700_s3 = inlined_call_operand.vmem [shape: f32[1,4], index: 3, kind: input, shape index: {}]   ;;  %s2701_s4 = inlined_call_operand.vmem [shape: f32[2048,4], index: 4, kind: output, shape index: {}]  }
   0x1   :  { %s2127_s17 = smov 0  }
   0x2 LB: > { %s33_s18 = sadd.s32 1, %s2091_s16  ;;  %p1680_p0 = scmp.ge.s32.totalorder %s2095_s17, 1  ;;  %s2095_s17 = sphi %s2127_s17, %s14_s17   ;;  %s2091_s16 = sphi %s2125_s16, %s2703_s16   ;;  %s2087_s15 = sphi %s2123_s15, %s2702_s15  }
   0x3   : > { %p35_p1 = scmp.ge.s32.totalorder %s33_s18, 4  ;;  %p221_p2 = scmp.lt.s32.totalorder %s2095_s17, 5 }
   0x5   : > { %s2705_s18 = smov (%p35_p1, %s33_s18), 0  ;;  %p222_p3 = pnand %p1680_p0, %p221_p2 }
   0x6   : > { %s1681_s23 = sshll.u32 (!%p222_p3), %s2087_s15, 6 }
   0x7   : > { %225 = sbr.rel (%p222_p3) target bundleno = 319 (0x13f), region = 36  ;;  %p268_p4 = scmp.lt.s32.totalorder (!%p222_p3), %s1681_s23, 255 }
   0xc   : > { %v1906_v0 = vld [vmem:[%s2698_s1 + $0x20] ss:$0 sps:$4 sm:$0xff]   ;;  %vm791_vm0 = vcmask 1043456   ;;  %v2147_v1 = vld [vmem:[%s2698_s1 + $0x18] sm:$0xff]   ;;  %v2154_v3 = vld [vmem:[%s2698_s1 + $0x10] sm:$0xff]   ;;  %vm305_vm1 = vcmask 31744  }
   0xd   : > { %1879 = vmatprep.subr.msk.bf16.mxu0 %vm791_vm0, %v1906_v0  ;;  %1880 = vmatprep.subr.msk.bf16.mxu1 %vm791_vm0, %v1906_v0  ;;  %v793_v2 = vsel %vm791_vm0, %v1906_v0, 0  ;;  %s2707_s23 = smov (!%p268_p4, %s1681_s23), 255  ;;  %v2097_v4 = vmov 0.0   ;;  %v1909_v5 = vld [vmem:[%s2698_s1 + $0x8] sm:$0xff]   ;;  %vm694_vm2 = vcmask 588800   ;;  %v1910_v8 = vld [vmem:[%s2698_s1] sm:$0xff]  }
   0xe   : > { %1796 = vmatpush3.bf16.msra.mxu0 %v793_v2  ;;  %1874 = vmatpush3.bf16.msra.mxu1 %v793_v2  ;;  %308 = vst.msk [vmem:[#allocation2 + $0x10] sm:$0xff] %vm305_vm1, %v2097_v4  ;;  %306 = vst.msk [vmem:[#allocation2] sm:$0xff] %vm305_vm1, %v2097_v4  ;;  %s1682_s28 = sshll.u32 %s2707_s23, 2  ;;  %s1684_s12 = sshll.u32 %s2707_s23, 3 }
   0xf   : > { %1797 = vmatprep.subr.bf16.mxu0 %v2147_v1  ;;  %1870 = vmatprep.subr.bf16.mxu1 %v2147_v1  ;;  %307 = vst.msk [vmem:[#allocation2 + $0x8] sm:$0xff] %vm305_vm1, %v2097_v4  ;;  %309 = vst.msk [vmem:[#allocation2 + $0x18] sm:$0xff] %vm305_vm1, %v2097_v4  ;;  %s2297_s5 = scalar_lea.vmem %s2697_s0, %s1682_s28  ;;  %s2431_s15 = scalar_lea.vmem %s2701_s4, %s1684_s12 }
  0x10   : > { %310 = vst.msk [vmem:[#allocation2 + $0x20] sm:$0xff] %vm305_vm1, %v2097_v4  ;;  %311 = vst.msk [vmem:[#allocation2 + $0x28] sm:$0xff] %vm305_vm1, %v2097_v4  ;;  %v1911_v6 = vld [vmem:[%s2297_s5] sm:$0xff]   ;;  %v1913_v9 = vld [vmem:[%s2297_s5 + $0x8] sm:$0xff]  }
  0x11   : > { %312 = vst.msk [vmem:[#allocation2 + $0x30] sm:$0xff] %vm305_vm1, %v2097_v4  ;;  %313 = vst.msk [vmem:[#allocation2 + $0x38] sm:$0xff] %vm305_vm1, %v2097_v4  ;;  %v1912_v7 = vld [vmem:[%s2297_s5 + $0x80] sm:$0xff]   ;;  %1805 = vmatprep.mubr.msk.bf16.mxu0 %vm694_vm2, %v1911_v6  ;;  %v1914_v10 = vld [vmem:[%s2297_s5 + $0x88] sm:$0xff]  }
  0x12   : > { %314 = vst.msk [vmem:[#allocation2 + $0x40] sm:$0xff] %vm305_vm1, %v2097_v4  ;;  %315 = vst.msk [vmem:[#allocation2 + $0x48] sm:$0xff] %vm305_vm1, %v2097_v4  ;;  %1798 = vmatpush3.bf16.msra.mxu0 %v2147_v1  ;;  %1875 = vmatpush3.bf16.msra.mxu1 %v2147_v1  ;;  %v1915_v11 = vld [vmem:[%s2297_s5 + $0x10] sm:$0xff]   ;;  %v1917_v13 = vld [vmem:[%s2297_s5 + $0x18] sm:$0xff]  }
  0x13   : > { %316 = vst.msk [vmem:[#allocation2 + $0x50] sm:$0xff] %vm305_vm1, %v2097_v4  ;;  %317 = vst.msk [vmem:[#allocation2 + $0x58] sm:$0xff] %vm305_vm1, %v2097_v4  ;;  %1799 = vmatprep.subr.bf16.mxu0 %v2154_v3  ;;  %1871 = vmatprep.subr.bf16.mxu1 %v2154_v3  ;;  %v1916_v12 = vld [vmem:[%s2297_s5 + $0x90] sm:$0xff]   ;;  %v1918_v14 = vld [vmem:[%s2297_s5 + $0x98] sm:$0xff]  }
  0x14   : > { %318 = vst.msk [vmem:[#allocation2 + $0x60] sm:$0xff] %vm305_vm1, %v2097_v4  ;;  %319 = vst.msk [vmem:[#allocation2 + $0x68] sm:$0xff] %vm305_vm1, %v2097_v4  ;;  %1837 = vmatprep.mubr.msk.bf16.mxu1 %vm694_vm2, %v1912_v7  ;;  %v1919_v15 = vld [vmem:[%s2297_s5 + $0x20] sm:$0xff]   ;;  %v1921_v17 = vld [vmem:[%s2297_s5 + $0x28] sm:$0xff]  }
  0x15   : > { %320 = vst.msk [vmem:[#allocation2 + $0x70] sm:$0xff] %vm305_vm1, %v2097_v4  ;;  %321 = vst.msk [vmem:[#allocation2 + $0x78] sm:$0xff] %vm305_vm1, %v2097_v4  ;;  %v1920_v16 = vld [vmem:[%s2297_s5 + $0xa0] sm:$0xff]   ;;  %v1922_v18 = vld [vmem:[%s2297_s5 + $0xa8] sm:$0xff]  }
  0x16   : > { %322 = vst.msk [vmem:[#allocation2 + $0x80] sm:$0xff] %vm305_vm1, %v2097_v4  ;;  %323 = vst.msk [vmem:[#allocation2 + $0x88] sm:$0xff] %vm305_vm1, %v2097_v4  ;;  %1800 = vmatpush3.bf16.msra.mxu0 %v2154_v3  ;;  %1876 = vmatpush3.bf16.msra.mxu1 %v2154_v3  ;;  %v1923_v19 = vld [vmem:[%s2297_s5 + $0x30] sm:$0xff]   ;;  %v1925_v21 = vld [vmem:[%s2297_s5 + $0x38] sm:$0xff]  }
  0x17   : > { %324 = vst.msk [vmem:[#allocation2 + $0x90] sm:$0xff] %vm305_vm1, %v2097_v4  ;;  %325 = vst.msk [vmem:[#allocation2 + $0x98] sm:$0xff] %vm305_vm1, %v2097_v4  ;;  %1801 = vmatprep.subr.bf16.mxu0 %v1909_v5  ;;  %1872 = vmatprep.subr.bf16.mxu1 %v1909_v5  ;;  %v1924_v20 = vld [vmem:[%s2297_s5 + $0xb0] sm:$0xff]   ;;  %v1926_v22 = vld [vmem:[%s2297_s5 + $0xb8] sm:$0xff]  }
  0x18   : > { %326 = vst.msk [vmem:[#allocation2 + $0xa0] sm:$0xff] %vm305_vm1, %v2097_v4  ;;  %327 = vst.msk [vmem:[#allocation2 + $0xa8] sm:$0xff] %vm305_vm1, %v2097_v4  ;;  %v1927_v23 = vld [vmem:[%s2297_s5 + $0x40] sm:$0xff]   ;;  %v1929_v25 = vld [vmem:[%s2297_s5 + $0x48] sm:$0xff]  }
  0x19   : > { %328 = vst.msk [vmem:[#allocation2 + $0xb0] sm:$0xff] %vm305_vm1, %v2097_v4  ;;  %329 = vst.msk [vmem:[#allocation2 + $0xb8] sm:$0xff] %vm305_vm1, %v2097_v4  ;;  %v1928_v24 = vld [vmem:[%s2297_s5 + $0xc0] sm:$0xff]   ;;  %v1930_v26 = vld [vmem:[%s2297_s5 + $0xc8] sm:$0xff]  }
  0x1a   : > { %330 = vst.msk [vmem:[#allocation2 + $0xc0] sm:$0xff] %vm305_vm1, %v2097_v4  ;;  %331 = vst.msk [vmem:[#allocation2 + $0xc8] sm:$0xff] %vm305_vm1, %v2097_v4  ;;  %1802 = vmatpush3.bf16.msra.mxu0 %v1909_v5  ;;  %1877 = vmatpush3.bf16.msra.mxu1 %v1909_v5  ;;  %v1931_v27 = vld [vmem:[%s2297_s5 + $0x50] sm:$0xff]   ;;  %v1933_v29 = vld [vmem:[%s2297_s5 + $0x58] sm:$0xff]  }
  0x1b   : > { %332 = vst.msk [vmem:[#allocation2 + $0xd0] sm:$0xff] %vm305_vm1, %v2097_v4  ;;  %333 = vst.msk [vmem:[#allocation2 + $0xd8] sm:$0xff] %vm305_vm1, %v2097_v4  ;;  %1803 = vmatprep.subr.bf16.mxu0 %v1910_v8  ;;  %1873 = vmatprep.subr.bf16.mxu1 %v1910_v8  ;;  %v1932_v28 = vld [vmem:[%s2297_s5 + $0xd0] sm:$0xff]   ;;  %v1934_v30 = vld [vmem:[%s2297_s5 + $0xd8] sm:$0xff]  }
  0x1c   : > { %334 = vst.msk [vmem:[#allocation2 + $0xe0] sm:$0xff] %vm305_vm1, %v2097_v4  ;;  %335 = vst.msk [vmem:[#allocation2 + $0xe8] sm:$0xff] %vm305_vm1, %v2097_v4  ;;  %v1935_v31 = vld [vmem:[%s2297_s5 + $0x60] sm:$0xff]   ;;  %v1937_v33 = vld [vmem:[%s2297_s5 + $0x68] sm:$0xff]  }
  0x1d   : > { %336 = vst.msk [vmem:[#allocation2 + $0xf0] sm:$0xff] %vm305_vm1, %v2097_v4  ;;  %337 = vst.msk [vmem:[#allocation2 + $0xf8] sm:$0xff] %vm305_vm1, %v2097_v4  ;;  %v1936_v32 = vld [vmem:[%s2297_s5 + $0xe0] sm:$0xff]   ;;  %v1938_v34 = vld [vmem:[%s2297_s5 + $0xe8] sm:$0xff]  }
  0x1e   : > { %338 = vst.msk [vmem:[#allocation2 + $0x100] sm:$0xff] %vm305_vm1, %v2097_v4  ;;  %339 = vst.msk [vmem:[#allocation2 + $0x108] sm:$0xff] %vm305_vm1, %v2097_v4  ;;  %1804 = vmatpush3.bf16.msra.mxu0 %v1910_v8  ;;  %1878 = vmatpush3.bf16.msra.mxu1 %v1910_v8  ;;  %v1939_v35 = vld [vmem:[%s2297_s5 + $0x70] sm:$0xff]   ;;  %v1941_v37 = vld [vmem:[%s2297_s5 + $0x78] sm:$0xff]  }
  0x1f   : > { %340 = vst.msk [vmem:[#allocation2 + $0x110] sm:$0xff] %vm305_vm1, %v2097_v4  ;;  %341 = vst.msk [vmem:[#allocation2 + $0x118] sm:$0xff] %vm305_vm1, %v2097_v4  ;;  %v1940_v36 = vld [vmem:[%s2297_s5 + $0xf0] sm:$0xff]   ;;  %v1942_v38 = vld [vmem:[%s2297_s5 + $0xf8] sm:$0xff]  }
  0x20   : > { %342 = vst.msk [vmem:[#allocation2 + $0x120] sm:$0xff] %vm305_vm1, %v2097_v4  ;;  %343 = vst.msk [vmem:[#allocation2 + $0x128] sm:$0xff] %vm305_vm1, %v2097_v4  ;;  %v372_v39 = vld [vmem:[#allocation2 + $0x10] sm:$0xff]  ;;  %v370_v43 = vld [vmem:[#allocation2] sm:$0xff] }
  0x21   : > { %344 = vst.msk [vmem:[#allocation2 + $0x130] sm:$0xff] %vm305_vm1, %v2097_v4  ;;  %345 = vst.msk [vmem:[#allocation2 + $0x138] sm:$0xff] %vm305_vm1, %v2097_v4  ;;  %1806 = vmatmul.mubr.msk.bf16.vlgmr.msra.gmra.mxu0 %vm694_vm2, %v1913_v9  ;;  %1838 = vmatmul.mubr.msk.bf16.vlgmr.msra.gmra.mxu1 %vm694_vm2, %v1914_v10  ;;  %v373_v49 = vld [vmem:[#allocation2 + $0x18] sm:$0xff]  ;;  %v371_v55 = vld [vmem:[#allocation2 + $0x8] sm:$0xff] }
  0x22   : > { %346 = vst.msk [vmem:[#allocation2 + $0x140] sm:$0xff] %vm305_vm1, %v2097_v4  ;;  %347 = vst.msk [vmem:[#allocation2 + $0x148] sm:$0xff] %vm305_vm1, %v2097_v4  ;;  %1809 = vmatprep.mubr.msk.bf16.mxu0 %vm694_vm2, %v1915_v11  ;;  %1841 = vmatprep.mubr.msk.bf16.mxu1 %vm694_vm2, %v1916_v12  ;;  %v376_v61 = vld [vmem:[#allocation2 + $0x30] sm:$0xff]  ;;  %v2377_v1 = vld [vmem:[%s2699_s2] ss:$0 sm:$0xff] }
  0x23   : > { %348 = vst.msk [vmem:[#allocation2 + $0x150] sm:$0xff] %vm305_vm1, %v2097_v4  ;;  %349 = vst.msk [vmem:[#allocation2 + $0x158] sm:$0xff] %vm305_vm1, %v2097_v4  ;;  %v2384_v9 = vld [vmem:[%s2700_s3] ss:$0 sm:$0xff] }
  0x24   : > { %350 = vst.msk [vmem:[#allocation2 + $0x160] sm:$0xff] %vm305_vm1, %v2097_v4  ;;  %351 = vst.msk [vmem:[#allocation2 + $0x168] sm:$0xff] %vm305_vm1, %v2097_v4 }
  0x25   : > { %352 = vst.msk [vmem:[#allocation2 + $0x170] sm:$0xff] %vm305_vm1, %v2097_v4  ;;  %353 = vst.msk [vmem:[#allocation2 + $0x178] sm:$0xff] %vm305_vm1, %v2097_v4  ;;  %v402_v44 = vld [vmem:[#allocation2 + $0x100] sm:$0xff]  ;;  %v403_v56 = vld [vmem:[#allocation2 + $0x108] sm:$0xff] }
  0x26   : > { %354 = vst.msk [vmem:[#allocation2 + $0x180] sm:$0xff] %vm305_vm1, %v2097_v4  ;;  %355 = vst.msk [vmem:[#allocation2 + $0x188] sm:$0xff] %vm305_vm1, %v2097_v4  ;;  %v404_v40 = vld [vmem:[#allocation2 + $0x110] sm:$0xff]  ;;  %v405_v50 = vld [vmem:[#allocation2 + $0x118] sm:$0xff] }
  0x27   : > { %356 = vst.msk [vmem:[#allocation2 + $0x190] sm:$0xff] %vm305_vm1, %v2097_v4  ;;  %357 = vst.msk [vmem:[#allocation2 + $0x198] sm:$0xff] %vm305_vm1, %v2097_v4  ;;  %v406_v5 = vld [vmem:[#allocation2 + $0x120] sm:$0xff] }
  0x28   : > { %358 = vst.msk [vmem:[#allocation2 + $0x1a0] sm:$0xff] %vm305_vm1, %v2097_v4  ;;  %359 = vst.msk [vmem:[#allocation2 + $0x1a8] sm:$0xff] %vm305_vm1, %v2097_v4  ;;  %v408_v62 = vld [vmem:[#allocation2 + $0x130] sm:$0xff] }
  0x29   : > { %360 = vst.msk [vmem:[#allocation2 + $0x1b0] sm:$0xff] %vm305_vm1, %v2097_v4  ;;  %361 = vst.msk [vmem:[#allocation2 + $0x1b8] sm:$0xff] %vm305_vm1, %v2097_v4  ;;  %1810 = vmatmul.mubr.msk.bf16.gmra.mxu0 %vm694_vm2, %v1917_v13  ;;  %1842 = vmatmul.mubr.msk.bf16.gmra.mxu1 %vm694_vm2, %v1918_v14 }
  0x2a   : > { %362 = vst.msk [vmem:[#allocation2 + $0x1c0] sm:$0xff] %vm305_vm1, %v2097_v4  ;;  %363 = vst.msk [vmem:[#allocation2 + $0x1c8] sm:$0xff] %vm305_vm1, %v2097_v4  ;;  %1813 = vmatprep.mubr.msk.bf16.mxu0 %vm694_vm2, %v1919_v15  ;;  %1845 = vmatprep.mubr.msk.bf16.mxu1 %vm694_vm2, %v1920_v16 }
  0x2b   : > { %364 = vst.msk [vmem:[#allocation2 + $0x1d0] sm:$0xff] %vm305_vm1, %v2097_v4  ;;  %365 = vst.msk [vmem:[#allocation2 + $0x1d8] sm:$0xff] %vm305_vm1, %v2097_v4 }
  0x2c   : > { %366 = vst.msk [vmem:[#allocation2 + $0x1e0] sm:$0xff] %vm305_vm1, %v2097_v4  ;;  %367 = vst.msk [vmem:[#allocation2 + $0x1e8] sm:$0xff] %vm305_vm1, %v2097_v4 }
  0x2d   : > { %368 = vst.msk [vmem:[#allocation2 + $0x1f0] sm:$0xff] %vm305_vm1, %v2097_v4  ;;  %369 = vst.msk [vmem:[#allocation2 + $0x1f8] sm:$0xff] %vm305_vm1, %v2097_v4  ;;  %v374_v4 = vld [vmem:[#allocation2 + $0x20] sm:$0xff] }
  0x31   : > { %1814 = vmatmul.mubr.msk.bf16.gmra.mxu0 %vm694_vm2, %v1921_v17  ;;  %1846 = vmatmul.mubr.msk.bf16.gmra.mxu1 %vm694_vm2, %v1922_v18  ;;  %v377_v17 = vld [vmem:[#allocation2 + $0x38] sm:$0xff] }
  0x32   : > { %1817 = vmatprep.mubr.msk.bf16.mxu0 %vm694_vm2, %v1923_v19  ;;  %1849 = vmatprep.mubr.msk.bf16.mxu1 %vm694_vm2, %v1924_v20  ;;  %v409_v18 = vld [vmem:[#allocation2 + $0x138] sm:$0xff] }
  0x39   : > { %1818 = vmatmul.mubr.msk.bf16.gmra.mxu0 %vm694_vm2, %v1925_v21  ;;  %1850 = vmatmul.mubr.msk.bf16.gmra.mxu1 %vm694_vm2, %v1926_v22 }
  0x3a   : > { %1821 = vmatprep.mubr.msk.bf16.mxu0 %vm694_vm2, %v1927_v23  ;;  %1853 = vmatprep.mubr.msk.bf16.mxu1 %vm694_vm2, %v1928_v24 }
  0x41   : > { %1822 = vmatmul.mubr.msk.bf16.gmra.mxu0 %vm694_vm2, %v1929_v25  ;;  %1854 = vmatmul.mubr.msk.bf16.gmra.mxu1 %vm694_vm2, %v1930_v26 }
  0x42   : > { %1825 = vmatprep.mubr.msk.bf16.mxu0 %vm694_vm2, %v1931_v27  ;;  %1857 = vmatprep.mubr.msk.bf16.mxu1 %vm694_vm2, %v1932_v28  ;;  %v375_v27 = vld [vmem:[#allocation2 + $0x28] sm:$0xff] }
  0x43   : > { %v407_v28 = vld [vmem:[#allocation2 + $0x128] sm:$0xff] }
  0x49   : > { %1826 = vmatmul.mubr.msk.bf16.gmra.mxu0 %vm694_vm2, %v1933_v29  ;;  %1858 = vmatmul.mubr.msk.bf16.gmra.mxu1 %vm694_vm2, %v1934_v30 }
  0x4a   : > { %1829 = vmatprep.mubr.msk.bf16.mxu0 %vm694_vm2, %v1935_v31  ;;  %1861 = vmatprep.mubr.msk.bf16.mxu1 %vm694_vm2, %v1936_v32 }
  0x51   : > { %1830 = vmatmul.mubr.msk.bf16.gmra.mxu0 %vm694_vm2, %v1937_v33  ;;  %1862 = vmatmul.mubr.msk.bf16.gmra.mxu1 %vm694_vm2, %v1938_v34 }
  0x52   : > { %1833 = vmatprep.mubr.msk.bf16.mxu0 %vm694_vm2, %v1939_v35  ;;  %1865 = vmatprep.mubr.msk.bf16.mxu1 %vm694_vm2, %v1940_v36 }
  0x59   : > { %1834 = vmatmul.mubr.msk.bf16.gmra.mxu0 %vm694_vm2, %v1941_v37  ;;  %1866 = vmatmul.mubr.msk.bf16.gmra.mxu1 %vm694_vm2, %v1942_v38  ;;  %v380_v38 = vld [vmem:[#allocation2 + $0x50] sm:$0xff] }
  0xe1   : > { %v1807_v41 = vpop.f32.mrf.mxu0  ;;  %v1839_v42 = vpop.f32.mrf.mxu1 }
  0xe2   : > { %v1086_v45 = vadd.f32 %v1807_v41, %v372_v39  ;;  %v1118_v46 = vadd.f32 %v1839_v42, %v404_v40  ;;  %v412_v39 = vld [vmem:[#allocation2 + $0x150] sm:$0xff] }
  0xe3   : > { %v829_v47 = vpop.f32.mrf.mxu0  ;;  %v957_v48 = vpop.f32.mrf.mxu1 }
  0xe4   : > { %1151 = vst.msk [vmem:[#allocation2 + $0x10] sm:$0xff] %vm305_vm1, %v1086_v45  ;;  %1183 = vst.msk [vmem:[#allocation2 + $0x110] sm:$0xff] %vm305_vm1, %v1118_v46  ;;  %v1084_v51 = vadd.f32 %v829_v47, %v370_v43  ;;  %v1116_v52 = vadd.f32 %v957_v48, %v402_v44 }
  0xe5   : > { %v1808_v53 = vpop.f32.mrf.mxu0  ;;  %v1840_v54 = vpop.f32.mrf.mxu1 }
  0xe6   : > { %1149 = vst.msk [vmem:[#allocation2] sm:$0xff] %vm305_vm1, %v1084_v51  ;;  %1181 = vst.msk [vmem:[#allocation2 + $0x100] sm:$0xff] %vm305_vm1, %v1116_v52  ;;  %v1087_v57 = vadd.f32 %v1808_v53, %v373_v49  ;;  %v1119_v58 = vadd.f32 %v1840_v54, %v405_v50  ;;  %v378_v50 = vld [vmem:[#allocation2 + $0x40] sm:$0xff] }
  0xe7   : > { %v832_v59 = vpop.f32.mrf.mxu0  ;;  %v960_v60 = vpop.f32.mrf.mxu1  ;;  %v410_v51 = vld [vmem:[#allocation2 + $0x140] sm:$0xff] }
  0xe8   : > { %1152 = vst.msk [vmem:[#allocation2 + $0x18] sm:$0xff] %vm305_vm1, %v1087_v57  ;;  %1184 = vst.msk [vmem:[#allocation2 + $0x118] sm:$0xff] %vm305_vm1, %v1119_v58  ;;  %v1085_v63 = vadd.f32 %v832_v59, %v371_v55  ;;  %v1117_v0 = vadd.f32 %v960_v60, %v403_v56 }
  0xe9   : > { %v1811_v2 = vpop.f32.mrf.mxu0  ;;  %v1843_v3 = vpop.f32.mrf.mxu1 }
  0xea   : > { %1150 = vst.msk [vmem:[#allocation2 + $0x8] sm:$0xff] %vm305_vm1, %v1085_v63  ;;  %1182 = vst.msk [vmem:[#allocation2 + $0x108] sm:$0xff] %vm305_vm1, %v1117_v0  ;;  %v1090_v6 = vadd.f32 %v1811_v2, %v376_v61  ;;  %v1122_v7 = vadd.f32 %v1843_v3, %v408_v62  ;;  %v381_v62 = vld [vmem:[#allocation2 + $0x58] sm:$0xff] }
  0xeb   : > { %v1218_v8 = vld [vmem:[#allocation2 + $0x10] sm:$0xff]  ;;  %v845_v11 = vpop.f32.mrf.mxu0  ;;  %v973_v12 = vpop.f32.mrf.mxu1  ;;  %v413_v63 = vld [vmem:[#allocation2 + $0x158] sm:$0xff] }
  0xec   : > { %v1250_v10 = vld [vmem:[#allocation2 + $0x110] sm:$0xff]  ;;  %v1289_v13 = vmul.f32 %v2377_v1, %v1218_v8  ;;  %1155 = vst.msk [vmem:[#allocation2 + $0x30] sm:$0xff] %vm305_vm1, %v1090_v6  ;;  %1187 = vst.msk [vmem:[#allocation2 + $0x130] sm:$0xff] %vm305_vm1, %v1122_v7  ;;  %v1088_v15 = vadd.f32 %v845_v11, %v374_v4  ;;  %v1120_v16 = vadd.f32 %v973_v12, %v406_v5  ;;  %v379_v8 = vld [vmem:[#allocation2 + $0x48] sm:$0xff] }
  0xed   : > { %v1321_v14 = vmul.f32 %v2377_v1, %v1250_v10  ;;  %v1216_v19 = vld [vmem:[#allocation2] sm:$0xff]  ;;  %v1812_v21 = vpop.f32.mrf.mxu0  ;;  %v1844_v22 = vpop.f32.mrf.mxu1 }
  0xee   : > { %v1248_v20 = vld [vmem:[#allocation2 + $0x100] sm:$0xff]  ;;  %v1360_v23 = vadd.f32 %v2384_v9, %v1289_v13  ;;  %v1287_v25 = vmul.f32 %v2377_v1, %v1216_v19  ;;  %1153 = vst.msk [vmem:[#allocation2 + $0x20] sm:$0xff] %vm305_vm1, %v1088_v15  ;;  %1185 = vst.msk [vmem:[#allocation2 + $0x120] sm:$0xff] %vm305_vm1, %v1120_v16  ;;  %v1091_v31 = vadd.f32 %v1812_v21, %v377_v17  ;;  %v411_v13 = vld [vmem:[#allocation2 + $0x148] sm:$0xff] }
  0xef   : > { %v1392_v24 = vadd.f32 %v2384_v9, %v1321_v14  ;;  %v1319_v26 = vmul.f32 %v2377_v1, %v1248_v20  ;;  %v1219_v29 = vld [vmem:[#allocation2 + $0x18] sm:$0xff]  ;;  %v1123_v32 = vadd.f32 %v1844_v22, %v409_v18  ;;  %v848_v33 = vpop.f32.mrf.mxu0  ;;  %v976_v34 = vpop.f32.mrf.mxu1  ;;  %v384_v19 = vld [vmem:[#allocation2 + $0x70] sm:$0xff] }
  0xf0   : > { %v1251_v30 = vld [vmem:[#allocation2 + $0x118] sm:$0xff]  ;;  %1943 = vtanh.f32 %v1360_v23  ;;  %v1358_v35 = vadd.f32 %v2384_v9, %v1287_v25  ;;  %v1290_v37 = vmul.f32 %v2377_v1, %v1219_v29  ;;  %1156 = vst.msk [vmem:[#allocation2 + $0x38] sm:$0xff] %vm305_vm1, %v1091_v31  ;;  %v1089_v43 = vadd.f32 %v848_v33, %v375_v27  ;;  %v416_v20 = vld [vmem:[#allocation2 + $0x170] sm:$0xff]  ;;  %v382_v31 = vld [vmem:[#allocation2 + $0x60] sm:$0xff] }
  0xf1   : > { %v1390_v36 = vadd.f32 %v2384_v9, %v1319_v26  ;;  %1945 = vtanh.f32 %v1392_v24  ;;  %v1322_v40 = vmul.f32 %v2377_v1, %v1251_v30  ;;  %v1217_v41 = vld [vmem:[#allocation2 + $0x8] sm:$0xff]  ;;  %1188 = vst.msk [vmem:[#allocation2 + $0x138] sm:$0xff] %vm305_vm1, %v1123_v32  ;;  %v1121_v44 = vadd.f32 %v976_v34, %v407_v28  ;;  %v1815_v45 = vpop.f32.mrf.mxu0  ;;  %v1847_v46 = vpop.f32.mrf.mxu1  ;;  %v414_v32 = vld [vmem:[#allocation2 + $0x160] sm:$0xff] }
  0xf2   : > { %v1249_v42 = vld [vmem:[#allocation2 + $0x108] sm:$0xff]  ;;  %1947 = vtanh.f32 %v1358_v35  ;;  %v1361_v47 = vadd.f32 %v2384_v9, %v1290_v37  ;;  %v1288_v48 = vmul.f32 %v2377_v1, %v1217_v41  ;;  %1154 = vst.msk [vmem:[#allocation2 + $0x28] sm:$0xff] %vm305_vm1, %v1089_v43  ;;  %v1094_v55 = vadd.f32 %v1815_v45, %v380_v38  ;;  %v417_v43 = vld [vmem:[#allocation2 + $0x178] sm:$0xff] }
  0xf3   : > { %v1320_v49 = vmul.f32 %v2377_v1, %v1249_v42  ;;  %1949 = vtanh.f32 %v1390_v36  ;;  %v1393_v52 = vadd.f32 %v2384_v9, %v1322_v40  ;;  %v1222_v53 = vld [vmem:[#allocation2 + $0x30] sm:$0xff]  ;;  %1186 = vst.msk [vmem:[#allocation2 + $0x128] sm:$0xff] %vm305_vm1, %v1121_v44  ;;  %v1126_v56 = vadd.f32 %v1847_v46, %v412_v39  ;;  %v861_v57 = vpop.f32.mrf.mxu0  ;;  %v989_v58 = vpop.f32.mrf.mxu1  ;;  %v385_v42 = vld [vmem:[#allocation2 + $0x78] sm:$0xff] }
  0xf4   : > { %v1254_v54 = vld [vmem:[#allocation2 + $0x130] sm:$0xff]  ;;  %1951 = vtanh.f32 %v1361_v47  ;;  %v1359_v59 = vadd.f32 %v2384_v9, %v1288_v48  ;;  %v1293_v61 = vmul.f32 %v2377_v1, %v1222_v53  ;;  %1159 = vst.msk [vmem:[#allocation2 + $0x50] sm:$0xff] %vm305_vm1, %v1094_v55  ;;  %v1092_v4 = vadd.f32 %v861_v57, %v378_v50  ;;  %v383_v55 = vld [vmem:[#allocation2 + $0x68] sm:$0xff] }
  0xf5   : > { %v1391_v60 = vadd.f32 %v2384_v9, %v1320_v49  ;;  %1953 = vtanh.f32 %v1393_v52  ;;  %v1325_v0 = vmul.f32 %v2377_v1, %v1254_v54  ;;  %v1220_v2 = vld [vmem:[#allocation2 + $0x20] sm:$0xff]  ;;  %1191 = vst.msk [vmem:[#allocation2 + $0x150] sm:$0xff] %vm305_vm1, %v1126_v56  ;;  %v1124_v5 = vadd.f32 %v989_v58, %v410_v51  ;;  %v1816_v6 = vpop.f32.mrf.mxu0  ;;  %v1848_v7 = vpop.f32.mrf.mxu1  ;;  %v415_v56 = vld [vmem:[#allocation2 + $0x168] sm:$0xff] }
  0xf6   : > { %v1252_v3 = vld [vmem:[#allocation2 + $0x120] sm:$0xff]  ;;  %1955 = vtanh.f32 %v1359_v59  ;;  %v1364_v10 = vadd.f32 %v2384_v9, %v1293_v61  ;;  %v1291_v11 = vmul.f32 %v2377_v1, %v1220_v2  ;;  %1157 = vst.msk [vmem:[#allocation2 + $0x40] sm:$0xff] %vm305_vm1, %v1092_v4  ;;  %v1095_v15 = vadd.f32 %v1816_v6, %v381_v62  ;;  %v388_v6 = vld [vmem:[#allocation2 + $0x90] sm:$0xff] }
  0xf7   : > { %v1323_v12 = vmul.f32 %v2377_v1, %v1252_v3  ;;  %1957 = vtanh.f32 %v1391_v60  ;;  %v1396_v14 = vadd.f32 %v2384_v9, %v1325_v0  ;;  %1189 = vst.msk [vmem:[#allocation2 + $0x140] sm:$0xff] %vm305_vm1, %v1124_v5  ;;  %v1127_v16 = vadd.f32 %v1848_v7, %v413_v63  ;;  %v864_v17 = vpop.f32.mrf.mxu0  ;;  %v992_v18 = vpop.f32.mrf.mxu1  ;;  %v1223_v23 = vld [vmem:[#allocation2 + $0x38] sm:$0xff] }
  0xf8   : > { %1959 = vtanh.f32 %v1364_v10  ;;  %v1362_v21 = vadd.f32 %v2384_v9, %v1291_v11  ;;  %v1255_v24 = vld [vmem:[#allocation2 + $0x138] sm:$0xff]  ;;  %v1093_v25 = vadd.f32 %v864_v17, %v379_v8  ;;  %v1294_v26 = vmul.f32 %v2377_v1, %v1223_v23  ;;  %1160 = vst.msk [vmem:[#allocation2 + $0x58] sm:$0xff] %vm305_vm1, %v1095_v15 }
  0xf9   : > { %v1394_v22 = vadd.f32 %v2384_v9, %v1323_v12  ;;  %1961 = vtanh.f32 %v1396_v14  ;;  %v1326_v27 = vmul.f32 %v2377_v1, %v1255_v24  ;;  %1192 = vst.msk [vmem:[#allocation2 + $0x158] sm:$0xff] %vm305_vm1, %v1127_v16  ;;  %v1125_v28 = vadd.f32 %v992_v18, %v411_v13  ;;  %v1819_v29 = vpop.f32.mrf.mxu0  ;;  %v1851_v30 = vpop.f32.mrf.mxu1  ;;  %v1221_v33 = vld [vmem:[#allocation2 + $0x28] sm:$0xff] }
  0xfa   : > { %1963 = vtanh.f32 %v1362_v21  ;;  %v1253_v34 = vld [vmem:[#allocation2 + $0x128] sm:$0xff]  ;;  %1158 = vst.msk [vmem:[#allocation2 + $0x48] sm:$0xff] %vm305_vm1, %v1093_v25  ;;  %v1098_v35 = vadd.f32 %v1819_v29, %v384_v19  ;;  %v1130_v36 = vadd.f32 %v1851_v30, %v416_v20  ;;  %v1365_v37 = vadd.f32 %v2384_v9, %v1294_v26  ;;  %v420_v26 = vld [vmem:[#allocation2 + $0x190] sm:$0xff] }
  0xfb   : > { %1965 = vtanh.f32 %v1394_v22  ;;  %v1397_v38 = vadd.f32 %v2384_v9, %v1326_v27  ;;  %v1292_v39 = vmul.f32 %v2377_v1, %v1221_v33  ;;  %1190 = vst.msk [vmem:[#allocation2 + $0x148] sm:$0xff] %vm305_vm1, %v1125_v28  ;;  %v877_v40 = vpop.f32.mrf.mxu0  ;;  %v1005_v41 = vpop.f32.mrf.mxu1  ;;  %v1324_v44 = vmul.f32 %v2377_v1, %v1253_v34  ;;  %v1226_v45 = vld [vmem:[#allocation2 + $0x50] sm:$0xff]  ;;  %v386_v27 = vld [vmem:[#allocation2 + $0x80] sm:$0xff] }
  0xfc   : > { %v1258_v46 = vld [vmem:[#allocation2 + $0x150] sm:$0xff]  ;;  %1163 = vst.msk [vmem:[#allocation2 + $0x70] sm:$0xff] %vm305_vm1, %v1098_v35  ;;  %1195 = vst.msk [vmem:[#allocation2 + $0x170] sm:$0xff] %vm305_vm1, %v1130_v36  ;;  %v1096_v47 = vadd.f32 %v877_v40, %v382_v31  ;;  %v1128_v48 = vadd.f32 %v1005_v41, %v414_v32  ;;  %1967 = vtanh.f32 %v1365_v37  ;;  %v1297_v51 = vmul.f32 %v2377_v1, %v1226_v45  ;;  %v418_v40 = vld [vmem:[#allocation2 + $0x180] sm:$0xff] }
  0xfd   : > { %v1944_v49 = vpop.eup %1943  ;;  %v1363_v50 = vadd.f32 %v2384_v9, %v1292_v39  ;;  %v1329_v52 = vmul.f32 %v2377_v1, %v1258_v46  ;;  %v1820_v53 = vpop.f32.mrf.mxu0  ;;  %1969 = vtanh.f32 %v1397_v38  ;;  %v1395_v58 = vadd.f32 %v2384_v9, %v1324_v44  ;;  %v1224_v59 = vld [vmem:[#allocation2 + $0x40] sm:$0xff]  ;;  %v389_v41 = vld [vmem:[#allocation2 + $0x98] sm:$0xff] }
  0xfe   : > { %v1852_v54 = vpop.f32.mrf.mxu1  ;;  %v1946_v57 = vpop.eup %1945  ;;  %1488 = vst.msk [vmem:[%s2431_s15 + $0x10] sm:$0xff] %vm305_vm1, %v1944_v49  ;;  %v1256_v60 = vld [vmem:[#allocation2 + $0x140] sm:$0xff]  ;;  %1161 = vst.msk [vmem:[#allocation2 + $0x60] sm:$0xff] %vm305_vm1, %v1096_v47  ;;  %v1099_v61 = vadd.f32 %v1820_v53, %v385_v42  ;;  %v1368_v0 = vadd.f32 %v2384_v9, %v1297_v51  ;;  %v1295_v3 = vmul.f32 %v2377_v1, %v1224_v59 }
  0xff   : > { %1193 = vst.msk [vmem:[#allocation2 + $0x160] sm:$0xff] %vm305_vm1, %v1128_v48  ;;  %v1131_v62 = vadd.f32 %v1852_v54, %v417_v43  ;;  %v1948_v63 = vpop.eup %1947  ;;  %1520 = vst.msk [vmem:[%s2431_s15 + $0x110] sm:$0xff] %vm305_vm1, %v1946_v57  ;;  %1971 = vtanh.f32 %v1363_v50  ;;  %v1400_v2 = vadd.f32 %v2384_v9, %v1329_v52  ;;  %v880_v4 = vpop.f32.mrf.mxu0  ;;  %v1327_v8 = vmul.f32 %v2377_v1, %v1256_v60  ;;  %v1227_v10 = vld [vmem:[#allocation2 + $0x58] sm:$0xff] }
 0x100   : > { %v1008_v5 = vpop.f32.mrf.mxu1  ;;  %v1950_v7 = vpop.eup %1949  ;;  %1486 = vst.msk [vmem:[%s2431_s15] sm:$0xff] %vm305_vm1, %v1948_v63  ;;  %1973 = vtanh.f32 %v1395_v58  ;;  %v1259_v11 = vld [vmem:[#allocation2 + $0x158] sm:$0xff]  ;;  %1164 = vst.msk [vmem:[#allocation2 + $0x78] sm:$0xff] %vm305_vm1, %v1099_v61  ;;  %v1097_v12 = vadd.f32 %v880_v4, %v383_v55  ;;  %v1366_v15 = vadd.f32 %v2384_v9, %v1295_v3  ;;  %v1298_v16 = vmul.f32 %v2377_v1, %v1227_v10  ;;  %v387_v55 = vld [vmem:[#allocation2 + $0x88] sm:$0xff] }
 0x101   : > { %1196 = vst.msk [vmem:[#allocation2 + $0x178] sm:$0xff] %vm305_vm1, %v1131_v62  ;;  %v1129_v13 = vadd.f32 %v1008_v5, %v415_v56  ;;  %v1952_v14 = vpop.eup %1951  ;;  %1518 = vst.msk [vmem:[%s2431_s15 + $0x100] sm:$0xff] %vm305_vm1, %v1950_v7  ;;  %1975 = vtanh.f32 %v1368_v0  ;;  %v1330_v17 = vmul.f32 %v2377_v1, %v1259_v11  ;;  %v1225_v18 = vld [vmem:[#allocation2 + $0x48] sm:$0xff]  ;;  %v1823_v19 = vpop.f32.mrf.mxu0  ;;  %v1398_v22 = vadd.f32 %v2384_v9, %v1327_v8  ;;  %v421_v54 = vld [vmem:[#allocation2 + $0x198] sm:$0xff] }
 0x102   : > { %v1855_v20 = vpop.f32.mrf.mxu1  ;;  %v1954_v21 = vpop.eup %1953  ;;  %1489 = vst.msk [vmem:[%s2431_s15 + $0x18] sm:$0xff] %vm305_vm1, %v1952_v14  ;;  %1977 = vtanh.f32 %v1400_v2  ;;  %v1296_v23 = vmul.f32 %v2377_v1, %v1225_v18  ;;  %v1257_v24 = vld [vmem:[#allocation2 + $0x148] sm:$0xff]  ;;  %1162 = vst.msk [vmem:[#allocation2 + $0x68] sm:$0xff] %vm305_vm1, %v1097_v12  ;;  %v1102_v25 = vadd.f32 %v1823_v19, %v388_v6  ;;  %v1369_v29 = vadd.f32 %v2384_v9, %v1298_v16  ;;  %v392_v6 = vld [vmem:[#allocation2 + $0xb0] sm:$0xff] }
 0x103   : > { %1194 = vst.msk [vmem:[#allocation2 + $0x168] sm:$0xff] %vm305_vm1, %v1129_v13  ;;  %v1956_v28 = vpop.eup %1955  ;;  %1521 = vst.msk [vmem:[%s2431_s15 + $0x118] sm:$0xff] %vm305_vm1, %v1954_v21  ;;  %1979 = vtanh.f32 %v1366_v15  ;;  %v1401_v30 = vadd.f32 %v2384_v9, %v1330_v17  ;;  %v1328_v31 = vmul.f32 %v2377_v1, %v1257_v24  ;;  %v1230_v32 = vld [vmem:[#allocation2 + $0x70] sm:$0xff]  ;;  %v893_v34 = vpop.f32.mrf.mxu0  ;;  %v1134_v46 = vadd.f32 %v1855_v20, %v420_v26  ;;  %v419_v5 = vld [vmem:[#allocation2 + $0x188] sm:$0xff] }
 0x104   : > { %v1262_v33 = vld [vmem:[#allocation2 + $0x170] sm:$0xff]  ;;  %v1021_v35 = vpop.f32.mrf.mxu1  ;;  %v1958_v36 = vpop.eup %1957  ;;  %1487 = vst.msk [vmem:[%s2431_s15 + $0x8] sm:$0xff] %vm305_vm1, %v1956_v28  ;;  %1981 = vtanh.f32 %v1398_v22  ;;  %v1367_v37 = vadd.f32 %v2384_v9, %v1296_v23  ;;  %v1301_v38 = vmul.f32 %v2377_v1, %v1230_v32  ;;  %1167 = vst.msk [vmem:[#allocation2 + $0x90] sm:$0xff] %vm305_vm1, %v1102_v25  ;;  %v1100_v47 = vadd.f32 %v893_v34, %v386_v27  ;;  %v390_v20 = vld [vmem:[#allocation2 + $0xa0] sm:$0xff] }
 0x105   : > { %v1333_v39 = vmul.f32 %v2377_v1, %v1262_v33  ;;  %v1960_v42 = vpop.eup %1959  ;;  %1519 = vst.msk [vmem:[%s2431_s15 + $0x108] sm:$0xff] %vm305_vm1, %v1958_v36  ;;  %1983 = vtanh.f32 %v1369_v29  ;;  %v1399_v43 = vadd.f32 %v2384_v9, %v1328_v31  ;;  %v1228_v44 = vld [vmem:[#allocation2 + $0x60] sm:$0xff]  ;;  %v1824_v48 = vpop.f32.mrf.mxu0  ;;  %1199 = vst.msk [vmem:[#allocation2 + $0x190] sm:$0xff] %vm305_vm1, %v1134_v46  ;;  %v1132_v60 = vadd.f32 %v1021_v35, %v418_v40  ;;  %v424_v14 = vld [vmem:[#allocation2 + $0x1b0] sm:$0xff] }
 0x106   : > { %v1260_v45 = vld [vmem:[#allocation2 + $0x160] sm:$0xff]  ;;  %v1856_v49 = vpop.f32.mrf.mxu1  ;;  %v1962_v50 = vpop.eup %1961  ;;  %1492 = vst.msk [vmem:[%s2431_s15 + $0x30] sm:$0xff] %vm305_vm1, %v1960_v42  ;;  %1985 = vtanh.f32 %v1401_v30  ;;  %v1372_v51 = vadd.f32 %v2384_v9, %v1301_v38  ;;  %v1299_v53 = vmul.f32 %v2377_v1, %v1228_v44  ;;  %1165 = vst.msk [vmem:[#allocation2 + $0x80] sm:$0xff] %vm305_vm1, %v1100_v47  ;;  %v1103_v61 = vadd.f32 %v1824_v48, %v389_v41  ;;  %v393_v29 = vld [vmem:[#allocation2 + $0xb8] sm:$0xff] }
 0x107   : > { %v1404_v52 = vadd.f32 %v2384_v9, %v1333_v39  ;;  %v1964_v56 = vpop.eup %1963  ;;  %1524 = vst.msk [vmem:[%s2431_s15 + $0x130] sm:$0xff] %vm305_vm1, %v1962_v50  ;;  %1987 = vtanh.f32 %v1367_v37  ;;  %v1331_v57 = vmul.f32 %v2377_v1, %v1260_v45  ;;  %v1231_v58 = vld [vmem:[#allocation2 + $0x78] sm:$0xff]  ;;  %v896_v62 = vpop.f32.mrf.mxu0  ;;  %1197 = vst.msk [vmem:[#allocation2 + $0x180] sm:$0xff] %vm305_vm1, %v1132_v60  ;;  %v1135_v11 = vadd.f32 %v1856_v49, %v421_v54  ;;  %v422_v21 = vld [vmem:[#allocation2 + $0x1a0] sm:$0xff] }
 0x108   : > { %v1263_v59 = vld [vmem:[#allocation2 + $0x178] sm:$0xff]  ;;  %v1024_v63 = vpop.f32.mrf.mxu1  ;;  %v1966_v0 = vpop.eup %1965  ;;  %1490 = vst.msk [vmem:[%s2431_s15 + $0x20] sm:$0xff] %vm305_vm1, %v1964_v56  ;;  %1989 = vtanh.f32 %v1399_v43  ;;  %v1370_v2 = vadd.f32 %v2384_v9, %v1299_v53  ;;  %v1302_v3 = vmul.f32 %v2377_v1, %v1231_v58  ;;  %1168 = vst.msk [vmem:[#allocation2 + $0x98] sm:$0xff] %vm305_vm1, %v1103_v61  ;;  %v1101_v12 = vadd.f32 %v896_v62, %v387_v55  ;;  %v391_v41 = vld [vmem:[#allocation2 + $0xa8] sm:$0xff] }
 0x109   : > { %v1334_v4 = vmul.f32 %v2377_v1, %v1263_v59  ;;  %1522 = vst.msk [vmem:[%s2431_s15 + $0x120] sm:$0xff] %vm305_vm1, %v1966_v0  ;;  %1991 = vtanh.f32 %v1372_v51  ;;  %v1402_v7 = vadd.f32 %v2384_v9, %v1331_v57  ;;  %v1229_v8 = vld [vmem:[#allocation2 + $0x68] sm:$0xff]  ;;  %v1827_v13 = vpop.f32.mrf.mxu0  ;;  %v1968_v16 = vpop.eup %1967  ;;  %1200 = vst.msk [vmem:[#allocation2 + $0x198] sm:$0xff] %vm305_vm1, %v1135_v11  ;;  %v1133_v25 = vadd.f32 %v1024_v63, %v419_v5  ;;  %v425_v30 = vld [vmem:[#allocation2 + $0x1b8] sm:$0xff] }
 0x10a   : > { %v1261_v10 = vld [vmem:[#allocation2 + $0x168] sm:$0xff]  ;;  %v1859_v15 = vpop.f32.mrf.mxu1  ;;  %1993 = vtanh.f32 %v1404_v52  ;;  %v1373_v17 = vadd.f32 %v2384_v9, %v1302_v3  ;;  %v1300_v19 = vmul.f32 %v2377_v1, %v1229_v8  ;;  %v1970_v22 = vpop.eup %1969  ;;  %1493 = vst.msk [vmem:[%s2431_s15 + $0x38] sm:$0xff] %vm305_vm1, %v1968_v16  ;;  %1166 = vst.msk [vmem:[#allocation2 + $0x88] sm:$0xff] %vm305_vm1, %v1101_v12  ;;  %v1106_v26 = vadd.f32 %v1827_v13, %v392_v6  ;;  %v396_v54 = vld [vmem:[#allocation2 + $0xd0] sm:$0xff] }
 0x10b   : > { %v1405_v18 = vadd.f32 %v2384_v9, %v1334_v4  ;;  %1995 = vtanh.f32 %v1370_v2  ;;  %v1332_v23 = vmul.f32 %v2377_v1, %v1261_v10  ;;  %v1234_v24 = vld [vmem:[#allocation2 + $0x90] sm:$0xff]  ;;  %v909_v27 = vpop.f32.mrf.mxu0  ;;  %1525 = vst.msk [vmem:[%s2431_s15 + $0x138] sm:$0xff] %vm305_vm1, %v1970_v22  ;;  %v1138_v34 = vadd.f32 %v1859_v15, %v424_v14  ;;  %1198 = vst.msk [vmem:[#allocation2 + $0x188] sm:$0xff] %vm305_vm1, %v1133_v25  ;;  %v423_v42 = vld [vmem:[#allocation2 + $0x1a8] sm:$0xff] }
 0x10c   : > { %v1037_v28 = vpop.f32.mrf.mxu1  ;;  %v1972_v31 = vpop.eup %1971  ;;  %1997 = vtanh.f32 %v1402_v7  ;;  %v1371_v32 = vadd.f32 %v2384_v9, %v1300_v19  ;;  %v1305_v33 = vmul.f32 %v2377_v1, %v1234_v24  ;;  %1171 = vst.msk [vmem:[#allocation2 + $0xb0] sm:$0xff] %vm305_vm1, %v1106_v26  ;;  %v1104_v37 = vadd.f32 %v909_v27, %v390_v20  ;;  %v1266_v45 = vld [vmem:[#allocation2 + $0x190] sm:$0xff]  ;;  %v394_v4 = vld [vmem:[#allocation2 + $0xc0] sm:$0xff]  ;;  %v397_v19 = vld [vmem:[#allocation2 + $0xd8] sm:$0xff] }
 0x10d   : > { %v1974_v35 = vpop.eup %1973  ;;  %1491 = vst.msk [vmem:[%s2431_s15 + $0x28] sm:$0xff] %vm305_vm1, %v1972_v31  ;;  %1999 = vtanh.f32 %v1373_v17  ;;  %v1403_v36 = vadd.f32 %v2384_v9, %v1332_v23  ;;  %v1136_v38 = vadd.f32 %v1037_v28, %v422_v21  ;;  %v1828_v39 = vpop.f32.mrf.mxu0  ;;  %v1232_v46 = vld [vmem:[#allocation2 + $0x80] sm:$0xff]  ;;  %1203 = vst.msk [vmem:[#allocation2 + $0x1b0] sm:$0xff] %vm305_vm1, %v1138_v34  ;;  %v1337_v50 = vmul.f32 %v2377_v1, %v1266_v45  ;;  %v428_v55 = vld [vmem:[#allocation2 + $0x1d0] sm:$0xff] }
 0x10e   : > { %v1860_v40 = vpop.f32.mrf.mxu1  ;;  %v1976_v43 = vpop.eup %1975  ;;  %1523 = vst.msk [vmem:[%s2431_s15 + $0x128] sm:$0xff] %vm305_vm1, %v1974_v35  ;;  %2001 = vtanh.f32 %v1405_v18  ;;  %v1376_v44 = vadd.f32 %v2384_v9, %v1305_v33  ;;  %v1107_v47 = vadd.f32 %v1828_v39, %v393_v29  ;;  %v1303_v51 = vmul.f32 %v2377_v1, %v1232_v46  ;;  %1169 = vst.msk [vmem:[#allocation2 + $0xa0] sm:$0xff] %vm305_vm1, %v1104_v37  ;;  %v1264_v57 = vld [vmem:[#allocation2 + $0x180] sm:$0xff] }
 0x10f   : > { %v1139_v48 = vadd.f32 %v1860_v40, %v425_v30  ;;  %v1978_v49 = vpop.eup %1977  ;;  %1496 = vst.msk [vmem:[%s2431_s15 + $0x50] sm:$0xff] %vm305_vm1, %v1976_v43  ;;  %2003 = vtanh.f32 %v1371_v32  ;;  %1201 = vst.msk [vmem:[#allocation2 + $0x1a0] sm:$0xff] %vm305_vm1, %v1136_v38  ;;  %v912_v52 = vpop.f32.mrf.mxu0  ;;  %v1235_v58 = vld [vmem:[#allocation2 + $0x98] sm:$0xff]  ;;  %v1408_v62 = vadd.f32 %v2384_v9, %v1337_v50  ;;  %v1335_v0 = vmul.f32 %v2377_v1, %v1264_v57  ;;  %v426_v5 = vld [vmem:[#allocation2 + $0x1c0] sm:$0xff] }
 0x110   : > { %v1040_v53 = vpop.f32.mrf.mxu1  ;;  %v1980_v56 = vpop.eup %1979  ;;  %1528 = vst.msk [vmem:[%s2431_s15 + $0x150] sm:$0xff] %vm305_vm1, %v1978_v49  ;;  %2005 = vtanh.f32 %v1403_v36  ;;  %1172 = vst.msk [vmem:[#allocation2 + $0xb8] sm:$0xff] %vm305_vm1, %v1107_v47  ;;  %v1105_v59 = vadd.f32 %v912_v52, %v391_v41  ;;  %v1374_v63 = vadd.f32 %v2384_v9, %v1303_v51  ;;  %v1306_v7 = vmul.f32 %v2377_v1, %v1235_v58  ;;  %v1267_v8 = vld [vmem:[#allocation2 + $0x198] sm:$0xff]  ;;  %v395_v52 = vld [vmem:[#allocation2 + $0xc8] sm:$0xff] }
 0x111   : > { %1204 = vst.msk [vmem:[#allocation2 + $0x1b8] sm:$0xff] %vm305_vm1, %v1139_v48  ;;  %v1137_v60 = vadd.f32 %v1040_v53, %v423_v42  ;;  %v1982_v61 = vpop.eup %1981  ;;  %1494 = vst.msk [vmem:[%s2431_s15 + $0x40] sm:$0xff] %vm305_vm1, %v1980_v56  ;;  %2007 = vtanh.f32 %v1376_v44  ;;  %v1831_v2 = vpop.f32.mrf.mxu0  ;;  %v1233_v10 = vld [vmem:[#allocation2 + $0x88] sm:$0xff]  ;;  %v1406_v14 = vadd.f32 %v2384_v9, %v1335_v0  ;;  %v1338_v15 = vmul.f32 %v2377_v1, %v1267_v8  ;;  %v429_v51 = vld [vmem:[#allocation2 + $0x1d8] sm:$0xff] }
 0x112   : > { %v1863_v3 = vpop.f32.mrf.mxu1  ;;  %v1984_v6 = vpop.eup %1983  ;;  %1526 = vst.msk [vmem:[%s2431_s15 + $0x140] sm:$0xff] %vm305_vm1, %v1982_v61  ;;  %1170 = vst.msk [vmem:[#allocation2 + $0xa8] sm:$0xff] %vm305_vm1, %v1105_v59  ;;  %v1110_v11 = vadd.f32 %v1831_v2, %v396_v54  ;;  %2009 = vtanh.f32 %v1408_v62  ;;  %v1304_v16 = vmul.f32 %v2377_v1, %v1233_v10  ;;  %v1377_v21 = vadd.f32 %v2384_v9, %v1306_v7  ;;  %v1265_v22 = vld [vmem:[#allocation2 + $0x188] sm:$0xff] }
 0x113   : > { %1202 = vst.msk [vmem:[#allocation2 + $0x1a8] sm:$0xff] %vm305_vm1, %v1137_v60  ;;  %v1142_v12 = vadd.f32 %v1863_v3, %v428_v55  ;;  %v1986_v13 = vpop.eup %1985  ;;  %1497 = vst.msk [vmem:[%s2431_s15 + $0x58] sm:$0xff] %vm305_vm1, %v1984_v6  ;;  %v925_v17 = vpop.f32.mrf.mxu0  ;;  %2011 = vtanh.f32 %v1374_v63  ;;  %v1238_v23 = vld [vmem:[#allocation2 + $0xb0] sm:$0xff]  ;;  %v1409_v27 = vadd.f32 %v2384_v9, %v1338_v15  ;;  %v1336_v29 = vmul.f32 %v2377_v1, %v1265_v22  ;;  %v427_v2 = vld [vmem:[#allocation2 + $0x1c8] sm:$0xff] }
 0x114   : > { %v1053_v18 = vpop.f32.mrf.mxu1  ;;  %v1988_v20 = vpop.eup %1987  ;;  %1529 = vst.msk [vmem:[%s2431_s15 + $0x158] sm:$0xff] %vm305_vm1, %v1986_v13  ;;  %1175 = vst.msk [vmem:[#allocation2 + $0xd0] sm:$0xff] %vm305_vm1, %v1110_v11  ;;  %v1108_v24 = vadd.f32 %v925_v17, %v394_v4  ;;  %2013 = vtanh.f32 %v1406_v14  ;;  %v1375_v28 = vadd.f32 %v2384_v9, %v1304_v16  ;;  %v1270_v30 = vld [vmem:[#allocation2 + $0x1b0] sm:$0xff]  ;;  %v1309_v34 = vmul.f32 %v2377_v1, %v1238_v23 }
 0x115   : > { %1207 = vst.msk [vmem:[#allocation2 + $0x1d0] sm:$0xff] %vm305_vm1, %v1142_v12  ;;  %v1140_v25 = vadd.f32 %v1053_v18, %v426_v5  ;;  %v1990_v26 = vpop.eup %1989  ;;  %1495 = vst.msk [vmem:[%s2431_s15 + $0x48] sm:$0xff] %vm305_vm1, %v1988_v20  ;;  %v1832_v31 = vpop.f32.mrf.mxu0  ;;  %2015 = vtanh.f32 %v1377_v21  ;;  %v1341_v35 = vmul.f32 %v2377_v1, %v1270_v30  ;;  %v1236_v36 = vld [vmem:[#allocation2 + $0xa0] sm:$0xff]  ;;  %v1407_v40 = vadd.f32 %v2384_v9, %v1336_v29  ;;  %v400_v3 = vld [vmem:[#allocation2 + $0xf0] sm:$0xff] }
 0x116   : > { %v1864_v32 = vpop.f32.mrf.mxu1  ;;  %v1992_v33 = vpop.eup %1991  ;;  %1527 = vst.msk [vmem:[%s2431_s15 + $0x148] sm:$0xff] %vm305_vm1, %v1990_v26  ;;  %v1268_v37 = vld [vmem:[#allocation2 + $0x1a0] sm:$0xff]  ;;  %1173 = vst.msk [vmem:[#allocation2 + $0xc0] sm:$0xff] %vm305_vm1, %v1108_v24  ;;  %v1111_v38 = vadd.f32 %v1832_v31, %v397_v19  ;;  %2017 = vtanh.f32 %v1409_v27  ;;  %v1307_v41 = vmul.f32 %v2377_v1, %v1236_v36  ;;  %v1380_v48 = vadd.f32 %v2384_v9, %v1309_v34  ;;  %v432_v17 = vld [vmem:[#allocation2 + $0x1f0] sm:$0xff] }
 0x117   : > { %1205 = vst.msk [vmem:[#allocation2 + $0x1c0] sm:$0xff] %vm305_vm1, %v1140_v25  ;;  %v1994_v39 = vpop.eup %1993  ;;  %1500 = vst.msk [vmem:[%s2431_s15 + $0x70] sm:$0xff] %vm305_vm1, %v1992_v33  ;;  %v1339_v42 = vmul.f32 %v2377_v1, %v1268_v37  ;;  %v1239_v43 = vld [vmem:[#allocation2 + $0xb8] sm:$0xff]  ;;  %v928_v45 = vpop.f32.mrf.mxu0  ;;  %2019 = vtanh.f32 %v1375_v28  ;;  %v1412_v49 = vadd.f32 %v2384_v9, %v1341_v35  ;;  %v1143_v8 = vadd.f32 %v1864_v32, %v429_v51  ;;  %v398_v18 = vld [vmem:[#allocation2 + $0xe0] sm:$0xff] }
 0x118   : > { %v1271_v44 = vld [vmem:[#allocation2 + $0x1b8] sm:$0xff]  ;;  %v1056_v46 = vpop.f32.mrf.mxu1  ;;  %v1996_v47 = vpop.eup %1995  ;;  %1532 = vst.msk [vmem:[%s2431_s15 + $0x170] sm:$0xff] %vm305_vm1, %v1994_v39  ;;  %v1310_v50 = vmul.f32 %v2377_v1, %v1239_v43  ;;  %1176 = vst.msk [vmem:[#allocation2 + $0xd8] sm:$0xff] %vm305_vm1, %v1111_v38  ;;  %2021 = vtanh.f32 %v1407_v40  ;;  %v1378_v54 = vadd.f32 %v2384_v9, %v1307_v41  ;;  %v1109_v10 = vadd.f32 %v928_v45, %v395_v52  ;;  %v430_v31 = vld [vmem:[#allocation2 + $0x1e0] sm:$0xff] }
 0x119   : > { %v1998_v53 = vpop.eup %1997  ;;  %1498 = vst.msk [vmem:[%s2431_s15 + $0x60] sm:$0xff] %vm305_vm1, %v1996_v47  ;;  %v1410_v55 = vadd.f32 %v2384_v9, %v1339_v42  ;;  %v1342_v56 = vmul.f32 %v2377_v1, %v1271_v44  ;;  %v1237_v57 = vld [vmem:[#allocation2 + $0xa8] sm:$0xff]  ;;  %v1835_v59 = vpop.f32.mrf.mxu0  ;;  %2023 = vtanh.f32 %v1380_v48  ;;  %1208 = vst.msk [vmem:[#allocation2 + $0x1d8] sm:$0xff] %vm305_vm1, %v1143_v8  ;;  %v1141_v23 = vadd.f32 %v1056_v46, %v427_v2  ;;  %v401_v32 = vld [vmem:[#allocation2 + $0xf8] sm:$0xff] }
 0x11a   : > { %v1269_v58 = vld [vmem:[#allocation2 + $0x1a8] sm:$0xff]  ;;  %v1867_v60 = vpop.f32.mrf.mxu1  ;;  %v2000_v61 = vpop.eup %1999  ;;  %1530 = vst.msk [vmem:[%s2431_s15 + $0x160] sm:$0xff] %vm305_vm1, %v1998_v53  ;;  %v1381_v62 = vadd.f32 %v2384_v9, %v1310_v50  ;;  %v1308_v63 = vmul.f32 %v2377_v1, %v1237_v57  ;;  %2025 = vtanh.f32 %v1412_v49  ;;  %1174 = vst.msk [vmem:[#allocation2 + $0xc8] sm:$0xff] %vm305_vm1, %v1109_v10  ;;  %v1114_v24 = vadd.f32 %v1835_v59, %v400_v3  ;;  %v433_v33 = vld [vmem:[#allocation2 + $0x1f8] sm:$0xff] }
 0x11b   : > { %v1340_v0 = vmul.f32 %v2377_v1, %v1269_v58  ;;  %v2002_v4 = vpop.eup %2001  ;;  %1501 = vst.msk [vmem:[%s2431_s15 + $0x78] sm:$0xff] %vm305_vm1, %v2000_v61  ;;  %v1413_v5 = vadd.f32 %v2384_v9, %v1342_v56  ;;  %v1242_v6 = vld [vmem:[#allocation2 + $0xd0] sm:$0xff]  ;;  %v941_v11 = vpop.f32.mrf.mxu0  ;;  %2027 = vtanh.f32 %v1378_v54  ;;  %1206 = vst.msk [vmem:[#allocation2 + $0x1c8] sm:$0xff] %vm305_vm1, %v1141_v23  ;;  %v1146_v36 = vadd.f32 %v1867_v60, %v432_v17  ;;  %v399_v38 = vld [vmem:[#allocation2 + $0xe8] sm:$0xff] }
 0x11c   : > { %v1274_v7 = vld [vmem:[#allocation2 + $0x1d0] sm:$0xff]  ;;  %v1069_v12 = vpop.f32.mrf.mxu1  ;;  %v2004_v13 = vpop.eup %2003  ;;  %1533 = vst.msk [vmem:[%s2431_s15 + $0x178] sm:$0xff] %vm305_vm1, %v2002_v4  ;;  %v1379_v14 = vadd.f32 %v2384_v9, %v1308_v63  ;;  %v1313_v16 = vmul.f32 %v2377_v1, %v1242_v6  ;;  %2029 = vtanh.f32 %v1410_v55  ;;  %1179 = vst.msk [vmem:[#allocation2 + $0xf0] sm:$0xff] %vm305_vm1, %v1114_v24  ;;  %v1112_v37 = vadd.f32 %v941_v11, %v398_v18  ;;  %v431_v40 = vld [vmem:[#allocation2 + $0x1e8] sm:$0xff] }
 0x11d   : > { %v1411_v15 = vadd.f32 %v2384_v9, %v1340_v0  ;;  %v2006_v19 = vpop.eup %2005  ;;  %1499 = vst.msk [vmem:[%s2431_s15 + $0x68] sm:$0xff] %vm305_vm1, %v2004_v13  ;;  %v1345_v20 = vmul.f32 %v2377_v1, %v1274_v7  ;;  %v1240_v21 = vld [vmem:[#allocation2 + $0xc0] sm:$0xff]  ;;  %v1836_v25 = vpop.f32.mrf.mxu0  ;;  %2031 = vtanh.f32 %v1381_v62  ;;  %1211 = vst.msk [vmem:[#allocation2 + $0x1f0] sm:$0xff] %vm305_vm1, %v1146_v36  ;;  %v1144_v47 = vadd.f32 %v1069_v12, %v430_v31 }
 0x11e   : > { %v1272_v22 = vld [vmem:[#allocation2 + $0x1c0] sm:$0xff]  ;;  %v1868_v26 = vpop.f32.mrf.mxu1  ;;  %v2008_v27 = vpop.eup %2007  ;;  %1531 = vst.msk [vmem:[%s2431_s15 + $0x168] sm:$0xff] %vm305_vm1, %v2006_v19  ;;  %v1384_v28 = vadd.f32 %v2384_v9, %v1313_v16  ;;  %v1311_v29 = vmul.f32 %v2377_v1, %v1240_v21  ;;  %2033 = vtanh.f32 %v1413_v5  ;;  %1177 = vst.msk [vmem:[#allocation2 + $0xe0] sm:$0xff] %vm305_vm1, %v1112_v37  ;;  %v1115_v48 = vadd.f32 %v1836_v25, %v401_v32 }
 0x11f   : > { %v1343_v30 = vmul.f32 %v2377_v1, %v1272_v22  ;;  %1504 = vst.msk [vmem:[%s2431_s15 + $0x90] sm:$0xff] %vm305_vm1, %v2008_v27  ;;  %v1416_v34 = vadd.f32 %v2384_v9, %v1345_v20  ;;  %v1243_v35 = vld [vmem:[#allocation2 + $0xd8] sm:$0xff]  ;;  %v944_v39 = vpop.f32.mrf.mxu0  ;;  %v2010_v42 = vpop.eup %2009  ;;  %2035 = vtanh.f32 %v1379_v14  ;;  %v1147_v49 = vadd.f32 %v1868_v26, %v433_v33  ;;  %1209 = vst.msk [vmem:[#allocation2 + $0x1e0] sm:$0xff] %vm305_vm1, %v1144_v47  ;;  %v2071_v57 = vld [vmem:[%s2699_s2] ss:$0 sm:$0xff] }
 0x120   : > { %v1072_v41 = vpop.f32.mrf.mxu1  ;;  %v1382_v43 = vadd.f32 %v2384_v9, %v1311_v29  ;;  %v1314_v45 = vmul.f32 %v2377_v1, %v1243_v35  ;;  %v2012_v46 = vpop.eup %2011  ;;  %1536 = vst.msk [vmem:[%s2431_s15 + $0x190] sm:$0xff] %vm305_vm1, %v2010_v42  ;;  %2037 = vtanh.f32 %v1411_v15  ;;  %v1113_v1 = vadd.f32 %v944_v39, %v399_v38  ;;  %1180 = vst.msk [vmem:[#allocation2 + $0xf8] sm:$0xff] %vm305_vm1, %v1115_v48  ;;  %v1275_v55 = vld [vmem:[#allocation2 + $0x1d8] sm:$0xff]  ;;  %v2072_v0 = vld [vmem:[%s2700_s3] ss:$0 sm:$0xff] }
 0x121   : > { %v1414_v44 = vadd.f32 %v2384_v9, %v1343_v30  ;;  %v2014_v50 = vpop.eup %2013  ;;  %1502 = vst.msk [vmem:[%s2431_s15 + $0x80] sm:$0xff] %vm305_vm1, %v2012_v46  ;;  %2039 = vtanh.f32 %v1384_v28  ;;  %v1145_v52 = vadd.f32 %v1072_v41, %v431_v40  ;;  %1212 = vst.msk [vmem:[#allocation2 + $0x1f8] sm:$0xff] %vm305_vm1, %v1147_v49  ;;  %v1346_v58 = vmul.f32 %v2071_v57, %v1275_v55 }
 0x122   : > { %v1385_v51 = vadd.f32 %v2384_v9, %v1314_v45  ;;  %v2016_v53 = vpop.eup %2015  ;;  %1534 = vst.msk [vmem:[%s2431_s15 + $0x180] sm:$0xff] %vm305_vm1, %v2014_v50  ;;  %2041 = vtanh.f32 %v1416_v34  ;;  %v1241_v9 = vld [vmem:[#allocation2 + $0xc8] sm:$0xff]  ;;  %1178 = vst.msk [vmem:[#allocation2 + $0xe8] sm:$0xff] %vm305_vm1, %v1113_v1 }
 0x123   : > { %v2018_v54 = vpop.eup %2017  ;;  %1505 = vst.msk [vmem:[%s2431_s15 + $0x98] sm:$0xff] %vm305_vm1, %v2016_v53  ;;  %2043 = vtanh.f32 %v1382_v43  ;;  %1210 = vst.msk [vmem:[#allocation2 + $0x1e8] sm:$0xff] %vm305_vm1, %v1145_v52  ;;  %v1312_v59 = vmul.f32 %v2071_v57, %v1241_v9  ;;  %v1273_v61 = vld [vmem:[#allocation2 + $0x1c8] sm:$0xff]  ;;  %v1246_v62 = vld [vmem:[#allocation2 + $0xf0] sm:$0xff]  ;;  %v1417_v2 = vadd.f32 %v2072_v0, %v1346_v58 }
 0x124   : > { %v2020_v56 = vpop.eup %2019  ;;  %1537 = vst.msk [vmem:[%s2431_s15 + $0x198] sm:$0xff] %vm305_vm1, %v2018_v54  ;;  %2045 = vtanh.f32 %v1414_v44  ;;  %v1344_v4 = vmul.f32 %v2071_v57, %v1273_v61  ;;  %v1317_v5 = vmul.f32 %v2071_v57, %v1246_v62  ;;  %v1278_v7 = vld [vmem:[#allocation2 + $0x1f0] sm:$0xff] }
 0x125   : > { %v2022_v60 = vpop.eup %2021  ;;  %1503 = vst.msk [vmem:[%s2431_s15 + $0x88] sm:$0xff] %vm305_vm1, %v2020_v56  ;;  %2047 = vtanh.f32 %v1385_v51  ;;  %v1383_v3 = vadd.f32 %v2072_v0, %v1312_v59  ;;  %v1244_v8 = vld [vmem:[#allocation2 + $0xe0] sm:$0xff]  ;;  %v1349_v13 = vmul.f32 %v2071_v57, %v1278_v7 }
 0x126   : > { %v2024_v63 = vpop.eup %2023  ;;  %1535 = vst.msk [vmem:[%s2431_s15 + $0x188] sm:$0xff] %vm305_vm1, %v2022_v60  ;;  %2049 = vtanh.f32 %v1417_v2  ;;  %v1415_v11 = vadd.f32 %v2072_v0, %v1344_v4  ;;  %v1388_v12 = vadd.f32 %v2072_v0, %v1317_v5  ;;  %v1315_v15 = vmul.f32 %v2071_v57, %v1244_v8  ;;  %v1276_v16 = vld [vmem:[#allocation2 + $0x1e0] sm:$0xff] }
 0x127   : > { %v2026_v6 = vpop.eup %2025  ;;  %1508 = vst.msk [vmem:[%s2431_s15 + $0xb0] sm:$0xff] %vm305_vm1, %v2024_v63  ;;  %2051 = vtanh.f32 %v1383_v3  ;;  %v1247_v17 = vld [vmem:[#allocation2 + $0xf8] sm:$0xff]  ;;  %v1420_v20 = vadd.f32 %v2072_v0, %v1349_v13  ;;  %v1347_v21 = vmul.f32 %v2071_v57, %v1276_v16 }
 0x128   : > { %v2028_v10 = vpop.eup %2027  ;;  %1540 = vst.msk [vmem:[%s2431_s15 + $0x1b0] sm:$0xff] %vm305_vm1, %v2026_v6  ;;  %v1279_v18 = vld [vmem:[#allocation2 + $0x1f8] sm:$0xff]  ;;  %2053 = vtanh.f32 %v1415_v11  ;;  %v1318_v22 = vmul.f32 %v2071_v57, %v1247_v17  ;;  %v1386_v26 = vadd.f32 %v2072_v0, %v1315_v15 }
 0x129   : > { %v2030_v14 = vpop.eup %2029  ;;  %1506 = vst.msk [vmem:[%s2431_s15 + $0xa0] sm:$0xff] %vm305_vm1, %v2028_v10  ;;  %v1245_v23 = vld [vmem:[#allocation2 + $0xe8] sm:$0xff]  ;;  %2055 = vtanh.f32 %v1388_v12  ;;  %v1350_v27 = vmul.f32 %v2071_v57, %v1279_v18  ;;  %v1418_v30 = vadd.f32 %v2072_v0, %v1347_v21 }
 0x12a   : > { %v2032_v19 = vpop.eup %2031  ;;  %1538 = vst.msk [vmem:[%s2431_s15 + $0x1a0] sm:$0xff] %vm305_vm1, %v2030_v14  ;;  %v1277_v24 = vld [vmem:[#allocation2 + $0x1e8] sm:$0xff]  ;;  %v1316_v28 = vmul.f32 %v2071_v57, %v1245_v23  ;;  %2057 = vtanh.f32 %v1420_v20  ;;  %v1389_v31 = vadd.f32 %v2072_v0, %v1318_v22 }
 0x12b   : > { %v2034_v25 = vpop.eup %2033  ;;  %1509 = vst.msk [vmem:[%s2431_s15 + $0xb8] sm:$0xff] %vm305_vm1, %v2032_v19  ;;  %v1348_v32 = vmul.f32 %v2071_v57, %v1277_v24  ;;  %2059 = vtanh.f32 %v1386_v26  ;;  %v1421_v34 = vadd.f32 %v2072_v0, %v1350_v27 }
 0x12c   : > { %v2036_v29 = vpop.eup %2035  ;;  %1541 = vst.msk [vmem:[%s2431_s15 + $0x1b8] sm:$0xff] %vm305_vm1, %v2034_v25  ;;  %v1387_v35 = vadd.f32 %v2072_v0, %v1316_v28  ;;  %2061 = vtanh.f32 %v1418_v30 }
 0x12d   : > { %v2038_v33 = vpop.eup %2037  ;;  %1507 = vst.msk [vmem:[%s2431_s15 + $0xa8] sm:$0xff] %vm305_vm1, %v2036_v29  ;;  %v1419_v37 = vadd.f32 %v2072_v0, %v1348_v32  ;;  %2063 = vtanh.f32 %v1389_v31 }
 0x12e   : > { %v2040_v36 = vpop.eup %2039  ;;  %1539 = vst.msk [vmem:[%s2431_s15 + $0x1a8] sm:$0xff] %vm305_vm1, %v2038_v33  ;;  %2065 = vtanh.f32 %v1421_v34 }
 0x12f   : > { %v2042_v38 = vpop.eup %2041  ;;  %1512 = vst.msk [vmem:[%s2431_s15 + $0xd0] sm:$0xff] %vm305_vm1, %v2040_v36  ;;  %2067 = vtanh.f32 %v1387_v35 }
 0x130   : > { %v2044_v39 = vpop.eup %2043  ;;  %1544 = vst.msk [vmem:[%s2431_s15 + $0x1d0] sm:$0xff] %vm305_vm1, %v2042_v38  ;;  %2069 = vtanh.f32 %v1419_v37 }
 0x131   : > { %v2046_v40 = vpop.eup %2045  ;;  %1510 = vst.msk [vmem:[%s2431_s15 + $0xc0] sm:$0xff] %vm305_vm1, %v2044_v39 }
 0x132   : > { %v2048_v41 = vpop.eup %2047  ;;  %1542 = vst.msk [vmem:[%s2431_s15 + $0x1c0] sm:$0xff] %vm305_vm1, %v2046_v40 }
 0x133   : > { %1513 = vst.msk [vmem:[%s2431_s15 + $0xd8] sm:$0xff] %vm305_vm1, %v2048_v41  ;;  %v2050_v42 = vpop.eup %2049 }
 0x134   : > { %v2052_v43 = vpop.eup %2051  ;;  %1545 = vst.msk [vmem:[%s2431_s15 + $0x1d8] sm:$0xff] %vm305_vm1, %v2050_v42 }
 0x135   : > { %v2054_v44 = vpop.eup %2053  ;;  %1511 = vst.msk [vmem:[%s2431_s15 + $0xc8] sm:$0xff] %vm305_vm1, %v2052_v43 }
 0x136   : > { %v2056_v45 = vpop.eup %2055  ;;  %1543 = vst.msk [vmem:[%s2431_s15 + $0x1c8] sm:$0xff] %vm305_vm1, %v2054_v44 }
 0x137   : > { %v2058_v46 = vpop.eup %2057  ;;  %1516 = vst.msk [vmem:[%s2431_s15 + $0xf0] sm:$0xff] %vm305_vm1, %v2056_v45 }
 0x138   : > { %v2060_v47 = vpop.eup %2059  ;;  %1548 = vst.msk [vmem:[%s2431_s15 + $0x1f0] sm:$0xff] %vm305_vm1, %v2058_v46 }
 0x139   : > { %v2062_v48 = vpop.eup %2061  ;;  %1514 = vst.msk [vmem:[%s2431_s15 + $0xe0] sm:$0xff] %vm305_vm1, %v2060_v47 }
 0x13a   : > { %v2064_v49 = vpop.eup %2063  ;;  %1546 = vst.msk [vmem:[%s2431_s15 + $0x1e0] sm:$0xff] %vm305_vm1, %v2062_v48 }
 0x13b   : > { %v2066_v50 = vpop.eup %2065  ;;  %1517 = vst.msk [vmem:[%s2431_s15 + $0xf8] sm:$0xff] %vm305_vm1, %v2064_v49 }
 0x13c   : > { %v2068_v51 = vpop.eup %2067  ;;  %1549 = vst.msk [vmem:[%s2431_s15 + $0x1f8] sm:$0xff] %vm305_vm1, %v2066_v50 }
 0x13d   : > { %v2070_v1 = vpop.eup %2069  ;;  %1515 = vst.msk [vmem:[%s2431_s15 + $0xe8] sm:$0xff] %vm305_vm1, %v2068_v51 }
 0x13e   : > { %1547 = vst.msk [vmem:[%s2431_s15 + $0x1e8] sm:$0xff] %vm305_vm1, %v2070_v1 }
 0x13f PF: > { %s14_s17 = sadd.s32 1, %s2095_s17   ;;  %s2702_s15 = smov %s2091_s16 }
 0x140   : > { %p11_p5 = scmp.ge.s32.totalorder %s14_s17, 6   ;;  %s2703_s16 = smov %s2705_s18 }
 0x142   :  { %13 = sbr.rel (!%p11_p5) target bundleno = 2 (0x2), region = 83 }

</bundles_post_ra>
